<compile_context>
chip_gen: v7x
topology: tpu7x:2x2x1
jax: 0.10.0
libtpu: 0.0.40
codegen_flags: <defaults>
</compile_context>

<pallas_src>
import functools

import jax
import jax.numpy as jnp
from jax.experimental import pallas as pl
from jax.experimental.pallas import tpu as pltpu


_TAPS = tuple((dh, dw) for dh in range(3) for dw in range(3))
_SUBLANE_BF16 = 16  # bf16 second-minor tile


# --------------------------------------------------------------------------
# Fused Pallas kernel: conv1 -> maxpool -> conv2 -> avgpool -> dropout -> fc
# --------------------------------------------------------------------------

def fused_forward_kernel(xcol_ref, w1_ref, b1_ref, w2_ref, b2_ref,
                         fcw_ref, fcb_ref, mask_ref, out_ref,
                         y1_ref, hrow_ref, y2pad_ref, col2_ref):
    """Entire ModifiedGoogLeNet forward; every activation stays in VMEM."""
    B, H, W, C1 = y1_ref.shape
    Hh, Wh = H // 2, W // 2
    C2 = w2_ref.shape[-1]

    # ---- conv1: ONE im2col matmul (K = 9*Cin), bias + ReLU in f32 ---------
    y1 = jnp.dot(xcol_ref[...], w1_ref[...],
                 preferred_element_type=jnp.float32)          # [B*H*W, C1]
    y1 = jnp.maximum(y1 + b1_ref[...], 0.0)
    y1_ref[...] = y1.reshape(B, H, W, C1)                     # leading-dim split

    # ---- maxpool 2x2 / s2, in f32, entirely in VMEM ------------------------
    # H pool: stride-2 reads on a non-minor axis (cheap addressing).
    hrow_ref[...] = jnp.maximum(y1_ref[:, pl.ds(0, Hh, stride=2), :, :],
                                y1_ref[:, pl.ds(1, Hh, stride=2), :, :])
    # W pool: one sublane-strided pass over the already-halved activation.
    pooled = jnp.maximum(hrow_ref[:, :, pl.ds(0, Wh, stride=2), :],
                         hrow_ref[:, :, pl.ds(1, Wh, stride=2), :])

    # ---- padded conv2 input: zero ONLY the halo the taps read --------------
    wpad = y2pad_ref.shape[2]
    zrow = jnp.zeros((B, 1, wpad, C1), y2pad_ref.dtype)        # full-width -> unmasked
    zcol = jnp.zeros((B, Hh, 1, C1), y2pad_ref.dtype)
    y2pad_ref[:, 0:1, :, :] = zrow                             # top halo row
    y2pad_ref[:, Hh + 1:Hh + 2, :, :] = zrow                   # bottom halo row
    y2pad_ref[:, 1:Hh + 1, 0:1, :] = zcol                      # left halo col
    y2pad_ref[:, 1:Hh + 1, Wh + 1:Wh + 2, :] = zcol            # right halo col
    # interior written exactly once (downcast to bf16 only here)
    y2pad_ref[:, 1:Hh + 1, 1:Wh + 1, :] = pooled.astype(y2pad_ref.dtype)

    # ---- conv2: pack 9 taps along K (lane-aligned 128-wide writes), then ---
    # ---- ONE K = 9*C1 bf16 matmul with f32 accumulation --------------------
    for t, (dh, dw) in enumerate(_TAPS):
        tap = y2pad_ref[:, dh:dh + Hh, dw:dw + Wh, :].reshape(B * Hh * Wh, C1)
        col2_ref[:, t * C1:(t + 1) * C1] = tap
    y2 = jnp.dot(col2_ref[...], w2_ref[...],
                 preferred_element_type=jnp.float32)           # [B*Hh*Wh, C2]
    y2 = jnp.maximum(y2 + b2_ref[...], 0.0)

    # ---- adaptive avg pool to 1x1 -> flatten -> [B, in_features] ----------
    feat = jnp.mean(y2.reshape(B, Hh * Wh, C2), axis=1)

    # ---- dropout(p=0.5) via precomputed scaled mask, then fc (f32) --------
    feat = feat * mask_ref[...]
    out_ref[...] = (jnp.dot(feat, fcw_ref[...],
                            preferred_element_type=jnp.float32)
                    + fcb_ref[...])


# --------------------------------------------------------------------------
# pallas_call wrapper (whole-array VMEM blocks; tiny model fits easily)
# --------------------------------------------------------------------------

def _vmem_spec():
    return pl.BlockSpec(memory_space=pltpu.MemorySpace.VMEM)


def pallas_googlenet_forward(x_col, w1, b1, w2, b2, fcw, fcb, mask,
                             *, B, H, W, C1):
    Hh, Wh = H // 2, W // 2
    N = fcw.shape[-1]
    # Round the padded-W (sublane) dim up to the bf16 tile so halo-row stores
    # and dw-shifted tap reads stay within a fully tiled buffer.
    wpad = ((Wh + 2 + _SUBLANE_BF16 - 1) // _SUBLANE_BF16) * _SUBLANE_BF16
    return pl.pallas_call(
        fused_forward_kernel,
        out_shape=jax.ShapeDtypeStruct((B, N), jnp.float32),
        in_specs=[_vmem_spec()] * 8,
        out_specs=_vmem_spec(),
        scratch_shapes=[
            pltpu.VMEM((B, H, W, C1), jnp.float32),            # conv1 output (f32)
            pltpu.VMEM((B, Hh, W, C1), jnp.float32),           # H-pooled rows (f32)
            pltpu.VMEM((B, Hh + 2, wpad, C1), jnp.bfloat16),   # padded conv2 input
            pltpu.VMEM((B * Hh * Wh, 9 * C1), jnp.bfloat16),   # conv2 im2col (K pack)
        ],
        compiler_params=pltpu.CompilerParams(
            vmem_limit_bytes=32 * 1024 * 1024),
    )(x_col, w1, b1, w2, b2, fcw, fcb, mask)


# --------------------------------------------------------------------------
# Glue: params, dropout mask, forward
# --------------------------------------------------------------------------

def init_params(key, c_in=4, c1=128, c2=128, num_classes=2):
    # c1/c2 chosen lane-dense (multiples of 128) so conv matmuls fill lanes.
    # NOTE: real PyTorch conv weights are (Cout, Cin, kh, kw); they must be
    # permuted to (kh*kw, Cin, Cout) before use with this kernel.
    ks = jax.random.split(key, 6)
    s = 0.1
    return {
        "conv1_w": (s * jax.random.normal(ks[0], (9, c_in, c1))).astype(jnp.bfloat16),
        "conv1_b": s * jax.random.normal(ks[1], (1, c1), jnp.float32),
        "conv2_w": (s * jax.random.normal(ks[2], (9, c1, c2))).astype(jnp.bfloat16),
        "conv2_b": s * jax.random.normal(ks[3], (1, c2), jnp.float32),
        # self.fc = nn.Linear(original_model.fc.in_features, 2)  (kept f32)
        "fc_w": s * jax.random.normal(ks[4], (c2, num_classes), jnp.float32),
        "fc_b": s * jax.random.normal(ks[5], (1, num_classes), jnp.float32),
    }


@functools.partial(jax.jit, static_argnames=("training",))
def modified_googlenet_forward(x_nchw, params, dropout_rng=None, *, training=False):
    # NCHW (PyTorch) -> NHWC (channels on the lane axis); pad the 3x3 halo once.
    x = jnp.transpose(x_nchw, (0, 2, 3, 1)).astype(jnp.bfloat16)
    B, H, W, Cin = x.shape
    xpad = jnp.pad(x, ((0, 0), (1, 1), (1, 1), (0, 0)))
    # conv1 im2col built once by XLA: the kernel does a single K = 9*Cin matmul.
    x_col = jnp.concatenate(
        [xpad[:, dh:dh + H, dw:dw + W, :] for dh, dw in _TAPS],
        axis=-1).reshape(B * H * W, 9 * Cin)

    c1 = params["conv1_w"].shape[-1]
    c2 = params["conv2_w"].shape[-1]
    w1 = params["conv1_w"].reshape(9 * Cin, c1)    # (tap, cin) contraction order
    w2 = params["conv2_w"].reshape(9 * c1, c2)     # matches in-kernel K packing

    if training:
        # TODO(synk): PyTorch's Bernoulli RNG stream cannot be reproduced
        # bit-for-bit; the inverted-dropout mask is drawn with jax.random
        # outside the kernel (identity in eval, matching nn.Dropout).
        keep = jax.random.bernoulli(dropout_rng, 0.5, (B, c2))
        mask = keep.astype(jnp.float32) * 2.0              # scale by 1/(1-p)
    else:
        mask = jnp.ones((B, c2), jnp.float32)

    return pallas_googlenet_forward(
        x_col, w1, params["conv1_b"], w2, params["conv2_b"],
        params["fc_w"], params["fc_b"], mask,
        B=B, H=H, W=W, C1=c1)


# --------------------------------------------------------------------------
# Main
# --------------------------------------------------------------------------

if __name__ == "__main__":
    key = jax.random.PRNGKey(0)
    k_x, k_p = jax.random.split(key)

    B, C, H, W = 2, 4, 16, 16                     # small NCHW input
    x = jax.random.normal(k_x, (B, C, H, W), dtype=jnp.float32)

    params = init_params(k_p, c_in=C, c1=128, c2=128, num_classes=2)

    out = modified_googlenet_forward(x, params, training=False)
    out = jax.block_until_ready(out)

    assert out.shape == (B, 2), out.shape
    assert out.dtype == jnp.float32, out.dtype
    assert bool(jnp.all(jnp.isfinite(out))), "non-finite output"
    print("KERNEL_OK")
</pallas_src>

<mosaic_0001>
module attributes {stable_mosaic.version = 11 : i64} {
  func.func @fused_forward_kernel(%arg0: memref<512x36xbf16, #tpu.memory_space<vmem>>, %arg1: memref<36x128xbf16, #tpu.memory_space<vmem>>, %arg2: memref<1x128xf32, #tpu.memory_space<vmem>>, %arg3: memref<1152x128xbf16, #tpu.memory_space<vmem>>, %arg4: memref<1x128xf32, #tpu.memory_space<vmem>>, %arg5: memref<128x2xf32, #tpu.memory_space<vmem>>, %arg6: memref<1x2xf32, #tpu.memory_space<vmem>>, %arg7: memref<2x128xf32, #tpu.memory_space<vmem>>, %arg8: memref<2x2xf32, #tpu.memory_space<vmem>>, %arg9: memref<2x16x16x128xf32, #tpu.memory_space<vmem>>, %arg10: memref<2x8x16x128xf32, #tpu.memory_space<vmem>>, %arg11: memref<2x10x16x128xbf16, #tpu.memory_space<vmem>>, %arg12: memref<128x1152xbf16, #tpu.memory_space<vmem>>) attributes {dimension_semantics = [], scalar_prefetch = 0 : i64, scratch_operands = 4 : i64, tpu.core_type = #tpu.core_type<tc>} {
    %c0 = arith.constant 0 : index
    %c0_0 = arith.constant 0 : index
    %0 = vector.load %arg0[%c0, %c0_0] : memref<512x36xbf16, #tpu.memory_space<vmem>>, vector<512x36xbf16>
    %c0_1 = arith.constant 0 : index
    %c0_2 = arith.constant 0 : index
    %1 = vector.load %arg1[%c0_1, %c0_2] : memref<36x128xbf16, #tpu.memory_space<vmem>>, vector<36x128xbf16>
    %cst = arith.constant dense<0.000000e+00> : vector<512x128xf32>
    %2 = tpu.matmul %0, %1, %cst {dimension_numbers = #tpu.dot_dimension_numbers<[1], [0], [0], [1], [0, 0, 1, 1], [], []>} : vector<512x36xbf16>, vector<36x128xbf16>, vector<512x128xf32> -> vector<512x128xf32>
    %c0_3 = arith.constant 0 : index
    %c0_4 = arith.constant 0 : index
    %3 = vector.load %arg2[%c0_3, %c0_4] : memref<1x128xf32, #tpu.memory_space<vmem>>, vector<1x128xf32>
    %4 = vector.broadcast %3 : vector<1x128xf32> to vector<512x128xf32>
    %5 = arith.addf %2, %4 : vector<512x128xf32>
    %cst_5 = arith.constant 0.000000e+00 : f32
    %6 = vector.broadcast %cst_5 : f32 to vector<512x128xf32>
    %7 = arith.maximumf %5, %6 : vector<512x128xf32>
    %8 = vector.shape_cast %7 : vector<512x128xf32> to vector<2x16x16x128xf32>
    %c0_6 = arith.constant 0 : index
    %c0_7 = arith.constant 0 : index
    %c0_8 = arith.constant 0 : index
    %c0_9 = arith.constant 0 : index
    %9 = vector.load %arg9[%c0_6, %c0_7, %c0_8, %c0_9] : memref<2x16x16x128xf32, #tpu.memory_space<vmem>>, vector<2x16x16x128xf32>
    tpu.vector_store %arg9[%c0_6, %c0_7, %c0_8, %c0_9], %8 {strides = array<i32>} : memref<2x16x16x128xf32, #tpu.memory_space<vmem>>, vector<2x16x16x128xf32>,
    %c0_10 = arith.constant 0 : index
    %c0_11 = arith.constant 0 : index
    %c0_12 = arith.constant 0 : index
    %c0_13 = arith.constant 0 : index
    %10 = tpu.strided_load %arg9[%c0_10, %c0_11, %c0_12, %c0_13] {strides = array<i32: 1, 2, 1, 1>} : memref<2x16x16x128xf32, #tpu.memory_space<vmem>>, vector<2x8x16x128xf32>
    %c0_14 = arith.constant 0 : index
    %c1 = arith.constant 1 : index
    %c0_15 = arith.constant 0 : index
    %c0_16 = arith.constant 0 : index
    %11 = tpu.strided_load %arg9[%c0_14, %c1, %c0_15, %c0_16] {strides = array<i32: 1, 2, 1, 1>} : memref<2x16x16x128xf32, #tpu.memory_space<vmem>>, vector<2x8x16x128xf32>
    %12 = arith.maximumf %10, %11 : vector<2x8x16x128xf32>
    %c0_17 = arith.constant 0 : index
    %c0_18 = arith.constant 0 : index
    %c0_19 = arith.constant 0 : index
    %c0_20 = arith.constant 0 : index
    %13 = vector.load %arg10[%c0_17, %c0_18, %c0_19, %c0_20] : memref<2x8x16x128xf32, #tpu.memory_space<vmem>>, vector<2x8x16x128xf32>
    tpu.vector_store %arg10[%c0_17, %c0_18, %c0_19, %c0_20], %12 {strides = array<i32>} : memref<2x8x16x128xf32, #tpu.memory_space<vmem>>, vector<2x8x16x128xf32>,
    %c0_21 = arith.constant 0 : index
    %c0_22 = arith.constant 0 : index
    %c0_23 = arith.constant 0 : index
    %c0_24 = arith.constant 0 : index
    %14 = tpu.strided_load %arg10[%c0_21, %c0_22, %c0_23, %c0_24] {strides = array<i32: 1, 1, 2, 1>} : memref<2x8x16x128xf32, #tpu.memory_space<vmem>>, vector<2x8x8x128xf32>
    %c0_25 = arith.constant 0 : index
    %c0_26 = arith.constant 0 : index
    %c1_27 = arith.constant 1 : index
    %c0_28 = arith.constant 0 : index
    %15 = tpu.strided_load %arg10[%c0_25, %c0_26, %c1_27, %c0_28] {strides = array<i32: 1, 1, 2, 1>} : memref<2x8x16x128xf32, #tpu.memory_space<vmem>>, vector<2x8x8x128xf32>
    %16 = arith.maximumf %14, %15 : vector<2x8x8x128xf32>
    %cst_29 = arith.constant 0.000000e+00 : bf16
    %17 = vector.broadcast %cst_29 : bf16 to vector<2x1x16x128xbf16>
    %cst_30 = arith.constant 0.000000e+00 : bf16
    %18 = vector.broadcast %cst_30 : bf16 to vector<2x8x1x128xbf16>
    %c0_31 = arith.constant 0 : index
    %c0_32 = arith.constant 0 : index
    %c0_33 = arith.constant 0 : index
    %c0_34 = arith.constant 0 : index
    %19 = vector.load %arg11[%c0_31, %c0_32, %c0_33, %c0_34] : memref<2x10x16x128xbf16, #tpu.memory_space<vmem>>, vector<2x1x16x128xbf16>
    tpu.vector_store %arg11[%c0_31, %c0_32, %c0_33, %c0_34], %17 {strides = array<i32>} : memref<2x10x16x128xbf16, #tpu.memory_space<vmem>>, vector<2x1x16x128xbf16>,
    %c0_35 = arith.constant 0 : index
    %c9 = arith.constant 9 : index
    %c0_36 = arith.constant 0 : index
    %c0_37 = arith.constant 0 : index
    %20 = vector.load %arg11[%c0_35, %c9, %c0_36, %c0_37] : memref<2x10x16x128xbf16, #tpu.memory_space<vmem>>, vector<2x1x16x128xbf16>
    tpu.vector_store %arg11[%c0_35, %c9, %c0_36, %c0_37], %17 {strides = array<i32>} : memref<2x10x16x128xbf16, #tpu.memory_space<vmem>>, vector<2x1x16x128xbf16>,
    %c0_38 = arith.constant 0 : index
    %c1_39 = arith.constant 1 : index
    %c0_40 = arith.constant 0 : index
    %c0_41 = arith.constant 0 : index
    %21 = vector.load %arg11[%c0_38, %c1_39, %c0_40, %c0_41] : memref<2x10x16x128xbf16, #tpu.memory_space<vmem>>, vector<2x8x1x128xbf16>
    tpu.vector_store %arg11[%c0_38, %c1_39, %c0_40, %c0_41], %18 {strides = array<i32>} : memref<2x10x16x128xbf16, #tpu.memory_space<vmem>>, vector<2x8x1x128xbf16>,
    %c0_42 = arith.constant 0 : index
    %c1_43 = arith.constant 1 : index
    %c9_44 = arith.constant 9 : index
    %c0_45 = arith.constant 0 : index
    %22 = vector.load %arg11[%c0_42, %c1_43, %c9_44, %c0_45] : memref<2x10x16x128xbf16, #tpu.memory_space<vmem>>, vector<2x8x1x128xbf16>
    tpu.vector_store %arg11[%c0_42, %c1_43, %c9_44, %c0_45], %18 {strides = array<i32>} : memref<2x10x16x128xbf16, #tpu.memory_space<vmem>>, vector<2x8x1x128xbf16>,
    %23 = arith.truncf %16 : vector<2x8x8x128xf32> to vector<2x8x8x128xbf16>
    %c0_46 = arith.constant 0 : index
    %c1_47 = arith.constant 1 : index
    %c1_48 = arith.constant 1 : index
    %c0_49 = arith.constant 0 : index
    %24 = vector.load %arg11[%c0_46, %c1_47, %c1_48, %c0_49] : memref<2x10x16x128xbf16, #tpu.memory_space<vmem>>, vector<2x8x8x128xbf16>
    tpu.vector_store %arg11[%c0_46, %c1_47, %c1_48, %c0_49], %23 {strides = array<i32>} : memref<2x10x16x128xbf16, #tpu.memory_space<vmem>>, vector<2x8x8x128xbf16>,
    %c0_50 = arith.constant 0 : index
    %c0_51 = arith.constant 0 : index
    %c0_52 = arith.constant 0 : index
    %c0_53 = arith.constant 0 : index
    %25 = vector.load %arg11[%c0_50, %c0_51, %c0_52, %c0_53] : memref<2x10x16x128xbf16, #tpu.memory_space<vmem>>, vector<2x8x8x128xbf16>
    %26 = vector.shape_cast %25 : vector<2x8x8x128xbf16> to vector<128x128xbf16>
    %c0_54 = arith.constant 0 : index
    %c0_55 = arith.constant 0 : index
    %27 = vector.load %arg12[%c0_54, %c0_55] : memref<128x1152xbf16, #tpu.memory_space<vmem>>, vector<128x128xbf16>
    tpu.vector_store %arg12[%c0_54, %c0_55], %26 {strides = array<i32>} : memref<128x1152xbf16, #tpu.memory_space<vmem>>, vector<128x128xbf16>,
    %c0_56 = arith.constant 0 : index
    %c0_57 = arith.constant 0 : index
    %c1_58 = arith.constant 1 : index
    %c0_59 = arith.constant 0 : index
    %28 = vector.load %arg11[%c0_56, %c0_57, %c1_58, %c0_59] : memref<2x10x16x128xbf16, #tpu.memory_space<vmem>>, vector<2x8x8x128xbf16>
    %29 = vector.shape_cast %28 : vector<2x8x8x128xbf16> to vector<128x128xbf16>
    %c0_60 = arith.constant 0 : index
    %c128 = arith.constant 128 : index
    %30 = vector.load %arg12[%c0_60, %c128] : memref<128x1152xbf16, #tpu.memory_space<vmem>>, vector<128x128xbf16>
    tpu.vector_store %arg12[%c0_60, %c128], %29 {strides = array<i32>} : memref<128x1152xbf16, #tpu.memory_space<vmem>>, vector<128x128xbf16>,
    %c0_61 = arith.constant 0 : index
    %c0_62 = arith.constant 0 : index
    %c2 = arith.constant 2 : index
    %c0_63 = arith.constant 0 : index
    %31 = vector.load %arg11[%c0_61, %c0_62, %c2, %c0_63] : memref<2x10x16x128xbf16, #tpu.memory_space<vmem>>, vector<2x8x8x128xbf16>
    %32 = vector.shape_cast %31 : vector<2x8x8x128xbf16> to vector<128x128xbf16>
    %c0_64 = arith.constant 0 : index
    %c256 = arith.constant 256 : index
    %33 = vector.load %arg12[%c0_64, %c256] : memref<128x1152xbf16, #tpu.memory_space<vmem>>, vector<128x128xbf16>
    tpu.vector_store %arg12[%c0_64, %c256], %32 {strides = array<i32>} : memref<128x1152xbf16, #tpu.memory_space<vmem>>, vector<128x128xbf16>,
    %c0_65 = arith.constant 0 : index
    %c1_66 = arith.constant 1 : index
    %c0_67 = arith.constant 0 : index
    %c0_68 = arith.constant 0 : index
    %34 = vector.load %arg11[%c0_65, %c1_66, %c0_67, %c0_68] : memref<2x10x16x128xbf16, #tpu.memory_space<vmem>>, vector<2x8x8x128xbf16>
    %35 = vector.shape_cast %34 : vector<2x8x8x128xbf16> to vector<128x128xbf16>
    %c0_69 = arith.constant 0 : index
    %c384 = arith.constant 384 : index
    %36 = vector.load %arg12[%c0_69, %c384] : memref<128x1152xbf16, #tpu.memory_space<vmem>>, vector<128x128xbf16>
    tpu.vector_store %arg12[%c0_69, %c384], %35 {strides = array<i32>} : memref<128x1152xbf16, #tpu.memory_space<vmem>>, vector<128x128xbf16>,
    %c0_70 = arith.constant 0 : index
    %c1_71 = arith.constant 1 : index
    %c1_72 = arith.constant 1 : index
    %c0_73 = arith.constant 0 : index
    %37 = vector.load %arg11[%c0_70, %c1_71, %c1_72, %c0_73] : memref<2x10x16x128xbf16, #tpu.memory_space<vmem>>, vector<2x8x8x128xbf16>
    %38 = vector.shape_cast %37 : vector<2x8x8x128xbf16> to vector<128x128xbf16>
    %c0_74 = arith.constant 0 : index
    %c512 = arith.constant 512 : index
    %39 = vector.load %arg12[%c0_74, %c512] : memref<128x1152xbf16, #tpu.memory_space<vmem>>, vector<128x128xbf16>
    tpu.vector_store %arg12[%c0_74, %c512], %38 {strides = array<i32>} : memref<128x1152xbf16, #tpu.memory_space<vmem>>, vector<128x128xbf16>,
    %c0_75 = arith.constant 0 : index
    %c1_76 = arith.constant 1 : index
    %c2_77 = arith.constant 2 : index
    %c0_78 = arith.constant 0 : index
    %40 = vector.load %arg11[%c0_75, %c1_76, %c2_77, %c0_78] : memref<2x10x16x128xbf16, #tpu.memory_space<vmem>>, vector<2x8x8x128xbf16>
    %41 = vector.shape_cast %40 : vector<2x8x8x128xbf16> to vector<128x128xbf16>
    %c0_79 = arith.constant 0 : index
    %c640 = arith.constant 640 : index
    %42 = vector.load %arg12[%c0_79, %c640] : memref<128x1152xbf16, #tpu.memory_space<vmem>>, vector<128x128xbf16>
    tpu.vector_store %arg12[%c0_79, %c640], %41 {strides = array<i32>} : memref<128x1152xbf16, #tpu.memory_space<vmem>>, vector<128x128xbf16>,
    %c0_80 = arith.constant 0 : index
    %c2_81 = arith.constant 2 : index
    %c0_82 = arith.constant 0 : index
    %c0_83 = arith.constant 0 : index
    %43 = vector.load %arg11[%c0_80, %c2_81, %c0_82, %c0_83] : memref<2x10x16x128xbf16, #tpu.memory_space<vmem>>, vector<2x8x8x128xbf16>
    %44 = vector.shape_cast %43 : vector<2x8x8x128xbf16> to vector<128x128xbf16>
    %c0_84 = arith.constant 0 : index
    %c768 = arith.constant 768 : index
    %45 = vector.load %arg12[%c0_84, %c768] : memref<128x1152xbf16, #tpu.memory_space<vmem>>, vector<128x128xbf16>
    tpu.vector_store %arg12[%c0_84, %c768], %44 {strides = array<i32>} : memref<128x1152xbf16, #tpu.memory_space<vmem>>, vector<128x128xbf16>,
    %c0_85 = arith.constant 0 : index
    %c2_86 = arith.constant 2 : index
    %c1_87 = arith.constant 1 : index
    %c0_88 = arith.constant 0 : index
    %46 = vector.load %arg11[%c0_85, %c2_86, %c1_87, %c0_88] : memref<2x10x16x128xbf16, #tpu.memory_space<vmem>>, vector<2x8x8x128xbf16>
    %47 = vector.shape_cast %46 : vector<2x8x8x128xbf16> to vector<128x128xbf16>
    %c0_89 = arith.constant 0 : index
    %c896 = arith.constant 896 : index
    %48 = vector.load %arg12[%c0_89, %c896] : memref<128x1152xbf16, #tpu.memory_space<vmem>>, vector<128x128xbf16>
    tpu.vector_store %arg12[%c0_89, %c896], %47 {strides = array<i32>} : memref<128x1152xbf16, #tpu.memory_space<vmem>>, vector<128x128xbf16>,
    %c0_90 = arith.constant 0 : index
    %c2_91 = arith.constant 2 : index
    %c2_92 = arith.constant 2 : index
    %c0_93 = arith.constant 0 : index
    %49 = vector.load %arg11[%c0_90, %c2_91, %c2_92, %c0_93] : memref<2x10x16x128xbf16, #tpu.memory_space<vmem>>, vector<2x8x8x128xbf16>
    %50 = vector.shape_cast %49 : vector<2x8x8x128xbf16> to vector<128x128xbf16>
    %c0_94 = arith.constant 0 : index
    %c1024 = arith.constant 1024 : index
    %51 = vector.load %arg12[%c0_94, %c1024] : memref<128x1152xbf16, #tpu.memory_space<vmem>>, vector<128x128xbf16>
    tpu.vector_store %arg12[%c0_94, %c1024], %50 {strides = array<i32>} : memref<128x1152xbf16, #tpu.memory_space<vmem>>, vector<128x128xbf16>,
    %c0_95 = arith.constant 0 : index
    %c0_96 = arith.constant 0 : index
    %52 = vector.load %arg12[%c0_95, %c0_96] : memref<128x1152xbf16, #tpu.memory_space<vmem>>, vector<128x1152xbf16>
    %c0_97 = arith.constant 0 : index
    %c0_98 = arith.constant 0 : index
    %53 = vector.load %arg3[%c0_97, %c0_98] : memref<1152x128xbf16, #tpu.memory_space<vmem>>, vector<1152x128xbf16>
    %cst_99 = arith.constant dense<0.000000e+00> : vector<128x128xf32>
    %54 = tpu.matmul %52, %53, %cst_99 {dimension_numbers = #tpu.dot_dimension_numbers<[1], [0], [0], [1], [0, 0, 1, 1], [], []>} : vector<128x1152xbf16>, vector<1152x128xbf16>, vector<128x128xf32> -> vector<128x128xf32>
    %c0_100 = arith.constant 0 : index
    %c0_101 = arith.constant 0 : index
    %55 = vector.load %arg4[%c0_100, %c0_101] : memref<1x128xf32, #tpu.memory_space<vmem>>, vector<1x128xf32>
    %56 = vector.broadcast %55 : vector<1x128xf32> to vector<128x128xf32>
    %57 = arith.addf %54, %56 : vector<128x128xf32>
    %cst_102 = arith.constant 0.000000e+00 : f32
    %58 = vector.broadcast %cst_102 : f32 to vector<128x128xf32>
    %59 = arith.maximumf %57, %58 : vector<128x128xf32>
    %60 = vector.shape_cast %59 : vector<128x128xf32> to vector<2x64x128xf32>
    %cst_103 = arith.constant dense<0.000000e+00> : vector<2x128xf32>
    %61 = vector.multi_reduction <add>, %60, %cst_103 [1] : vector<2x64x128xf32> to vector<2x128xf32>
    %cst_104 = arith.constant 6.400000e+01 : f32
    %62 = vector.broadcast %cst_104 : f32 to vector<2x128xf32>
    %63 = arith.divf %61, %62 : vector<2x128xf32>
    %c0_105 = arith.constant 0 : index
    %c0_106 = arith.constant 0 : index
    %64 = vector.load %arg7[%c0_105, %c0_106] : memref<2x128xf32, #tpu.memory_space<vmem>>, vector<2x128xf32>
    %65 = arith.mulf %63, %64 : vector<2x128xf32>
    %c0_107 = arith.constant 0 : index
    %c0_108 = arith.constant 0 : index
    %66 = vector.load %arg5[%c0_107, %c0_108] : memref<128x2xf32, #tpu.memory_space<vmem>>, vector<128x2xf32>
    %cst_109 = arith.constant dense<0.000000e+00> : vector<2x2xf32>
    %67 = tpu.matmul %65, %66, %cst_109 {dimension_numbers = #tpu.dot_dimension_numbers<[1], [0], [0], [1], [0, 0, 1, 1], [], []>} : vector<2x128xf32>, vector<128x2xf32>, vector<2x2xf32> -> vector<2x2xf32>
    %c0_110 = arith.constant 0 : index
    %c0_111 = arith.constant 0 : index
    %68 = vector.load %arg6[%c0_110, %c0_111] : memref<1x2xf32, #tpu.memory_space<vmem>>, vector<1x2xf32>
    %69 = vector.broadcast %68 : vector<1x2xf32> to vector<2x2xf32>
    %70 = arith.addf %67, %69 : vector<2x2xf32>
    %c0_112 = arith.constant 0 : index
    %c0_113 = arith.constant 0 : index
    %71 = vector.load %arg8[%c0_112, %c0_113] : memref<2x2xf32, #tpu.memory_space<vmem>>, vector<2x2xf32>
    tpu.vector_store %arg8[%c0_112, %c0_113], %70 {strides = array<i32>} : memref<2x2xf32, #tpu.memory_space<vmem>>, vector<2x2xf32>,
    return
  }
}

</mosaic_0001>

<bundles_post_ra>
// kernel: modified_googlenet_forward.1
= control target key start
LH: loop header
LB: loop body
LE: loop exit
PB: predicated region body
PF: predicated region fallthrough
CT: control target
= control target key end

     0   :  { %vm282_vm0 = vcmask 293888   ;;  %vm379_vm1 = vcmask 1041408   ;;  %s7076_s0 = inlined_call_operand.vmem [shape: bf16[512,36], index: 0, kind: input, shape index: {}]   ;;  %s7077_s1 = inlined_call_operand.vmem [shape: bf16[36,128], index: 1, kind: input, shape index: {}]   ;;  %s7078_s2 = inlined_call_operand.vmem [shape: f32[1,128], index: 2, kind: input, shape index: {}]   ;;  %s7079_s3 = inlined_call_operand.vmem [shape: bf16[1152,128], index: 3, kind: input, shape index: {}]   ;;  %s7080_s4 = inlined_call_operand.vmem [shape: f32[1,128], index: 4, kind: input, shape index: {}]   ;;  %s7081_s5 = inlined_call_operand.vmem [shape: f32[128,2], index: 5, kind: input, shape index: {}]   ;;  %s7082_s6 = inlined_call_operand.vmem [shape: f32[1,2], index: 6, kind: input, shape index: {}]   ;;  %s7083_s7 = inlined_call_operand.vmem [shape: f32[2,128], index: 7, kind: input, shape index: {}]   ;;  %s7084_s8 = inlined_call_operand.hbm [shape: f32[2,2], index: 8, kind: output, shape index: {}]  }
   0x1   :  { %v5466_v0 = vld [vmem:[%s7077_s1] sm:$0xff]   ;;  %v5467_v1 = vld [vmem:[%s7077_s1 + $0x8] sm:$0xff]   ;;  %v5468_v2 = vld [vmem:[%s7077_s1 + $0x10] ss:$0 sps:$4 sm:$0x33]  }
   0x2   :  { %5299 = vmatprep.subr.bf16.mxu0 %v5466_v0  ;;  %v5469_v3 = vld [vmem:[%s7076_s0] sm:$0xff]   ;;  %v381_v4 = vsel %vm379_vm1, %v5468_v2, 0  ;;  %v5470_v5 = vld [vmem:[%s7076_s0 + $0x8] sm:$0xff]   ;;  %v5471_v6 = vld [vmem:[%s7076_s0 + $0x10] sm:$0xff]  }
   0x3   :  { %5300 = vmatpush3.bf16.msra.mxu0 %v5466_v0  ;;  %5305 = vmatprep.mubr.msk.bf16.mxu0 %vm282_vm0, %v5469_v3  ;;  %v5472_v7 = vld [vmem:[%s7076_s0 + $0x18] sm:$0xff]   ;;  %v5473_v8 = vld [vmem:[%s7076_s0 + $0x20] sm:$0xff]   ;;  %v5474_v9 = vld [vmem:[%s7076_s0 + $0x28] sm:$0xff]  }
   0x4   :  { %5301 = vmatprep.subr.bf16.mxu0 %v5467_v1  ;;  %v5475_v10 = vld [vmem:[%s7076_s0 + $0x30] sm:$0xff]   ;;  %v5476_v11 = vld [vmem:[%s7076_s0 + $0x38] sm:$0xff]   ;;  %v5477_v12 = vld [vmem:[%s7076_s0 + $0x40] sm:$0xff]  }
   0x5   :  { %v5478_v13 = vld [vmem:[%s7076_s0 + $0x48] sm:$0xff]   ;;  %v5479_v14 = vld [vmem:[%s7076_s0 + $0x50] sm:$0xff]   ;;  %v5480_v15 = vld [vmem:[%s7076_s0 + $0x58] sm:$0xff]  }
   0x6   :  { %v5481_v16 = vld [vmem:[%s7076_s0 + $0x60] sm:$0xff]   ;;  %v5482_v17 = vld [vmem:[%s7076_s0 + $0x68] sm:$0xff]   ;;  %v5483_v18 = vld [vmem:[%s7076_s0 + $0x70] sm:$0xff]  }
   0x7   :  { %5302 = vmatpush3.bf16.msra.mxu0 %v5467_v1  ;;  %v5484_v19 = vld [vmem:[%s7076_s0 + $0x78] sm:$0xff]   ;;  %v5485_v20 = vld [vmem:[%s7076_s0 + $0x80] sm:$0xff]   ;;  %v5486_v21 = vld [vmem:[%s7076_s0 + $0x88] sm:$0xff]  }
   0x8   :  { %5460 = vmatprep.subr.msk.bf16.mxu0 %vm379_vm1, %v5468_v2  ;;  %v5487_v22 = vld [vmem:[%s7076_s0 + $0x90] sm:$0xff]   ;;  %v5488_v23 = vld [vmem:[%s7076_s0 + $0x98] sm:$0xff]  }
   0xb   :  { %5304 = vmatpush3.bf16.msra.mxu0 %v381_v4 }
   0xe   :  { %5306 = vmatmul.mubr.msk.bf16.vlgmr.msra.gmra.mrb[0].mxu0 %vm282_vm0, %v5470_v5 }
   0xf   :  { %5309 = vmatprep.mubr.msk.bf16.mxu0 %vm282_vm0, %v5471_v6 }
  0x16   :  { %5310 = vmatmul.mubr.msk.bf16.gmra.mrb[4].mxu0 %vm282_vm0, %v5472_v7 }
  0x17   :  { %5313 = vmatprep.mubr.msk.bf16.mxu0 %vm282_vm0, %v5473_v8 }
  0x1e   :  { %5314 = vmatmul.mubr.msk.bf16.gmra.mrb[8].mxu0 %vm282_vm0, %v5474_v9 }
  0x1f   :  { %5317 = vmatprep.mubr.msk.bf16.mxu0 %vm282_vm0, %v5475_v10 }
  0x26   :  { %5318 = vmatmul.mubr.msk.bf16.gmra.mrb[12].mxu0 %vm282_vm0, %v5476_v11 }
  0x27   :  { %5321 = vmatprep.mubr.msk.bf16.mxu0 %vm282_vm0, %v5477_v12 }
  0x2e   :  { %5322 = vmatmul.mubr.msk.bf16.gmra.mrb[16].mxu0 %vm282_vm0, %v5478_v13 }
  0x2f   :  { %5325 = vmatprep.mubr.msk.bf16.mxu0 %vm282_vm0, %v5479_v14 }
  0x36   :  { %5326 = vmatmul.mubr.msk.bf16.gmra.mrb[20].mxu0 %vm282_vm0, %v5480_v15 }
  0x37   :  { %5329 = vmatprep.mubr.msk.bf16.mxu0 %vm282_vm0, %v5481_v16 }
  0x3e   :  { %5330 = vmatmul.mubr.msk.bf16.gmra.mrb[24].mxu0 %vm282_vm0, %v5482_v17 }
  0x3f   :  { %5333 = vmatprep.mubr.msk.bf16.mxu0 %vm282_vm0, %v5483_v18 }
  0x46   :  { %5334 = vmatmul.mubr.msk.bf16.gmra.mrb[28].mxu0 %vm282_vm0, %v5484_v19 }
  0x47   :  { %5337 = vmatprep.mubr.msk.bf16.mxu0 %vm282_vm0, %v5485_v20 }
  0x4e   :  { %5338 = vmatmul.mubr.msk.bf16.gmra.mrb[32].mxu0 %vm282_vm0, %v5486_v21 }
  0x4f   :  { %5341 = vmatprep.mubr.msk.bf16.mxu0 %vm282_vm0, %v5487_v22 }
  0x50   :  { %13 = vsyncpa [#allocation7], 0  ;;  %v5489_v24 = vld [vmem:[%s7076_s0 + $0xa0] sm:$0xff]   ;;  %v5490_v25 = vld [vmem:[%s7076_s0 + $0xa8] sm:$0xff]   ;;  %vm1014_vm2 = vcmask 1040384   ;;  %vm1065_vm4 = vcmask 1044484  }
  0x51   :  { %v5491_v26 = vld [vmem:[%s7076_s0 + $0xb0] sm:$0xff]   ;;  %v5492_v27 = vld [vmem:[%s7076_s0 + $0xb8] sm:$0xff]   ;;  %v5493_v28 = vld [vmem:[%s7076_s0 + $0xc0] sm:$0xff]   ;;  %vm1015_vm3 = vsmask.f32 256  ;;  %v5815_v56 = vmov 0  }
  0x52   :  { %v5494_v29 = vld [vmem:[%s7076_s0 + $0xc8] sm:$0xff]   ;;  %v5495_v30 = vld [vmem:[%s7076_s0 + $0xd0] sm:$0xff]   ;;  %v5496_v31 = vld [vmem:[%s7076_s0 + $0xd8] sm:$0xff]   ;;  %vm1066_vm5 = vsmask.f32 7954  ;;  %1008 = vst [vmem:[#allocation4] sm:$0xff] %v5815_v56 }
  0x53   :  { %v5497_v32 = vld [vmem:[%s7076_s0 + $0xe0] sm:$0xff]   ;;  %vm5988_vm6 = vmand %vm1014_vm2, %vm1015_vm3  ;;  %v1017_v34 = vld [vmem:[#allocation4 + $0x8] sm:$0x1]  ;;  %1009 = vst [vmem:[#allocation4 + $0x50] sm:$0xff] %v5815_v56  ;;  %vm1260_vm8 = vcmask 1044480   ;;  %vm1842_vm14 = vcmask 1042432  }
  0x54   :  { %v1068_v35 = vld [vmem:[#allocation4 + $0x8] sm:$0x10]  ;;  %v1018_v36 = vsel %vm5988_vm6, 0, %v1017_v34  ;;  %vm5994_vm7 = vmand %vm1065_vm4, %vm1066_vm5  ;;  %v5501_v38 = vld [vmem:[%s7079_s3 + $0x40] sm:$0xff]   ;;  %1011 = vst [vmem:[#allocation4 + $0x48] sm:$0xff] %v5815_v56  ;;  %vm1843_vm15 = vcmask 1046532  }
  0x55   :  { %v5502_v39 = vld [vmem:[%s7079_s3] sm:$0xff]   ;;  %1019 = vst [vmem:[#allocation4 + $0x8] sm:$0x1] %v1018_v36  ;;  %v1069_v40 = vsel %vm5994_vm7, 0, %v1068_v35  ;;  %5010 = vmatprep.subr.bf16.mxu1 %v5501_v38  ;;  %v5503_v41 = vld [vmem:[%s7079_s3 + $0x48] sm:$0xff]   ;;  %v5506_v45 = vld [vmem:[%s7079_s3 + $0x50] sm:$0xff]  }
  0x56   :  { %5342 = vmatmul.mubr.msk.bf16.gmra.mrb[36].mxu0 %vm282_vm0, %v5488_v23  ;;  %1070 = vst [vmem:[#allocation4 + $0x8] sm:$0x10] %v1069_v40  ;;  %5011 = vmatpush3.bf16.msra.mxu1 %v5502_v39  ;;  %v5504_v42 = vld [vmem:[%s7079_s3 + $0x8] sm:$0xff]   ;;  %v5505_v43 = vld [vmem:[%s7079_s3 + $0x140] sm:$0xff]   ;;  %v5499_v47 = vld [vmem:[%s7076_s0 + $0xf0] sm:$0xff]   ;;  %vm5817_vm1 = vmmov 0  }
  0x57   :  { %5345 = vmatprep.mubr.msk.bf16.mxu0 %vm282_vm0, %v5489_v24  ;;  %5012 = vmatprep.subr.bf16.mxu1 %v5503_v41  ;;  %v5498_v44 = vld [vmem:[%s7076_s0 + $0xe8] sm:$0xff]   ;;  %v5507_v46 = vld [vmem:[%s7079_s3 + $0x100] sm:$0xff]   ;;  %v1020_v48 = vld [vmem:[#allocation4 + $0x10] sm:$0x1]  ;;  %1012 = vst [vmem:[#allocation4 + $0x98] sm:$0xff] %v5815_v56  ;;  %vm4432_vm2 = vcmask 1041409  }
  0x58   :  { %5138 = vmatprep.subr.bf16.mxu0 %v5505_v43  ;;  %v5508_v49 = vld [vmem:[%s7079_s3 + $0x10] sm:$0xff]   ;;  %v1021_v50 = vsel %vm5988_vm6, 0, %v1020_v48  ;;  %v5509_v53 = vld [vmem:[%s7079_s3 + $0x148] sm:$0xff]   ;;  %v5510_v54 = vld [vmem:[%s7079_s3 + $0x58] sm:$0xff]   ;;  %vm1261_vm9 = vsmask.f32 4354 }
  0x59   :  { %v1071_v51 = vld [vmem:[#allocation4 + $0x10] sm:$0x10]  ;;  %5139 = vmatpush3.bf16.msra.mxu0 %v5507_v46  ;;  %1022 = vst [vmem:[#allocation4 + $0x10] sm:$0x1] %v1021_v50  ;;  %v5511_v55 = vld [vmem:[%s7079_s3 + $0x108] sm:$0xff]   ;;  %v5512_v57 = vld [vmem:[%s7079_s3 + $0x18] sm:$0xff]  }
  0x5a   :  { %5013 = vmatpush3.bf16.msra.mxu1 %v5504_v42  ;;  %v1072_v52 = vsel %vm5994_vm7, 0, %v1071_v51  ;;  %5140 = vmatprep.subr.bf16.mxu0 %v5509_v53  ;;  %v5513_v58 = vld [vmem:[%s7079_s3 + $0x150] sm:$0xff]   ;;  %v5500_v59 = vld [vmem:[%s7076_s0 + $0xf8] sm:$0xff]   ;;  %v5514_v60 = vld [vmem:[%s7079_s3 + $0x60] sm:$0xff]   ;;  %vm1479_vm10 = vsmask.f32 3328 }
  0x5b   :  { %5014 = vmatprep.subr.bf16.mxu1 %v5506_v45  ;;  %1073 = vst [vmem:[#allocation4 + $0x10] sm:$0x10] %v1072_v52  ;;  %v5515_v61 = vld [vmem:[%s7079_s3 + $0x110] sm:$0xff]   ;;  %v1023_v62 = vld [vmem:[#allocation4 + $0x18] sm:$0x1]  ;;  %v5516_v0 = vld [vmem:[%s7079_s3 + $0x20] sm:$0xff]  }
  0x5c   :  { %v1074_v63 = vld [vmem:[#allocation4 + $0x18] sm:$0x10]  ;;  %v1024_v1 = vsel %vm5988_vm6, 0, %v1023_v62  ;;  %v5518_v4 = vld [vmem:[%s7079_s3 + $0x68] sm:$0xff]   ;;  %v5521_v7 = vld [vmem:[%s7079_s3 + $0x160] sm:$0xff]   ;;  %s5819_s1 = smov [#allocation6]  }
  0x5d   :  { %5141 = vmatpush3.bf16.msra.mxu0 %v5511_v55  ;;  %v1075_v2 = vsel %vm5994_vm7, 0, %v1074_v63  ;;  %1025 = vst [vmem:[#allocation4 + $0x18] sm:$0x1] %v1024_v1  ;;  %v5517_v3 = vld [vmem:[%s7079_s3 + $0x158] sm:$0xff]   ;;  %v5520_v6 = vld [vmem:[%s7079_s3 + $0x28] sm:$0xff]   ;;  %v5522_v8 = vld [vmem:[%s7079_s3 + $0x70] sm:$0xff]  }
  0x5e   :  { %5346 = vmatmul.mubr.msk.bf16.gmra.mrb[40].mxu0 %vm282_vm0, %v5490_v25  ;;  %5015 = vmatpush3.bf16.msra.mxu1 %v5508_v49  ;;  %1076 = vst [vmem:[#allocation4 + $0x18] sm:$0x10] %v1075_v2  ;;  %v5519_v5 = vld [vmem:[%s7079_s3 + $0x118] sm:$0xff]   ;;  %v5523_v9 = vld [vmem:[%s7079_s3 + $0x120] sm:$0xff]   ;;  %v5524_v12 = vld [vmem:[%s7079_s3 + $0x30] sm:$0xff]   ;;  %s4513_s17 = sshll.u32 %s5819_s1, 4  ;;  %s4514_s17 = int_to_ptr.vmem [resolvable:$true] %s4513_s17 }
  0x5f   :  { %5349 = vmatprep.mubr.msk.bf16.mxu0 %vm282_vm0, %v5491_v26  ;;  %5016 = vmatprep.subr.bf16.mxu1 %v5510_v54  ;;  %v1026_v10 = vld [vmem:[#allocation4 + $0x20] sm:$0x1]  ;;  %v1077_v11 = vld [vmem:[#allocation4 + $0x20] sm:$0x10]  ;;  %v5525_v15 = vld [vmem:[%s7079_s3 + $0x168] sm:$0xff]   ;;  %vm4505_vm3 = vcmask 9216   ;;  %p5796_p1 = scmp.lt.s32.totalorder %s4514_s17, %s4514_s17 }
  0x60   :  { %5142 = vmatprep.subr.bf16.mxu0 %v5513_v58  ;;  %v1027_v13 = vsel %vm5988_vm6, 0, %v1026_v10  ;;  %v1078_v14 = vsel %vm5994_vm7, 0, %v1077_v11  ;;  %v5526_v16 = vld [vmem:[%s7079_s3 + $0x78] sm:$0xff]   ;;  %v5527_v17 = vld [vmem:[%s7079_s3 + $0x128] sm:$0xff]   ;;  %v5533_v21 = vld [vmem:[%s7079_s3 + $0x170] sm:$0xff]  }
  0x61   :  { %5143 = vmatpush3.bf16.msra.mxu0 %v5515_v61  ;;  %1028 = vst [vmem:[#allocation4 + $0x20] sm:$0x1] %v1027_v13  ;;  %1079 = vst [vmem:[#allocation4 + $0x20] sm:$0x10] %v1078_v14  ;;  %v5528_v18 = vld [vmem:[%s7079_s3 + $0x38] sm:$0xff]   ;;  %v5535_v24 = vld [vmem:[%s7079_s3 + $0x130] sm:$0xff]  }
  0x62   :  { %5017 = vmatpush3.bf16.msra.mxu1 %v5512_v57  ;;  %5144 = vmatprep.subr.bf16.mxu0 %v5517_v3  ;;  %v1029_v19 = vld [vmem:[#allocation4 + $0x28] sm:$0x1]  ;;  %v1080_v20 = vld [vmem:[#allocation4 + $0x28] sm:$0x10]  ;;  %v1032_v25 = vld [vmem:[#allocation4 + $0x30] sm:$0x1] }
  0x63   :  { %5018 = vmatprep.subr.bf16.mxu1 %v5514_v60  ;;  %v1030_v22 = vsel %vm5988_vm6, 0, %v1029_v19  ;;  %v1081_v23 = vsel %vm5994_vm7, 0, %v1080_v20  ;;  %v1083_v26 = vld [vmem:[#allocation4 + $0x30] sm:$0x10]  ;;  %v1038_v36 = vld [vmem:[#allocation4 + $0x40] sm:$0x1]  ;;  %vm6190_vm12 = vmand %vm1260_vm8, %vm1261_vm9 }
  0x64   :  { %1031 = vst [vmem:[#allocation4 + $0x28] sm:$0x1] %v1030_v22  ;;  %1082 = vst [vmem:[#allocation4 + $0x28] sm:$0x10] %v1081_v23  ;;  %v1089_v38 = vld [vmem:[#allocation4 + $0x40] sm:$0x10] }
  0x65   :  { %5145 = vmatpush3.bf16.msra.mxu0 %v5519_v5  ;;  %v1039_v39 = vsel %vm5988_vm6, 0, %v1038_v36  ;;  %v1090_v40 = vsel %vm5994_vm7, 0, %v1089_v38  ;;  %v1041_v41 = vld [vmem:[#allocation4 + $0x58] sm:$0x1]  ;;  %v1092_v42 = vld [vmem:[#allocation4 + $0x58] sm:$0x10] }
  0x66   :  { %5350 = vmatmul.mubr.msk.bf16.gmra.mrb[44].mxu0 %vm282_vm0, %v5492_v27  ;;  %5019 = vmatpush3.bf16.msra.mxu1 %v5516_v0  ;;  %v1033_v27 = vsel %vm5988_vm6, 0, %v1032_v25  ;;  %1040 = vst [vmem:[#allocation4 + $0x40] sm:$0x1] %v1039_v39  ;;  %1091 = vst [vmem:[#allocation4 + $0x40] sm:$0x10] %v1090_v40  ;;  %v1042_v43 = vsel %vm5988_vm6, 0, %v1041_v41 }
  0x67   :  { %5353 = vmatprep.mubr.msk.bf16.mxu0 %vm282_vm0, %v5493_v28  ;;  %5020 = vmatprep.subr.bf16.mxu1 %v5518_v4  ;;  %v1084_v28 = vsel %vm5994_vm7, 0, %v1083_v26  ;;  %1034 = vst [vmem:[#allocation4 + $0x30] sm:$0x1] %v1033_v27  ;;  %1043 = vst [vmem:[#allocation4 + $0x58] sm:$0x1] %v1042_v43 }
  0x68   :  { %5146 = vmatprep.subr.bf16.mxu0 %v5521_v7  ;;  %1085 = vst [vmem:[#allocation4 + $0x30] sm:$0x10] %v1084_v28  ;;  %v1044_v45 = vld [vmem:[#allocation4 + $0x60] sm:$0x1]  ;;  %v1095_v46 = vld [vmem:[#allocation4 + $0x60] sm:$0x10] }
  0x69   :  { %5147 = vmatpush3.bf16.msra.mxu0 %v5523_v9  ;;  %v1096_v48 = vsel %vm5994_vm7, 0, %v1095_v46  ;;  %v1047_v49 = vld [vmem:[#allocation4 + $0x68] sm:$0x1]  ;;  %v1098_v50 = vld [vmem:[#allocation4 + $0x68] sm:$0x10] }
  0x6a   :  { %5021 = vmatpush3.bf16.msra.mxu1 %v5520_v6  ;;  %5148 = vmatprep.subr.bf16.mxu0 %v5525_v15  ;;  %1097 = vst [vmem:[#allocation4 + $0x60] sm:$0x10] %v1096_v48  ;;  %v1048_v51 = vsel %vm5988_vm6, 0, %v1047_v49  ;;  %v1099_v52 = vsel %vm5994_vm7, 0, %v1098_v50  ;;  %v1050_v53 = vld [vmem:[#allocation4 + $0x70] sm:$0x1] }
  0x6b   :  { %5022 = vmatprep.subr.bf16.mxu1 %v5522_v8  ;;  %1049 = vst [vmem:[#allocation4 + $0x68] sm:$0x1] %v1048_v51  ;;  %1100 = vst [vmem:[#allocation4 + $0x68] sm:$0x10] %v1099_v52  ;;  %v1101_v54 = vld [vmem:[#allocation4 + $0x70] sm:$0x10] }
  0x6c   :  { %v1051_v55 = vsel %vm5988_vm6, 0, %v1050_v53  ;;  %v1102_v56 = vsel %vm5994_vm7, 0, %v1101_v54  ;;  %v6157_v57 = vld [vmem:[%s7078_s2] ss:$0 sm:$0xff]  ;;  %v1053_v63 = vld [vmem:[#allocation4 + $0x78] sm:$0x1] }
  0x6d   :  { %5149 = vmatpush3.bf16.msra.mxu0 %v5527_v17  ;;  %1052 = vst [vmem:[#allocation4 + $0x70] sm:$0x1] %v1051_v55  ;;  %1103 = vst [vmem:[#allocation4 + $0x70] sm:$0x10] %v1102_v56  ;;  %v1104_v0 = vld [vmem:[#allocation4 + $0x78] sm:$0x10] }
  0x6e   :  { %5354 = vmatmul.mubr.msk.bf16.gmra.mrb[48].mxu0 %vm282_vm0, %v5494_v29  ;;  %5023 = vmatpush3.bf16.msra.mxu1 %v5524_v12  ;;  %v5540_v29 = vld [vmem:[%s7079_s3 + $0x178] sm:$0xff]   ;;  %v1054_v4 = vsel %vm5988_vm6, 0, %v1053_v63  ;;  %v1105_v5 = vsel %vm5994_vm7, 0, %v1104_v0  ;;  %v1383_v15 = vld [vmem:[#allocation4] sm:$0x1f] }
  0x6f   :  { %5357 = vmatprep.mubr.msk.bf16.mxu0 %vm282_vm0, %v5495_v30  ;;  %5024 = vmatprep.subr.bf16.mxu1 %v5526_v16  ;;  %v5541_v30 = vld [vmem:[%s7079_s3 + $0x138] sm:$0xff]   ;;  %1055 = vst [vmem:[#allocation4 + $0x78] sm:$0x1] %v1054_v4  ;;  %1106 = vst [vmem:[#allocation4 + $0x78] sm:$0x10] %v1105_v5  ;;  %v4597_v23 = vcombine.low %v1383_v15, %v1383_v15  ;;  %v4598_v50 = vcombine.high %v1383_v15, %v1383_v15 }
  0x70   :  { %5150 = vmatprep.subr.bf16.mxu0 %v5533_v21  ;;  %v6174_v26 = vld [vmem:[#allocation4 + $0x50] sm:$0x1f]  ;;  %vm1480_vm11 = vsmask.f32 7440 }
  0x71   :  { %5151 = vmatpush3.bf16.msra.mxu0 %v5535_v24  ;;  %v5581_v24 = vld [vmem:[%s7079_s3 + $0xc0] sm:$0xff]   ;;  %v1483_v36 = vshrl.u32 %v4597_v23, 16  ;;  %v4613_v38 = vcombine.low %v6174_v26, %v6174_v26  ;;  %v1486_v43 = vshll.u32 %v4597_v23, 16  ;;  %v4614_v63 = vcombine.high %v6174_v26, %v6174_v26  ;;  %vm6208_vm13 = vmor %vm1479_vm10, %vm1480_vm11 }
  0x72   :  { %5025 = vmatpush3.bf16.msra.mxu1 %v5528_v18  ;;  %5152 = vmatprep.subr.bf16.mxu0 %v5540_v29  ;;  %v1056_v29 = vld [vmem:[#allocation4 + $0x80] sm:$0x1]  ;;  %v1492_v0 = vshll.u32 %v4598_v50, 16 }
  0x73   :  { %5074 = vmatprep.subr.bf16.mxu1 %v5581_v24  ;;  %v1595_v54 = vshrl.u32 %v4613_v38, 16  ;;  %v1485_v56 = vrot.slane %v1483_v36, 4 }
  0x75   :  { %5153 = vmatpush3.bf16.msra.mxu0 %v5541_v30  ;;  %v1107_v30 = vld [vmem:[#allocation4 + $0x80] sm:$0x10] }
  0x76   :  { %5358 = vmatmul.mubr.msk.bf16.gmra.mrb[52].mxu0 %vm282_vm0, %v5496_v31  ;;  %v1035_v31 = vld [vmem:[#allocation4 + $0x38] sm:$0x1] }
  0x77   :  { %5361 = vmatprep.mubr.msk.bf16.mxu0 %vm282_vm0, %v5497_v32  ;;  %v1086_v32 = vld [vmem:[#allocation4 + $0x38] sm:$0x10]  ;;  %v1036_v34 = vsel %vm5988_vm6, 0, %v1035_v31  ;;  %v1057_v31 = vsel %vm5988_vm6, 0, %v1056_v29 }
  0x78   :  { %v1087_v35 = vsel %vm5994_vm7, 0, %v1086_v32  ;;  %1037 = vst [vmem:[#allocation4 + $0x38] sm:$0x1] %v1036_v34  ;;  %v1108_v32 = vsel %vm5994_vm7, 0, %v1107_v30  ;;  %1058 = vst [vmem:[#allocation4 + $0x80] sm:$0x1] %v1057_v31 }
  0x79   :  { %1088 = vst [vmem:[#allocation4 + $0x38] sm:$0x10] %v1087_v35  ;;  %1109 = vst [vmem:[#allocation4 + $0x80] sm:$0x10] %v1108_v32  ;;  %v1494_v32 = vrot.slane %v1492_v0, 5 }
  0x7e   :  { %5362 = vmatmul.mubr.msk.bf16.gmra.mrb[56].mxu0 %vm282_vm0, %v5498_v44  ;;  %v1093_v44 = vsel %vm5994_vm7, 0, %v1092_v42 }
  0x7f   :  { %5365 = vmatprep.mubr.msk.bf16.mxu0 %vm282_vm0, %v5499_v47  ;;  %1094 = vst [vmem:[#allocation4 + $0x58] sm:$0x10] %v1093_v44  ;;  %v1045_v47 = vsel %vm5988_vm6, 0, %v1044_v45 }
  0x80   :  { %1046 = vst [vmem:[#allocation4 + $0x60] sm:$0x1] %v1045_v47 }
  0x86   :  { %5366 = vmatmul.mubr.msk.bf16.gmra.mrb[60].mxu0 %vm282_vm0, %v5500_v59  ;;  %vm6259_vm0 = vmor %vm1842_vm14, %vm1843_vm15 }
  0xe1   :  { %v5307_v58 = vpop.f32.mrb[0].mxu0 }
  0xe2   :  { %v426_v59 = vadd.f32 %v5307_v58, %v6157_v57  ;;  %v417_v60 = vpop.f32.mrb[1].mxu0  ;;  %v1488_v58 = vrot.slane %v1486_v43, 5  ;;  %v1266_v43 = vld [vmem:[#allocation4 + $0x10] sm:$0x1f] }
  0xe3   :  { %v418_v61 = vadd.f32 %v6157_v57, %v417_v60  ;;  %v5308_v62 = vpop.f32.mrb[2].mxu0 }
  0xe4   :  { %v674_v1 = vmax.f32 %v426_v59, 0.0  ;;  %v429_v2 = vadd.f32 %v5308_v62, %v6157_v57  ;;  %v420_v3 = vpop.f32.mrb[3].mxu0  ;;  %v1598_v59 = vshll.u32 %v4613_v38, 16 }
  0xe5   :  { %v672_v6 = vmax.f32 %v418_v61, 0.0  ;;  %v421_v7 = vadd.f32 %v6157_v57, %v420_v3  ;;  %v1263_v3 = vld [vmem:[#allocation4 + $0x8] sm:$0x1f] }
  0xe6   :  { %v675_v8 = vmax.f32 %v429_v2, 0.0 }
  0xe7   :  { %v865_v9 = vmax.f32 %v672_v6, %v674_v1  ;;  %v673_v10 = vmax.f32 %v421_v7, 0.0  ;;  %v1597_v6 = vrot.slane %v1595_v54, 4 }
  0xe9   :  { %897 = vst [vmem:[#allocation3] sm:$0xff] %v865_v9  ;;  %v866_v11 = vmax.f32 %v673_v10, %v675_v8  ;;  %v5311_v12 = vpop.f32.mrb[4].mxu0 }
  0xea   :  { %v442_v13 = vadd.f32 %v5311_v12, %v6157_v57  ;;  %v433_v14 = vpop.f32.mrb[5].mxu0  ;;  %v1489_v12 = vor.u32 %v1488_v58, %v1485_v56 }
  0xeb   :  { %898 = vst [vmem:[#allocation3 + $0x8] sm:$0xff] %v866_v11  ;;  %v434_v16 = vadd.f32 %v6157_v57, %v433_v14  ;;  %v5312_v17 = vpop.f32.mrb[6].mxu0 }
  0xec   :  { %v678_v18 = vmax.f32 %v442_v13, 0.0  ;;  %v445_v19 = vadd.f32 %v5312_v17, %v6157_v57  ;;  %v436_v20 = vpop.f32.mrb[7].mxu0  ;;  %v1600_v13 = vrot.slane %v1598_v59, 5  ;;  %v1490_v31 = vrot.slane %v1489_v12, 4  ;;  %v1062_v59 = vld [vmem:[#allocation4 + $0x90] sm:$0x1] }
  0xed   :  { %v676_v21 = vmax.f32 %v434_v16, 0.0  ;;  %v437_v22 = vadd.f32 %v6157_v57, %v436_v20  ;;  %v1110_v20 = vld [vmem:[#allocation4 + $0x88] sm:$0x10] }
  0xee   :  { %v679_v25 = vmax.f32 %v445_v19, 0.0  ;;  %v1059_v19 = vld [vmem:[#allocation4 + $0x88] sm:$0x1] }
  0xef   :  { %v867_v27 = vmax.f32 %v676_v21, %v678_v18  ;;  %v677_v28 = vmax.f32 %v437_v22, 0.0  ;;  %v6196_v18 = vshll.u32 %v4614_v63, 16  ;;  %v1060_v24 = vsel %vm5988_vm6, 0, %v1059_v19 }
  0xf0   :  { %1061 = vst [vmem:[#allocation4 + $0x88] sm:$0x1] %v1060_v24 }
  0xf1   :  { %899 = vst [vmem:[#allocation3 + $0x10] sm:$0xff] %v867_v27  ;;  %v868_v34 = vmax.f32 %v677_v28, %v679_v25  ;;  %v5315_v35 = vpop.f32.mrb[8].mxu0  ;;  %v1111_v25 = vsel %vm5994_vm7, 0, %v1110_v20 }
  0xf2   :  { %v929_v39 = vld [vmem:[#allocation3] ss:$2 sm:$0xff]  ;;  %v961_v40 = vld [vmem:[#allocation3 + $0x1] ss:$2 sm:$0xff]  ;;  %v458_v41 = vadd.f32 %v5315_v35, %v6157_v57  ;;  %v449_v42 = vpop.f32.mrb[9].mxu0 }
  0xf3   :  { %v992_v44 = vmax.f32 %v929_v39, %v961_v40  ;;  %900 = vst [vmem:[#allocation3 + $0x18] sm:$0xff] %v868_v34  ;;  %v450_v45 = vadd.f32 %v6157_v57, %v449_v42  ;;  %v5316_v46 = vpop.f32.mrb[10].mxu0  ;;  %1112 = vst [vmem:[#allocation4 + $0x88] sm:$0x10] %v1111_v25  ;;  %v1601_v34 = vor.u32 %v1600_v13, %v1597_v6  ;;  %v6212_v40 = vld [vmem:[#allocation4] sm:$0x1e] }
  0xf4   :  { %v682_v47 = vmax.f32 %v458_v41, 0.0  ;;  %v461_v48 = vadd.f32 %v5316_v46, %v6157_v57  ;;  %v452_v49 = vpop.f32.mrb[11].mxu0  ;;  %v1606_v46 = vrot.slane %v6196_v18, 5 }
  0xf5   :  { %v1116_v51 = vpack.c.bf16 %v992_v44, %v992_v44  ;;  %v680_v52 = vmax.f32 %v450_v45, 0.0  ;;  %v453_v53 = vadd.f32 %v6157_v57, %v452_v49 }
  0xf6   :  { %v683_v55 = vmax.f32 %v461_v48, 0.0 }
  0xf7   :  { %v1133_v60 = vshrl.u32 %v1116_v51, 16  ;;  %v869_v61 = vmax.f32 %v680_v52, %v682_v47  ;;  %v681_v62 = vmax.f32 %v453_v53, 0.0  ;;  %v1136_v2 = vshll.u32 %v1116_v51, 16 }
  0xf8   :  { %v6218_v51 = vsel %vm6208_vm13, %v1490_v31, %v1494_v32  ;;  %v1602_v52 = vrot.slane %v1601_v34, 4  ;;  %v4637_v53 = vcombine.low %v6212_v40, %v6212_v40 }
  0xf9   :  { %v1135_v1 = vrot.slane %v1133_v60, 7  ;;  %901 = vst [vmem:[#allocation3 + $0x20] sm:$0xff] %v869_v61  ;;  %v870_v4 = vmax.f32 %v681_v62, %v683_v55  ;;  %v5319_v5 = vpop.f32.mrb[12].mxu0  ;;  %v1113_v60 = vld [vmem:[#allocation4 + $0x90] sm:$0x10]  ;;  %v4638_v61 = vcombine.high %v6212_v40, %v6212_v40 }
  0xfa   :  { %v931_v8 = vld [vmem:[#allocation3 + $0x10] ss:$2 sm:$0xff]  ;;  %v963_v9 = vld [vmem:[#allocation3 + $0x11] ss:$2 sm:$0xff]  ;;  %v474_v10 = vadd.f32 %v5319_v5, %v6157_v57  ;;  %v465_v11 = vpop.f32.mrb[13].mxu0  ;;  %v6235_v33 = vsel %vm6208_vm13, %v1602_v52, %v1606_v46 }
  0xfb   :  { %v1138_v14 = vor.u32 %v1136_v2, %v1135_v1  ;;  %v993_v15 = vmax.f32 %v931_v8, %v963_v9  ;;  %902 = vst [vmem:[#allocation3 + $0x28] sm:$0xff] %v870_v4  ;;  %v466_v16 = vadd.f32 %v6157_v57, %v465_v11  ;;  %v5320_v17 = vpop.f32.mrb[14].mxu0  ;;  %v1063_v1 = vsel %vm5988_vm6, 0, %v1062_v59 }
  0xfc   :  { %v686_v21 = vmax.f32 %v474_v10, 0.0  ;;  %v477_v22 = vadd.f32 %v5320_v17, %v6157_v57  ;;  %v468_v23 = vpop.f32.mrb[15].mxu0  ;;  %v1114_v2 = vsel %vm5994_vm7, 0, %v1113_v60  ;;  %1064 = vst [vmem:[#allocation4 + $0x90] sm:$0x1] %v1063_v1 }
  0xfd   :  { %v1264_v26 = vsel %vm6190_vm12, %v1138_v14, %v1263_v3  ;;  %v1117_v27 = vpack.c.bf16 %v993_v15, %v993_v15  ;;  %v684_v28 = vmax.f32 %v466_v16, 0.0  ;;  %v469_v29 = vadd.f32 %v6157_v57, %v468_v23  ;;  %1115 = vst [vmem:[#allocation4 + $0x90] sm:$0x10] %v1114_v2 }
  0xfe   :  { %1265 = vst [vmem:[#allocation4 + $0x8] sm:$0x1f] %v1264_v26  ;;  %v687_v30 = vmax.f32 %v477_v22, 0.0  ;;  %v1269_v22 = vld [vmem:[#allocation4 + $0x18] sm:$0x1f] }
  0xff   :  { %v1140_v35 = vshrl.u32 %v1117_v27, 16  ;;  %v871_v36 = vmax.f32 %v684_v28, %v686_v21  ;;  %v685_v38 = vmax.f32 %v469_v29, 0.0  ;;  %v1143_v42 = vshll.u32 %v1117_v27, 16 }
 0x101   :  { %v1142_v41 = vrot.slane %v1140_v35, 7  ;;  %903 = vst [vmem:[#allocation3 + $0x30] sm:$0xff] %v871_v36  ;;  %v872_v44 = vmax.f32 %v685_v38, %v687_v30  ;;  %v5323_v45 = vpop.f32.mrb[16].mxu0 }
 0x102   :  { %v933_v47 = vld [vmem:[#allocation3 + $0x20] ss:$2 sm:$0xff]  ;;  %v965_v48 = vld [vmem:[#allocation3 + $0x21] ss:$2 sm:$0xff]  ;;  %v490_v49 = vadd.f32 %v5323_v45, %v6157_v57  ;;  %v481_v50 = vpop.f32.mrb[17].mxu0 }
 0x103   :  { %v1145_v54 = vor.u32 %v1143_v42, %v1142_v41  ;;  %v994_v55 = vmax.f32 %v933_v47, %v965_v48  ;;  %904 = vst [vmem:[#allocation3 + $0x38] sm:$0xff] %v872_v44  ;;  %v482_v56 = vadd.f32 %v6157_v57, %v481_v50  ;;  %v5324_v58 = vpop.f32.mrb[18].mxu0 }
 0x104   :  { %v690_v62 = vmax.f32 %v490_v49, 0.0  ;;  %v493_v63 = vadd.f32 %v5324_v58, %v6157_v57  ;;  %v484_v0 = vpop.f32.mrb[19].mxu0 }
 0x105   :  { %v1267_v3 = vsel %vm6190_vm12, %v1145_v54, %v1266_v43  ;;  %v1118_v4 = vpack.c.bf16 %v994_v55, %v994_v55  ;;  %v688_v5 = vmax.f32 %v482_v56, 0.0  ;;  %v485_v6 = vadd.f32 %v6157_v57, %v484_v0  ;;  %v1384_v8 = vld [vmem:[#allocation4 + $0x8] sm:$0x1f] }
 0x106   :  { %1268 = vst [vmem:[#allocation4 + $0x10] sm:$0x1f] %v1267_v3  ;;  %v691_v9 = vmax.f32 %v493_v63, 0.0  ;;  %v4599_v10 = vcombine.low %v1384_v8, %v1384_v8  ;;  %v4600_v11 = vcombine.high %v1384_v8, %v1384_v8  ;;  %v2381_v12 = vld [vmem:[#allocation4 + $0x8] sm:$0x1e] }
 0x107   :  { %v1147_v37 = vshrl.u32 %v1118_v4, 16  ;;  %v1150_v13 = vshll.u32 %v1118_v4, 16  ;;  %v873_v14 = vmax.f32 %v688_v5, %v690_v62  ;;  %v689_v15 = vmax.f32 %v485_v6, 0.0  ;;  %v6237_v16 = vld [vmem:[#allocation4 + $0x8] sm:$0x1f] }
 0x108   :  { %v1497_v17 = vshrl.u32 %v4599_v10, 16  ;;  %v1500_v18 = vshll.u32 %v4599_v10, 16  ;;  %v1506_v19 = vshll.u32 %v4600_v11, 16  ;;  %v4741_v20 = vcombine.low %v2381_v12, %v2381_v12  ;;  %v6243_v27 = vld [vmem:[#allocation4 + $0x8] sm:$0x1e] }
 0x109   :  { %v1149_v21 = vrot.slane %v1147_v37, 7  ;;  %905 = vst [vmem:[#allocation3 + $0x40] sm:$0xff] %v873_v14  ;;  %v874_v23 = vmax.f32 %v689_v15, %v691_v9  ;;  %v5327_v24 = vpop.f32.mrb[20].mxu0  ;;  %v4742_v25 = vcombine.high %v2381_v12, %v2381_v12  ;;  %v6241_v26 = vcombine.low %v6237_v16, %v6237_v16  ;;  %v1272_v10 = vld [vmem:[#allocation4 + $0x20] sm:$0x1f] }
 0x10a   :  { %v935_v28 = vld [vmem:[#allocation3 + $0x30] ss:$2 sm:$0xff]  ;;  %v967_v29 = vld [vmem:[#allocation3 + $0x31] ss:$2 sm:$0xff]  ;;  %v506_v30 = vadd.f32 %v5327_v24, %v6157_v57  ;;  %v497_v31 = vpop.f32.mrb[21].mxu0  ;;  %v1499_v32 = vrot.slane %v1497_v17, 4  ;;  %v4702_v34 = vcombine.high %v6237_v16, %v6237_v16  ;;  %v4639_v35 = vcombine.low %v6243_v27, %v6243_v27 }
 0x10b   :  { %v1152_v36 = vor.u32 %v1150_v13, %v1149_v21  ;;  %v995_v38 = vmax.f32 %v935_v28, %v967_v29  ;;  %906 = vst [vmem:[#allocation3 + $0x48] sm:$0xff] %v874_v23  ;;  %v498_v41 = vadd.f32 %v6157_v57, %v497_v31  ;;  %v5328_v42 = vpop.f32.mrb[22].mxu0  ;;  %v1502_v43 = vrot.slane %v1500_v18, 5  ;;  %v5586_v29 = vld [vmem:[%s7079_s3 + $0x80] sm:$0xff]   ;;  %v5598_v16 = vld [vmem:[%s7079_s3 + $0xd0] sm:$0xff]  }
 0x10c   :  { %v694_v44 = vmax.f32 %v506_v30, 0.0  ;;  %v509_v45 = vadd.f32 %v5328_v42, %v6157_v57  ;;  %v500_v46 = vpop.f32.mrb[23].mxu0  ;;  %v1508_v47 = vrot.slane %v1506_v19, 5  ;;  %v4773_v48 = vrot.slane %v4741_v20, 9  ;;  %v5591_v42 = vld [vmem:[%s7079_s3 + $0xc8] sm:$0xff]  }
 0x10d   :  { %v1270_v49 = vsel %vm6190_vm12, %v1152_v36, %v1269_v22  ;;  %v1119_v50 = vpack.c.bf16 %v995_v38, %v995_v38  ;;  %v692_v52 = vmax.f32 %v498_v41, 0.0  ;;  %v501_v54 = vadd.f32 %v6157_v57, %v500_v46  ;;  %v2382_v55 = vld [vmem:[#allocation4 + $0x10] sm:$0x1e]  ;;  %v5534_v36 = vld [vmem:[#allocation4] ss:$8 sps:$4 sm:$0xff]  }
 0x10e   :  { %1271 = vst [vmem:[#allocation4 + $0x18] sm:$0x1f] %v1270_v49  ;;  %v695_v56 = vmax.f32 %v509_v45, 0.0  ;;  %v1503_v58 = vor.u32 %v1502_v43, %v1499_v32  ;;  %v4743_v59 = vcombine.low %v2382_v55, %v2382_v55  ;;  %v4744_v60 = vcombine.high %v2382_v55, %v2382_v55  ;;  %v6255_v62 = vld [vmem:[#allocation4 + $0x10] sm:$0x1f] }
 0x10f   :  { %v1154_v63 = vshrl.u32 %v1119_v50, 16  ;;  %v1157_v0 = vshll.u32 %v1119_v50, 16  ;;  %v875_v1 = vmax.f32 %v692_v52, %v694_v44  ;;  %v693_v2 = vmax.f32 %v501_v54, 0.0  ;;  %v6293_v50 = vld [vmem:[#allocation4 + $0x10] sm:$0x1f] }
 0x110   :  { %v1504_v4 = vrot.slane %v1503_v58, 4  ;;  %v2479_v5 = vrot.slane %v4742_v25, 5  ;;  %v4774_v6 = vrot.slane %v4743_v59, 9  ;;  %v2483_v8 = vrot.slane %v4744_v60, 5  ;;  %v5593_v58 = vld [vmem:[%s7079_s3 + $0x88] sm:$0xff]  }
 0x111   :  { %v1156_v9 = vrot.slane %v1154_v63, 7  ;;  %907 = vst [vmem:[#allocation3 + $0x50] sm:$0xff] %v875_v1  ;;  %v876_v11 = vmax.f32 %v693_v2, %v695_v56  ;;  %v5331_v12 = vpop.f32.mrb[24].mxu0  ;;  %v6265_v37 = vcombine.low %v6255_v62, %v6255_v62  ;;  %v4704_v13 = vcombine.high %v6255_v62, %v6255_v62  ;;  %v1275_v59 = vld [vmem:[#allocation4 + $0x28] sm:$0x1f] }
 0x112   :  { %v937_v14 = vld [vmem:[#allocation3 + $0x40] ss:$2 sm:$0xff]  ;;  %v969_v15 = vld [vmem:[#allocation3 + $0x41] ss:$2 sm:$0xff]  ;;  %v522_v17 = vadd.f32 %v5331_v12, %v6157_v57  ;;  %v513_v18 = vpop.f32.mrb[25].mxu0  ;;  %v1509_v19 = vsel %vm6208_vm13, %v1504_v4, %v1508_v47  ;;  %v2480_v20 = vsel %vm6259_vm0, %v4773_v48, %v2479_v5  ;;  %v2484_v21 = vsel %vm6259_vm0, %v4774_v6, %v2483_v8  ;;  %v5603_v5 = vld [vmem:[%s7079_s3 + $0x90] sm:$0xff]  }
 0x113   :  { %v1159_v22 = vor.u32 %v1157_v0, %v1156_v9  ;;  %v996_v23 = vmax.f32 %v937_v14, %v969_v15  ;;  %908 = vst [vmem:[#allocation3 + $0x58] sm:$0xff] %v876_v11  ;;  %v514_v24 = vadd.f32 %v6157_v57, %v513_v18  ;;  %v5332_v25 = vpop.f32.mrb[26].mxu0  ;;  %v4629_v28 = vcombine.low %v6218_v51, %v1509_v19  ;;  %v6313_v6 = vld [vmem:[%s7079_s3 + $0x200] sm:$0xff]   ;;  %v5608_v14 = vld [vmem:[%s7079_s3 + $0xd8] sm:$0xff]  }
 0x114   :  { %v698_v30 = vmax.f32 %v522_v17, 0.0  ;;  %v525_v31 = vadd.f32 %v5332_v25, %v6157_v57  ;;  %v516_v32 = vpop.f32.mrb[27].mxu0  ;;  %v4789_v38 = vcombine.low %v2480_v20, %v2484_v21  ;;  %v2118_v41 = vshrl.u32 %v6241_v26, 16  ;;  %5369 = vmatprep.subr.bf16.mxu0 %v6313_v6 }
 0x115   :  { %v1273_v43 = vsel %vm6190_vm12, %v1159_v22, %v1272_v10  ;;  %v1120_v51 = vpack.c.bf16 %v996_v23, %v996_v23  ;;  %v696_v44 = vmax.f32 %v514_v24, 0.0  ;;  %3901 = vmatprep.mubr.bf16.mxu1 %v4629_v28  ;;  %v517_v45 = vadd.f32 %v6157_v57, %v516_v32  ;;  %v6322_v21 = vld [vmem:[#allocation4 + $0x18] sm:$0x1f] }
 0x116   :  { %1274 = vst [vmem:[#allocation4 + $0x20] sm:$0x1f] %v1273_v43  ;;  %v699_v46 = vmax.f32 %v525_v31, 0.0  ;;  %3902 = vmatmul.mubr.bf16.vlgmr.msra.gmra.mrb[0].mxu1 %v5534_v36  ;;  %4095 = vmatprep.mubr.bf16.mxu0 %v4789_v38  ;;  %v2120_v47 = vrot.slane %v2118_v41, 4  ;;  %v2121_v48 = vshll.u32 %v6241_v26, 16  ;;  %v2127_v49 = vshll.u32 %v4702_v34, 16 }
 0x117   :  { %v1161_v52 = vshrl.u32 %v1120_v51, 16  ;;  %v1164_v54 = vshll.u32 %v1120_v51, 16  ;;  %v877_v55 = vmax.f32 %v696_v44, %v698_v30  ;;  %v697_v56 = vmax.f32 %v517_v45, 0.0  ;;  %5075 = vmatpush3.bf16.msra.mxu1 %v5586_v29 }
 0x118   :  { %v2123_v60 = vrot.slane %v2121_v48, 5  ;;  %v2129_v62 = vrot.slane %v2127_v49, 5  ;;  %v2132_v26 = vshrl.u32 %v6265_v37, 16  ;;  %v2135_v63 = vshll.u32 %v6265_v37, 16  ;;  %5076 = vmatprep.subr.bf16.mxu1 %v5591_v42 }
 0x119   :  { %v1163_v34 = vrot.slane %v1161_v52, 7  ;;  %909 = vst [vmem:[#allocation3 + $0x60] sm:$0xff] %v877_v55  ;;  %v878_v0 = vmax.f32 %v697_v56, %v699_v46  ;;  %v5335_v1 = vpop.f32.mrb[28].mxu0  ;;  %v2141_v2 = vshll.u32 %v4704_v13, 16  ;;  %v6305_v4 = vcombine.low %v6293_v50, %v6293_v50  ;;  %v5610_v46 = vld [vmem:[%s7079_s3 + $0x98] sm:$0xff]   ;;  %v5633_v55 = vld [vmem:[%s7079_s3 + $0x208] sm:$0xff]  }
 0x11a   :  { %v939_v8 = vld [vmem:[#allocation3 + $0x50] ss:$2 sm:$0xff]  ;;  %v971_v9 = vld [vmem:[#allocation3 + $0x51] ss:$2 sm:$0xff]  ;;  %v538_v10 = vadd.f32 %v5335_v1, %v6157_v57  ;;  %v529_v11 = vpop.f32.mrb[29].mxu0  ;;  %v2124_v12 = vor.u32 %v2123_v60, %v2120_v47  ;;  %v2134_v37 = vrot.slane %v2132_v26, 4  ;;  %v4602_v13 = vcombine.high %v6293_v50, %v6293_v50 }
 0x11b   :  { %v1166_v15 = vor.u32 %v1164_v54, %v1163_v34  ;;  %v997_v17 = vmax.f32 %v939_v8, %v971_v9  ;;  %910 = vst [vmem:[#allocation3 + $0x68] sm:$0xff] %v878_v0  ;;  %v530_v18 = vadd.f32 %v6157_v57, %v529_v11  ;;  %v5336_v19 = vpop.f32.mrb[30].mxu0  ;;  %v2137_v20 = vrot.slane %v2135_v63, 5  ;;  %5077 = vmatpush3.bf16.msra.mxu1 %v5593_v58  ;;  %v1278_v47 = vld [vmem:[#allocation4 + $0x30] sm:$0x1f]  ;;  %v5615_v54 = vld [vmem:[%s7079_s3 + $0xe0] sm:$0xff]  }
 0x11c   :  { %v702_v22 = vmax.f32 %v538_v10, 0.0  ;;  %v541_v23 = vadd.f32 %v5336_v19, %v6157_v57  ;;  %v2125_v24 = vrot.slane %v2124_v12, 4  ;;  %v2143_v25 = vrot.slane %v2141_v2, 5  ;;  %v532_v28 = vpop.f32.mrb[31].mxu0  ;;  %5078 = vmatprep.subr.bf16.mxu1 %v5598_v16  ;;  %v5620_v11 = vld [vmem:[%s7079_s3 + $0xa0] sm:$0xff]  }
 0x11d   :  { %v1276_v29 = vsel %vm6190_vm12, %v1166_v15, %v1275_v59  ;;  %v1121_v30 = vpack.c.bf16 %v997_v17, %v997_v17  ;;  %v700_v31 = vmax.f32 %v530_v18, 0.0  ;;  %v2138_v32 = vor.u32 %v2137_v20, %v2134_v37  ;;  %v5625_v17 = vld [vmem:[%s7079_s3 + $0xe8] sm:$0xff]  }
 0x11e   :  { %1277 = vst [vmem:[#allocation4 + $0x28] sm:$0x1f] %v1276_v29  ;;  %v703_v36 = vmax.f32 %v541_v23, 0.0  ;;  %v2130_v38 = vsel %vm6208_vm13, %v2125_v24, %v2129_v62  ;;  %v533_v41 = vadd.f32 %v6157_v57, %v532_v28  ;;  %v6333_v42 = vcombine.low %v6322_v21, %v6322_v21  ;;  %v2384_v29 = vld [vmem:[#allocation4 + $0x20] sm:$0x1e] }
 0x11f   :  { %v1168_v43 = vshrl.u32 %v1121_v30, 16  ;;  %v1171_v51 = vshll.u32 %v1121_v30, 16  ;;  %v879_v44 = vmax.f32 %v700_v31, %v702_v22  ;;  %v2139_v45 = vrot.slane %v2138_v32, 4  ;;  %5079 = vmatpush3.bf16.msra.mxu1 %v5603_v5  ;;  %v2383_v22 = vld [vmem:[#allocation4 + $0x18] sm:$0x1e]  ;;  %v5639_v30 = vld [vmem:[%s7079_s3 + $0x210] sm:$0xff]  }
 0x120   :  { %v701_v48 = vmax.f32 %v533_v41, 0.0  ;;  %v4604_v49 = vcombine.high %v6322_v21, %v6322_v21  ;;  %v1511_v50 = vshrl.u32 %v6305_v4, 16  ;;  %v1514_v52 = vshll.u32 %v6305_v4, 16  ;;  %5080 = vmatprep.subr.bf16.mxu1 %v5608_v14 }
 0x121   :  { %v1170_v56 = vrot.slane %v1168_v43, 7  ;;  %911 = vst [vmem:[#allocation3 + $0x70] sm:$0xff] %v879_v44  ;;  %v2144_v58 = vsel %vm6208_vm13, %v2139_v45, %v2143_v25  ;;  %v5339_v59 = vpop.f32.mrb[32].mxu0  ;;  %v1520_v60 = vshll.u32 %v4602_v13, 16  ;;  %v1525_v62 = vshrl.u32 %v6333_v42, 16  ;;  %v5634_v44 = vld [vmem:[%s7079_s3 + $0xf0] sm:$0xff]  }
 0x122   :  { %v941_v26 = vld [vmem:[#allocation3 + $0x60] ss:$2 sm:$0xff]  ;;  %v973_v63 = vld [vmem:[#allocation3 + $0x61] ss:$2 sm:$0xff]  ;;  %v4733_v16 = vcombine.low %v2130_v38, %v2144_v58  ;;  %v880_v34 = vmax.f32 %v701_v48, %v703_v36  ;;  %v554_v0 = vadd.f32 %v5339_v59, %v6157_v57  ;;  %v545_v1 = vpop.f32.mrb[33].mxu0  ;;  %v1513_v2 = vrot.slane %v1511_v50, 4 }
 0x123   :  { %v1173_v4 = vor.u32 %v1171_v51, %v1170_v56  ;;  %v998_v5 = vmax.f32 %v941_v26, %v973_v63  ;;  %v546_v8 = vadd.f32 %v6157_v57, %v545_v1  ;;  %v5340_v9 = vpop.f32.mrb[34].mxu0  ;;  %v1516_v10 = vrot.slane %v1514_v52, 5  ;;  %5081 = vmatpush3.bf16.msra.mxu1 %v5610_v46  ;;  %v1281_v50 = vld [vmem:[#allocation4 + $0x38] sm:$0x1f] }
 0x124   :  { %4096 = vmatmul.mubr.bf16.vlgmr.msra.gmra.mrb[64].mxu0 %v4733_v16  ;;  %912 = vst [vmem:[#allocation3 + $0x78] sm:$0xff] %v880_v34  ;;  %v706_v12 = vmax.f32 %v554_v0, 0.0  ;;  %v557_v37 = vadd.f32 %v5340_v9, %v6157_v57  ;;  %v1522_v13 = vrot.slane %v1520_v60, 5  ;;  %v1527_v14 = vrot.slane %v1525_v62, 4  ;;  %v548_v15 = vpop.f32.mrb[35].mxu0  ;;  %5082 = vmatprep.subr.bf16.mxu1 %v5615_v54  ;;  %v5640_v60 = vld [vmem:[%s7079_s3 + $0xb0] sm:$0xff]  }
 0x125   :  { %v1279_v18 = vsel %vm6190_vm12, %v1173_v4, %v1278_v47  ;;  %v1122_v19 = vpack.c.bf16 %v998_v5, %v998_v5  ;;  %v704_v20 = vmax.f32 %v546_v8, 0.0  ;;  %v1517_v21 = vor.u32 %v1516_v10, %v1513_v2  ;;  %5370 = vmatpush3.bf16.msra.mxu0 %v6313_v6  ;;  %v5628_v6 = vld [vmem:[%s7079_s3 + $0xa8] sm:$0xff]   ;;  %v5641_v62 = vld [vmem:[%s7079_s3 + $0x218] sm:$0xff]  }
 0x126   :  { %1280 = vst [vmem:[#allocation4 + $0x30] sm:$0x1f] %v1279_v18  ;;  %v707_v23 = vmax.f32 %v557_v37, 0.0  ;;  %v1528_v24 = vshll.u32 %v6333_v42, 16  ;;  %v1534_v25 = vshll.u32 %v4604_v49, 16  ;;  %v549_v28 = vadd.f32 %v6157_v57, %v548_v15  ;;  %5371 = vmatprep.subr.bf16.mxu0 %v5633_v55  ;;  %v5646_v10 = vld [vmem:[%s7079_s3 + $0xf8] sm:$0xff]  }
 0x127   :  { %v1175_v31 = vshrl.u32 %v1122_v19, 16  ;;  %v1178_v32 = vshll.u32 %v1122_v19, 16  ;;  %v881_v36 = vmax.f32 %v704_v20, %v706_v12  ;;  %v1518_v38 = vrot.slane %v1517_v21, 4  ;;  %5083 = vmatpush3.bf16.msra.mxu1 %v5620_v11  ;;  %v2023_v9 = vld [vmem:[#allocation4 + $0x18] sm:$0x1f] }
 0x128   :  { %v1530_v41 = vrot.slane %v1528_v24, 5  ;;  %v1536_v42 = vrot.slane %v1534_v25, 5  ;;  %v705_v43 = vmax.f32 %v549_v28, 0.0  ;;  %v4745_v51 = vcombine.low %v2383_v22, %v2383_v22  ;;  %5084 = vmatprep.subr.bf16.mxu1 %v5625_v17  ;;  %v2024_v20 = vld [vmem:[#allocation4 + $0x20] sm:$0x1f] }
 0x129   :  { %v1177_v45 = vrot.slane %v1175_v31, 7  ;;  %913 = vst [vmem:[#allocation3 + $0x80] sm:$0xff] %v881_v36  ;;  %v1523_v46 = vsel %vm6208_vm13, %v1518_v38, %v1522_v13  ;;  %v4746_v47 = vcombine.high %v2383_v22, %v2383_v22  ;;  %v4747_v48 = vcombine.low %v2384_v29, %v2384_v29  ;;  %v5343_v49 = vpop.f32.mrb[36].mxu0  ;;  %5372 = vmatpush3.bf16.msra.mxu0 %v5633_v55  ;;  %v5550_v22 = vld [vmem:[#allocation4 + $0x10] ss:$8 sps:$4 sm:$0xff]   ;;  %v5647_v28 = vld [vmem:[%s7079_s3 + $0x220] sm:$0xff]  }
 0x12a   :  { %v1531_v52 = vor.u32 %v1530_v41, %v1527_v14  ;;  %v882_v54 = vmax.f32 %v705_v43, %v707_v23  ;;  %v4748_v56 = vcombine.high %v2384_v29, %v2384_v29  ;;  %v4775_v58 = vrot.slane %v4745_v51, 9  ;;  %v561_v59 = vpop.f32.mrb[37].mxu0  ;;  %5373 = vmatprep.subr.bf16.mxu0 %v5639_v30  ;;  %v5649_v29 = vld [vmem:[%s7079_s3 + $0xb8] sm:$0xff]   ;;  %v6405_v38 = vld [vmem:[#allocation4 + $0x20] sm:$0x1f] }
 0x12b   :  { %v1180_v26 = vor.u32 %v1178_v32, %v1177_v45  ;;  %v943_v63 = vld [vmem:[#allocation3 + $0x70] ss:$2 sm:$0xff]  ;;  %v975_v16 = vld [vmem:[#allocation3 + $0x71] ss:$2 sm:$0xff]  ;;  %v2487_v34 = vrot.slane %v4746_v47, 5  ;;  %v4776_v55 = vrot.slane %v4747_v48, 9  ;;  %v570_v0 = vadd.f32 %v5343_v49, %v6157_v57  ;;  %5085 = vmatpush3.bf16.msra.mxu1 %v5628_v6 }
 0x12c   :  { %v999_v1 = vmax.f32 %v943_v63, %v975_v16  ;;  %v1532_v2 = vrot.slane %v1531_v52, 4  ;;  %914 = vst [vmem:[#allocation3 + $0x88] sm:$0xff] %v882_v54  ;;  %v2491_v4 = vrot.slane %v4748_v56, 5  ;;  %v562_v5 = vadd.f32 %v6157_v57, %v561_v59  ;;  %v5344_v8 = vpop.f32.mrb[38].mxu0  ;;  %5086 = vmatprep.subr.bf16.mxu1 %v5634_v44  ;;  %v5660_v6 = vld [vmem:[%s7079_s3 + $0x1c0] sm:$0xff]   ;;  %v5655_v52 = vld [vmem:[%s7079_s3 + $0x228] sm:$0xff]  }
 0x12d   :  { %v1282_v11 = vsel %vm6190_vm12, %v1180_v26, %v1281_v50  ;;  %v2488_v12 = vsel %vm6259_vm0, %v4775_v58, %v2487_v34  ;;  %v710_v37 = vmax.f32 %v570_v0, 0.0  ;;  %v6392_v13 = vadd.f32 %v5344_v8, %v6157_v57  ;;  %v564_v14 = vpop.f32.mrb[39].mxu0  ;;  %5374 = vmatpush3.bf16.msra.mxu0 %v5639_v30 }
 0x12e   :  { %1283 = vst [vmem:[#allocation4 + $0x38] sm:$0x1f] %v1282_v11  ;;  %v1123_v15 = vpack.c.bf16 %v999_v1, %v999_v1  ;;  %v1537_v17 = vsel %vm6208_vm13, %v1532_v2, %v1536_v42  ;;  %v2492_v18 = vsel %vm6259_vm0, %v4776_v55, %v2491_v4  ;;  %v708_v19 = vmax.f32 %v562_v5, 0.0  ;;  %5375 = vmatprep.subr.bf16.mxu0 %v5641_v62  ;;  %v1388_v11 = vld [vmem:[#allocation4 + $0x28] sm:$0x1f] }
 0x12f   :  { %v4630_v21 = vcombine.low %v1523_v46, %v1537_v17  ;;  %v4790_v23 = vcombine.low %v2488_v12, %v2492_v18  ;;  %v711_v24 = vmax.f32 %v6392_v13, 0.0  ;;  %v4705_v25 = vcombine.low %v2023_v9, %v2023_v9  ;;  %5087 = vmatpush3.bf16.msra.mxu1 %v5640_v60  ;;  %v1284_v46 = vld [vmem:[#allocation4 + $0x40] sm:$0x1f] }
 0x130   :  { %v1182_v30 = vshrl.u32 %v1123_v15, 16  ;;  %v1185_v31 = vshll.u32 %v1123_v15, 16  ;;  %v883_v32 = vmax.f32 %v708_v19, %v710_v37  ;;  %v4706_v36 = vcombine.high %v2023_v9, %v2023_v9  ;;  %5088 = vmatprep.subr.bf16.mxu1 %v5646_v10  ;;  %v5661_v15 = vld [vmem:[%s7079_s3 + $0x230] sm:$0xff]  }
 0x131   :  { %3909 = vmatprep.mubr.bf16.mxu1 %v4630_v21  ;;  %4103 = vmatprep.mubr.bf16.mxu0 %v4790_v23  ;;  %v4707_v41 = vcombine.low %v2024_v20, %v2024_v20  ;;  %v4708_v42 = vcombine.high %v2024_v20, %v2024_v20  ;;  %v2146_v43 = vshrl.u32 %v4705_v25, 16  ;;  %v2149_v51 = vshll.u32 %v4705_v25, 16  ;;  %v5347_v44 = vpop.f32.mrb[40].mxu0  ;;  %v6426_v20 = vld [vmem:[%s7078_s2] ss:$0 sm:$0xff] }
 0x132   :  { %v1184_v45 = vrot.slane %v1182_v30, 7  ;;  %3910 = vmatmul.mubr.bf16.gmra.mrb[4].mxu1 %v5550_v22  ;;  %915 = vst [vmem:[#allocation3 + $0x90] sm:$0xff] %v883_v32  ;;  %v2155_v47 = vshll.u32 %v4706_v36, 16  ;;  %v565_v48 = vadd.f32 %v6157_v57, %v564_v14  ;;  %v586_v49 = vadd.f32 %v5347_v44, %v6157_v57  ;;  %v577_v50 = vpop.f32.mrb[41].mxu0  ;;  %5376 = vmatpush3.bf16.msra.mxu0 %v5641_v62  ;;  %v1287_v22 = vld [vmem:[#allocation4 + $0x58] sm:$0x1f] }
 0x133   :  { %v945_v54 = vld [vmem:[#allocation3 + $0x80] ss:$2 sm:$0xff]  ;;  %v977_v56 = vld [vmem:[#allocation3 + $0x81] ss:$2 sm:$0xff]  ;;  %v2148_v58 = vrot.slane %v2146_v43, 4  ;;  %v2151_v59 = vrot.slane %v2149_v51, 5  ;;  %v578_v60 = vadd.f32 %v6157_v57, %v577_v50  ;;  %v4605_v26 = vcombine.low %v6405_v38, %v6405_v38  ;;  %5377 = vmatprep.subr.bf16.mxu0 %v5647_v28  ;;  %5089 = vmatpush3.bf16.msra.mxu1 %v5649_v29 }
 0x134   :  { %v1187_v63 = vor.u32 %v1185_v31, %v1184_v45  ;;  %v1000_v16 = vmax.f32 %v945_v54, %v977_v56  ;;  %v2157_v34 = vrot.slane %v2155_v47, 5  ;;  %v2160_v55 = vshrl.u32 %v4707_v41, 16  ;;  %v5348_v62 = vpop.f32.mrb[42].mxu0  ;;  %5202 = vmatprep.subr.bf16.mxu1 %v5660_v6  ;;  %v2385_v6 = vld [vmem:[#allocation4 + $0x28] sm:$0x1e] }
 0x135   :  { %v2152_v0 = vor.u32 %v2151_v59, %v2148_v58  ;;  %v2163_v1 = vshll.u32 %v4707_v41, 16  ;;  %v2169_v2 = vshll.u32 %v4708_v42, 16  ;;  %v709_v4 = vmax.f32 %v565_v48, 0.0  ;;  %v580_v5 = vpop.f32.mrb[43].mxu0  ;;  %v2386_v50 = vld [vmem:[#allocation4 + $0x30] sm:$0x1e] }
 0x136   :  { %v1285_v8 = vsel %vm6190_vm12, %v1187_v63, %v1284_v46  ;;  %v1124_v57 = vpack.c.bf16 %v1000_v16, %v1000_v16  ;;  %v2162_v9 = vrot.slane %v2160_v55, 4  ;;  %v714_v10 = vmax.f32 %v586_v49, 0.0  ;;  %5378 = vmatpush3.bf16.msra.mxu0 %v5647_v28 }
 0x137   :  { %1286 = vst [vmem:[#allocation4 + $0x40] sm:$0x1f] %v1285_v8  ;;  %v2153_v12 = vrot.slane %v2152_v0, 4  ;;  %v2165_v37 = vrot.slane %v2163_v1, 5  ;;  %v2171_v13 = vrot.slane %v2169_v2, 5  ;;  %v884_v14 = vmax.f32 %v709_v4, %v711_v24  ;;  %5379 = vmatprep.subr.bf16.mxu0 %v5655_v52 }
 0x138   :  { %v1189_v17 = vshrl.u32 %v1124_v57, 16  ;;  %v1192_v18 = vshll.u32 %v1124_v57, 16  ;;  %v712_v19 = vmax.f32 %v578_v60, 0.0  ;;  %v6429_v21 = vadd.f32 %v6426_v20, %v5348_v62 }
 0x139   :  { %v2158_v23 = vsel %vm6208_vm13, %v2153_v12, %v2157_v34  ;;  %v2166_v24 = vor.u32 %v2165_v37, %v2162_v9  ;;  %916 = vst [vmem:[#allocation3 + $0x98] sm:$0xff] %v884_v14  ;;  %v4606_v25 = vcombine.high %v6405_v38, %v6405_v38  ;;  %v4607_v28 = vcombine.low %v1388_v11, %v1388_v11  ;;  %v5351_v29 = vpop.f32.mrb[44].mxu0  ;;  %v5672_v38 = vld [vmem:[%s7079_s3 + $0x238] sm:$0xff]  }
 0x13a   :  { %v1191_v30 = vrot.slane %v1189_v17, 7  ;;  %v885_v31 = vmax.f32 %v712_v19, %v714_v10  ;;  %v715_v32 = vmax.f32 %v6429_v21, 0.0  ;;  %v4608_v36 = vcombine.high %v1388_v11, %v1388_v11  ;;  %v593_v41 = vpop.f32.mrb[45].mxu0  ;;  %5380 = vmatpush3.bf16.msra.mxu0 %v5655_v52 }
 0x13b   :  { %v2167_v42 = vrot.slane %v2166_v24, 4  ;;  %v1539_v43 = vshrl.u32 %v4605_v26, 16  ;;  %v1542_v51 = vshll.u32 %v4605_v26, 16  ;;  %v1548_v44 = vshll.u32 %v4606_v25, 16  ;;  %v6436_v45 = vpop.f32.mrb[46].mxu0  ;;  %5381 = vmatprep.subr.bf16.mxu0 %v5661_v15 }
 0x13c   :  { %v1194_v46 = vor.u32 %v1192_v18, %v1191_v30  ;;  %917 = vst [vmem:[#allocation3 + $0xa0] sm:$0xff] %v885_v31  ;;  %v1553_v47 = vshrl.u32 %v4607_v28, 16  ;;  %v1556_v48 = vshll.u32 %v4607_v28, 16  ;;  %v1562_v49 = vshll.u32 %v4608_v36, 16  ;;  %v6441_v54 = vpop.f32.mrb[47].mxu0 }
 0x13d   :  { %v2172_v52 = vsel %vm6208_vm13, %v2167_v42, %v2171_v13  ;;  %v1541_v56 = vrot.slane %v1539_v43, 4  ;;  %v1544_v58 = vrot.slane %v1542_v51, 5  ;;  %v1550_v59 = vrot.slane %v1548_v44, 5  ;;  %v2025_v24 = vld [vmem:[#allocation4 + $0x28] sm:$0x1f] }
 0x13e   :  { %v1288_v60 = vsel %vm6190_vm12, %v1194_v46, %v1287_v22  ;;  %v4734_v26 = vcombine.low %v2158_v23, %v2172_v52  ;;  %v1555_v63 = vrot.slane %v1553_v47, 4  ;;  %v1558_v16 = vrot.slane %v1556_v48, 5  ;;  %5382 = vmatpush3.bf16.msra.mxu0 %v5661_v15  ;;  %v5563_v44 = vld [vmem:[#allocation4 + $0x20] ss:$8 sps:$4 sm:$0xff]  }
 0x13f   :  { %1289 = vst [vmem:[#allocation4 + $0x58] sm:$0x1f] %v1288_v60  ;;  %v1545_v34 = vor.u32 %v1544_v58, %v1541_v56  ;;  %v1564_v55 = vrot.slane %v1562_v49, 5  ;;  %v581_v62 = vadd.f32 %v6426_v20, %v580_v5  ;;  %v4749_v0 = vcombine.low %v2385_v6, %v2385_v6  ;;  %5383 = vmatprep.subr.bf16.mxu0 %v5672_v38  ;;  %v1290_v56 = vld [vmem:[#allocation4 + $0x60] sm:$0x1f] }
 0x140   :  { %4104 = vmatmul.mubr.bf16.gmra.mrb[68].mxu0 %v4734_v26  ;;  %v947_v1 = vld [vmem:[#allocation3 + $0x90] ss:$2 sm:$0xff]  ;;  %v979_v2 = vld [vmem:[#allocation3 + $0x91] ss:$2 sm:$0xff]  ;;  %v1559_v4 = vor.u32 %v1558_v16, %v1555_v63  ;;  %v4750_v8 = vcombine.high %v2385_v6, %v2385_v6  ;;  %v4751_v57 = vcombine.low %v2386_v50, %v2386_v50  ;;  %v4752_v9 = vcombine.high %v2386_v50, %v2386_v50 }
 0x141   :  { %v1001_v10 = vmax.f32 %v947_v1, %v979_v2  ;;  %v1546_v11 = vrot.slane %v1545_v34, 4  ;;  %v713_v12 = vmax.f32 %v581_v62, 0.0  ;;  %v4777_v37 = vrot.slane %v4749_v0, 9  ;;  %v6448_v13 = vpop.f32.mrb[48].mxu0  ;;  %v2026_v6 = vld [vmem:[#allocation4 + $0x30] sm:$0x1f] }
 0x142   :  { %v1560_v14 = vrot.slane %v1559_v4, 4  ;;  %v2495_v15 = vrot.slane %v4750_v8, 5  ;;  %v4778_v17 = vrot.slane %v4751_v57, 9  ;;  %v2499_v18 = vrot.slane %v4752_v9, 5  ;;  %v609_v5 = vpop.f32.mrb[49].mxu0  ;;  %5384 = vmatpush3.bf16.msra.mxu0 %v5672_v38 }
 0x143   :  { %v1125_v19 = vpack.c.bf16 %v1001_v10, %v1001_v10  ;;  %v1551_v21 = vsel %vm6208_vm13, %v1546_v11, %v1550_v59  ;;  %v886_v22 = vmax.f32 %v713_v12, %v715_v32  ;;  %v602_v23 = vadd.f32 %v6426_v20, %v5351_v29  ;;  %v5356_v25 = vpop.f32.mrb[50].mxu0  ;;  %v1389_v4 = vld [vmem:[#allocation4 + $0x30] sm:$0x1f] }
 0x144   :  { %v1565_v28 = vsel %vm6208_vm13, %v1560_v14, %v1564_v55  ;;  %v2496_v30 = vsel %vm6259_vm0, %v4777_v37, %v2495_v15  ;;  %v2500_v31 = vsel %vm6259_vm0, %v4778_v17, %v2499_v18  ;;  %v594_v36 = vadd.f32 %v6426_v20, %v593_v41  ;;  %v6460_v42 = vpop.f32.mrb[51].mxu0 }
 0x145   :  { %v1196_v43 = vshrl.u32 %v1125_v19, 16  ;;  %v1199_v32 = vshll.u32 %v1125_v19, 16  ;;  %v4631_v51 = vcombine.low %v1551_v21, %v1565_v28  ;;  %918 = vst [vmem:[#allocation3 + $0xa8] sm:$0xff] %v886_v22  ;;  %v4791_v29 = vcombine.low %v2496_v30, %v2500_v31 }
 0x146   :  { %v718_v38 = vmax.f32 %v602_v23, 0.0  ;;  %v716_v46 = vmax.f32 %v594_v36, 0.0  ;;  %v605_v47 = vadd.f32 %v6426_v20, %v6436_v45  ;;  %v4709_v48 = vcombine.low %v2025_v24, %v2025_v24 }
 0x147   :  { %v1198_v49 = vrot.slane %v1196_v43, 7  ;;  %3917 = vmatprep.mubr.bf16.mxu1 %v4631_v51  ;;  %4111 = vmatprep.mubr.bf16.mxu0 %v4791_v29  ;;  %v4710_v50 = vcombine.high %v2025_v24, %v2025_v24  ;;  %v4711_v41 = vcombine.low %v2026_v6, %v2026_v6  ;;  %v4712_v52 = vcombine.high %v2026_v6, %v2026_v6  ;;  %v1390_v24 = vld [vmem:[#allocation4 + $0x38] sm:$0x1f] }
 0x148   :  { %3918 = vmatmul.mubr.bf16.gmra.mrb[8].mxu1 %v5563_v44  ;;  %v887_v58 = vmax.f32 %v716_v46, %v718_v38  ;;  %v719_v59 = vmax.f32 %v605_v47, 0.0  ;;  %v2174_v60 = vshrl.u32 %v4709_v48, 16  ;;  %v2177_v26 = vshll.u32 %v4709_v48, 16 }
 0x149   :  { %v1201_v63 = vor.u32 %v1199_v32, %v1198_v49  ;;  %v2183_v16 = vshll.u32 %v4710_v50, 16  ;;  %v2188_v34 = vshrl.u32 %v4711_v41, 16  ;;  %v2191_v55 = vshll.u32 %v4711_v41, 16  ;;  %v6464_v62 = vpop.f32.mrb[52].mxu0  ;;  %v1293_v50 = vld [vmem:[#allocation4 + $0x68] sm:$0x1f] }
 0x14a   :  { %919 = vst [vmem:[#allocation3 + $0xb0] sm:$0xff] %v887_v58  ;;  %v2176_v45 = vrot.slane %v2174_v60, 4  ;;  %v2179_v0 = vrot.slane %v2177_v26, 5  ;;  %v2197_v1 = vshll.u32 %v4712_v52, 16  ;;  %v597_v2 = vadd.f32 %v6426_v20, %v6441_v54  ;;  %v6468_v8 = vpop.f32.mrb[53].mxu0 }
 0x14b   :  { %v1291_v57 = vsel %vm6190_vm12, %v1201_v63, %v1290_v56  ;;  %v2185_v9 = vrot.slane %v2183_v16, 5  ;;  %v2190_v10 = vrot.slane %v2188_v34, 4  ;;  %v2193_v11 = vrot.slane %v2191_v55, 5  ;;  %v6472_v12 = vpop.f32.mrb[54].mxu0 }
 0x14c   :  { %1292 = vst [vmem:[#allocation4 + $0x60] sm:$0x1f] %v1291_v57  ;;  %v949_v37 = vld [vmem:[#allocation3 + $0xa0] ss:$2 sm:$0xff]  ;;  %v981_v14 = vld [vmem:[#allocation3 + $0xa1] ss:$2 sm:$0xff]  ;;  %v2180_v15 = vor.u32 %v2179_v0, %v2176_v45  ;;  %v618_v54 = vadd.f32 %v6426_v20, %v6448_v13  ;;  %v610_v22 = vadd.f32 %v6426_v20, %v609_v5  ;;  %v621_v23 = vadd.f32 %v6426_v20, %v5356_v25 }
 0x14d   :  { %v2199_v17 = vrot.slane %v2197_v1, 5  ;;  %v717_v18 = vmax.f32 %v597_v2, 0.0  ;;  %v1002_v19 = vmax.f32 %v949_v37, %v981_v14  ;;  %v2194_v21 = vor.u32 %v2193_v11, %v2190_v10  ;;  %v6478_v28 = vpop.f32.mrb[55].mxu0 }
 0x14e   :  { %v2181_v30 = vrot.slane %v2180_v15, 4  ;;  %v722_v36 = vmax.f32 %v618_v54, 0.0  ;;  %v4609_v6 = vcombine.low %v1389_v4, %v1389_v4  ;;  %v720_v51 = vmax.f32 %v610_v22, 0.0 }
 0x14f   :  { %v888_v31 = vmax.f32 %v717_v18, %v719_v59  ;;  %v1126_v43 = vpack.c.bf16 %v1002_v19, %v1002_v19  ;;  %v2195_v32 = vrot.slane %v2194_v21, 4  ;;  %v723_v29 = vmax.f32 %v621_v23, 0.0  ;;  %v2387_v59 = vld [vmem:[#allocation4 + $0x38] sm:$0x1e] }
 0x150   :  { %v2186_v13 = vsel %vm6208_vm13, %v2181_v30, %v2185_v9  ;;  %v4610_v44 = vcombine.high %v1389_v4, %v1389_v4  ;;  %v4611_v38 = vcombine.low %v1390_v24, %v1390_v24  ;;  %v4612_v5 = vcombine.high %v1390_v24, %v1390_v24  ;;  %v2388_v4 = vld [vmem:[#allocation4 + $0x40] sm:$0x1e] }
 0x151   :  { %920 = vst [vmem:[#allocation3 + $0xb8] sm:$0xff] %v888_v31  ;;  %v1203_v46 = vshrl.u32 %v1126_v43, 16  ;;  %v1206_v25 = vshll.u32 %v1126_v43, 16  ;;  %v2200_v47 = vsel %vm6208_vm13, %v2195_v32, %v2199_v17  ;;  %v889_v48 = vmax.f32 %v720_v51, %v722_v36  ;;  %v6484_v49 = vpop.f32.mrb[56].mxu0 }
 0x152   :  { %v4735_v41 = vcombine.low %v2186_v13, %v2200_v47  ;;  %v1567_v52 = vshrl.u32 %v4609_v6, 16  ;;  %v1570_v56 = vshll.u32 %v4609_v6, 16  ;;  %v1576_v58 = vshll.u32 %v4610_v44, 16  ;;  %v6486_v60 = vpop.f32.mrb[57].mxu0 }
 0x153   :  { %v1205_v26 = vrot.slane %v1203_v46, 7  ;;  %921 = vst [vmem:[#allocation3 + $0xc0] sm:$0xff] %v889_v48  ;;  %v1581_v63 = vshrl.u32 %v4611_v38, 16  ;;  %v1584_v16 = vshll.u32 %v4611_v38, 16  ;;  %v1590_v34 = vshll.u32 %v4612_v5, 16  ;;  %v6488_v55 = vpop.f32.mrb[58].mxu0 }
 0x154   :  { %4112 = vmatmul.mubr.bf16.gmra.mrb[72].mxu0 %v4735_v41  ;;  %v1569_v45 = vrot.slane %v1567_v52, 4  ;;  %v1572_v0 = vrot.slane %v1570_v56, 5  ;;  %v1578_v1 = vrot.slane %v1576_v58, 5  ;;  %v613_v2 = vadd.f32 %v6426_v20, %v6460_v42  ;;  %v6492_v57 = vpop.f32.mrb[59].mxu0  ;;  %v2028_v52 = vld [vmem:[#allocation4 + $0x40] sm:$0x1f] }
 0x155   :  { %v1208_v9 = vor.u32 %v1206_v25, %v1205_v26  ;;  %v1583_v10 = vrot.slane %v1581_v63, 4  ;;  %v1586_v11 = vrot.slane %v1584_v16, 5  ;;  %v1592_v37 = vrot.slane %v1590_v34, 5  ;;  %v2027_v25 = vld [vmem:[#allocation4 + $0x38] sm:$0x1f] }
 0x156   :  { %v1573_v14 = vor.u32 %v1572_v0, %v1569_v45  ;;  %v721_v15 = vmax.f32 %v613_v2, 0.0  ;;  %v4753_v17 = vcombine.low %v2387_v59, %v2387_v59  ;;  %v4754_v18 = vcombine.high %v2387_v59, %v2387_v59  ;;  %v5576_v63 = vld [vmem:[#allocation4 + $0x30] ss:$8 sps:$4 sm:$0xff]  }
 0x157   :  { %v1294_v54 = vsel %vm6190_vm12, %v1208_v9, %v1293_v50  ;;  %v1587_v22 = vor.u32 %v1586_v11, %v1583_v10  ;;  %v4755_v23 = vcombine.low %v2388_v4, %v2388_v4  ;;  %v4756_v24 = vcombine.high %v2388_v4, %v2388_v4  ;;  %v1296_v9 = vld [vmem:[#allocation4 + $0x70] sm:$0x1f] }
 0x158   :  { %v951_v19 = vld [vmem:[#allocation3 + $0xb0] ss:$2 sm:$0xff]  ;;  %v983_v21 = vld [vmem:[#allocation3 + $0xb1] ss:$2 sm:$0xff]  ;;  %1295 = vst [vmem:[#allocation4 + $0x68] sm:$0x1f] %v1294_v54  ;;  %v890_v31 = vmax.f32 %v721_v15, %v723_v29  ;;  %v634_v5 = vadd.f32 %v6426_v20, %v6464_v62  ;;  %v626_v46 = vadd.f32 %v6426_v20, %v6468_v8  ;;  %v637_v41 = vadd.f32 %v6426_v20, %v6472_v12 }
 0x159   :  { %v1003_v42 = vmax.f32 %v951_v19, %v983_v21  ;;  %v1574_v30 = vrot.slane %v1573_v14, 4  ;;  %v4779_v36 = vrot.slane %v4753_v17, 9  ;;  %v1588_v6 = vrot.slane %v1587_v22, 4  ;;  %v6496_v13 = vpop.f32.mrb[60].mxu0 }
 0x15a   :  { %v2503_v43 = vrot.slane %v4754_v18, 5  ;;  %v4780_v32 = vrot.slane %v4755_v23, 9  ;;  %v2507_v51 = vrot.slane %v4756_v24, 5  ;;  %922 = vst [vmem:[#allocation3 + $0xc8] sm:$0xff] %v890_v31  ;;  %v6504_v29 = vpop.f32.mrb[61].mxu0  ;;  %v726_v16 = vmax.f32 %v634_v5, 0.0 }
 0x15b   :  { %v1127_v44 = vpack.c.bf16 %v1003_v42, %v1003_v42  ;;  %v1579_v38 = vsel %vm6208_vm13, %v1574_v30, %v1578_v1  ;;  %v1593_v47 = vsel %vm6208_vm13, %v1588_v6, %v1592_v37  ;;  %v6514_v62 = vpop.f32.mrb[62].mxu0  ;;  %v724_v34 = vmax.f32 %v626_v46, 0.0  ;;  %v1392_v46 = vld [vmem:[#allocation4 + $0x58] sm:$0x1f] }
 0x15c   :  { %v2504_v48 = vsel %vm6259_vm0, %v4779_v36, %v2503_v43  ;;  %v2508_v50 = vsel %vm6259_vm0, %v4780_v32, %v2507_v51  ;;  %v4632_v58 = vcombine.low %v1579_v38, %v1593_v47  ;;  %v6516_v26 = vpop.f32.mrb[63].mxu0  ;;  %v727_v45 = vmax.f32 %v637_v41, 0.0 }
 0x15d   :  { %v1210_v56 = vshrl.u32 %v1127_v44, 16  ;;  %v1213_v8 = vshll.u32 %v1127_v44, 16  ;;  %v4792_v59 = vcombine.low %v2504_v48, %v2508_v50  ;;  %v4713_v0 = vcombine.low %v2027_v25, %v2027_v25  ;;  %v2389_v50 = vld [vmem:[#allocation4 + $0x58] sm:$0x1e] }
 0x15e   :  { %3925 = vmatprep.mubr.bf16.mxu1 %v4632_v58  ;;  %v4714_v2 = vcombine.high %v2027_v25, %v2027_v25  ;;  %v4715_v4 = vcombine.low %v2028_v52, %v2028_v52  ;;  %v4716_v12 = vcombine.high %v2028_v52, %v2028_v52  ;;  %v891_v10 = vmax.f32 %v724_v34, %v726_v16  ;;  %v2390_v34 = vld [vmem:[#allocation4 + $0x60] sm:$0x1e] }
 0x15f   :  { %v1212_v1 = vrot.slane %v1210_v56, 7  ;;  %4119 = vmatprep.mubr.bf16.mxu0 %v4792_v59  ;;  %3926 = vmatmul.mubr.bf16.gmra.mrb[12].mxu1 %v5576_v63  ;;  %v2202_v11 = vshrl.u32 %v4713_v0, 16  ;;  %v2205_v37 = vshll.u32 %v4713_v0, 16  ;;  %v629_v14 = vadd.f32 %v6426_v20, %v6478_v28 }
 0x160   :  { %v2211_v17 = vshll.u32 %v4714_v2, 16  ;;  %v2216_v18 = vshrl.u32 %v4715_v4, 16  ;;  %v2219_v54 = vshll.u32 %v4715_v4, 16  ;;  %923 = vst [vmem:[#allocation3 + $0xd0] sm:$0xff] %v891_v10  ;;  %v650_v24 = vadd.f32 %v6426_v20, %v6484_v49  ;;  %v1299_v2 = vld [vmem:[#allocation4 + $0x78] sm:$0x1f] }
 0x161   :  { %v1215_v15 = vor.u32 %v1213_v8, %v1212_v1  ;;  %v953_v19 = vld [vmem:[#allocation3 + $0xc0] ss:$2 sm:$0xff]  ;;  %v985_v21 = vld [vmem:[#allocation3 + $0xc1] ss:$2 sm:$0xff]  ;;  %v2204_v22 = vrot.slane %v2202_v11, 4  ;;  %v2207_v23 = vrot.slane %v2205_v37, 5  ;;  %v642_v42 = vadd.f32 %v6426_v20, %v6486_v60 }
 0x162   :  { %v1004_v31 = vmax.f32 %v953_v19, %v985_v21  ;;  %v2213_v28 = vrot.slane %v2211_v17, 5  ;;  %v2218_v36 = vrot.slane %v2216_v18, 4  ;;  %v2221_v43 = vrot.slane %v2219_v54, 5  ;;  %v2029_v21 = vld [vmem:[#allocation4 + $0x58] sm:$0x1f] }
 0x163   :  { %v1297_v30 = vsel %vm6190_vm12, %v1215_v15, %v1296_v9  ;;  %v2208_v6 = vor.u32 %v2207_v23, %v2204_v22  ;;  %v2225_v32 = vshll.u32 %v4716_v12, 16  ;;  %v725_v51 = vmax.f32 %v629_v14, 0.0 }
 0x164   :  { %1298 = vst [vmem:[#allocation4 + $0x70] sm:$0x1f] %v1297_v30  ;;  %v1128_v44 = vpack.c.bf16 %v1004_v31, %v1004_v31  ;;  %v730_v38 = vmax.f32 %v650_v24, 0.0  ;;  %v728_v5 = vmax.f32 %v642_v42, 0.0  ;;  %v653_v49 = vadd.f32 %v6426_v20, %v6488_v55 }
 0x165   :  { %v2209_v25 = vrot.slane %v2208_v6, 4  ;;  %v2222_v60 = vor.u32 %v2221_v43, %v2218_v36  ;;  %v2227_v47 = vrot.slane %v2225_v32, 5  ;;  %v892_v48 = vmax.f32 %v725_v51, %v727_v45 }
 0x166   :  { %v1217_v41 = vshrl.u32 %v1128_v44, 16  ;;  %v1220_v52 = vshll.u32 %v1128_v44, 16  ;;  %v893_v56 = vmax.f32 %v728_v5, %v730_v38  ;;  %v731_v8 = vmax.f32 %v653_v49, 0.0  ;;  %v2030_v44 = vld [vmem:[#allocation4 + $0x60] sm:$0x1f] }
 0x167   :  { %v2214_v58 = vsel %vm6208_vm13, %v2209_v25, %v2213_v28  ;;  %v2223_v59 = vrot.slane %v2222_v60, 4  ;;  %924 = vst [vmem:[#allocation3 + $0xd8] sm:$0xff] %v892_v48  ;;  %v4615_v63 = vcombine.low %v1392_v46, %v1392_v46  ;;  %v4616_v16 = vcombine.high %v1392_v46, %v1392_v46 }
 0x168   :  { %v1219_v0 = vrot.slane %v1217_v41, 7  ;;  %925 = vst [vmem:[#allocation3 + $0xe0] sm:$0xff] %v893_v56  ;;  %v645_v55 = vadd.f32 %v6426_v20, %v6492_v57  ;;  %v4757_v1 = vcombine.low %v2389_v50, %v2389_v50  ;;  %v4758_v45 = vcombine.high %v2389_v50, %v2389_v50 }
 0x169   :  { %v2228_v4 = vsel %vm6208_vm13, %v2223_v59, %v2227_v47  ;;  %v1609_v12 = vshrl.u32 %v4615_v63, 16  ;;  %v1612_v9 = vshll.u32 %v4615_v63, 16  ;;  %v1618_v10 = vshll.u32 %v4616_v16, 16  ;;  %v1393_v59 = vld [vmem:[#allocation4 + $0x60] sm:$0x1f] }
 0x16a   :  { %v1222_v11 = vor.u32 %v1220_v52, %v1219_v0  ;;  %v4736_v37 = vcombine.low %v2214_v58, %v2228_v4  ;;  %v729_v14 = vmax.f32 %v645_v55, 0.0  ;;  %v4759_v15 = vcombine.low %v2390_v34, %v2390_v34 }
 0x16b   :  { %v1611_v17 = vrot.slane %v1609_v12, 4  ;;  %v1614_v18 = vrot.slane %v1612_v9, 5  ;;  %v1620_v54 = vrot.slane %v1618_v10, 5  ;;  %v4760_v19 = vcombine.high %v2390_v34, %v2390_v34  ;;  %v5592_v34 = vld [vmem:[#allocation4 + $0x50] ss:$8 sps:$4 sm:$0xff]  }
 0x16c   :  { %v1300_v57 = vsel %vm6190_vm12, %v1222_v11, %v1299_v2  ;;  %4120 = vmatmul.mubr.bf16.gmra.mrb[76].mxu0 %v4736_v37  ;;  %v894_v22 = vmax.f32 %v729_v14, %v731_v8  ;;  %v4781_v23 = vrot.slane %v4757_v1, 9  ;;  %v2511_v24 = vrot.slane %v4758_v45, 5  ;;  %v1394_v12 = vld [vmem:[#allocation4 + $0x68] sm:$0x1f] }
 0x16d   :  { %1301 = vst [vmem:[#allocation4 + $0x78] sm:$0x1f] %v1300_v57  ;;  %v1615_v42 = vor.u32 %v1614_v18, %v1611_v17  ;;  %v4782_v30 = vrot.slane %v4759_v15, 9  ;;  %v2515_v31 = vrot.slane %v4760_v19, 5  ;;  %v666_v28 = vadd.f32 %v6426_v20, %v6496_v13  ;;  %v1302_v15 = vld [vmem:[#allocation4 + $0x80] sm:$0x1f] }
 0x16e   :  { %v955_v36 = vld [vmem:[#allocation3 + $0xd0] ss:$2 sm:$0xff]  ;;  %v987_v6 = vld [vmem:[#allocation3 + $0xd1] ss:$2 sm:$0xff]  ;;  %926 = vst [vmem:[#allocation3 + $0xe8] sm:$0xff] %v894_v22  ;;  %v2512_v43 = vsel %vm6259_vm0, %v4781_v23, %v2511_v24  ;;  %v658_v32 = vadd.f32 %v6426_v20, %v6504_v29  ;;  %v669_v51 = vadd.f32 %v6426_v20, %v6514_v62  ;;  %v4717_v38 = vcombine.low %v2029_v21, %v2029_v21 }
 0x16f   :  { %v1005_v5 = vmax.f32 %v955_v36, %v987_v6  ;;  %v1616_v49 = vrot.slane %v1615_v42, 4  ;;  %v2516_v46 = vsel %vm6259_vm0, %v4782_v30, %v2515_v31  ;;  %v734_v13 = vmax.f32 %v666_v28, 0.0 }
 0x170   :  { %v4793_v25 = vcombine.low %v2512_v43, %v2516_v46  ;;  %v732_v60 = vmax.f32 %v658_v32, 0.0  ;;  %v735_v47 = vmax.f32 %v669_v51, 0.0  ;;  %v4718_v48 = vcombine.high %v2029_v21, %v2029_v21 }
 0x171   :  { %v1129_v50 = vpack.c.bf16 %v1005_v5, %v1005_v5  ;;  %v1621_v41 = vsel %vm6208_vm13, %v1616_v49, %v1620_v54  ;;  %v4719_v29 = vcombine.low %v2030_v44, %v2030_v44  ;;  %v4720_v52 = vcombine.high %v2030_v44, %v2030_v44  ;;  %v2391_v44 = vld [vmem:[#allocation4 + $0x68] sm:$0x1e] }
 0x172   :  { %v4633_v62 = vcombine.low %v6235_v33, %v1621_v41  ;;  %4127 = vmatprep.mubr.bf16.mxu0 %v4793_v25  ;;  %v895_v56 = vmax.f32 %v732_v60, %v734_v13  ;;  %v2230_v8 = vshrl.u32 %v4717_v38, 16  ;;  %v2233_v58 = vshll.u32 %v4717_v38, 16  ;;  %v1305_v38 = vld [vmem:[#allocation4 + $0x88] sm:$0x1f] }
 0x173   :  { %v1224_v63 = vshrl.u32 %v1129_v50, 16  ;;  %v1227_v16 = vshll.u32 %v1129_v50, 16  ;;  %v2239_v0 = vshll.u32 %v4718_v48, 16  ;;  %v2244_v55 = vshrl.u32 %v4719_v29, 16  ;;  %v2392_v50 = vld [vmem:[#allocation4 + $0x70] sm:$0x1e] }
 0x174   :  { %3933 = vmatprep.mubr.bf16.mxu1 %v4633_v62  ;;  %927 = vst [vmem:[#allocation3 + $0xf0] sm:$0xff] %v895_v56  ;;  %v2232_v1 = vrot.slane %v2230_v8, 4  ;;  %v2235_v45 = vrot.slane %v2233_v58, 5  ;;  %v2247_v2 = vshll.u32 %v4719_v29, 16  ;;  %v2253_v4 = vshll.u32 %v4720_v52, 16 }
 0x175   :  { %v1226_v9 = vrot.slane %v1224_v63, 7  ;;  %v957_v10 = vld [vmem:[#allocation3 + $0xe0] ss:$2 sm:$0xff]  ;;  %v989_v33 = vld [vmem:[#allocation3 + $0xe1] ss:$2 sm:$0xff]  ;;  %3934 = vmatmul.mubr.bf16.gmra.mrb[16].mxu1 %v5592_v34  ;;  %v2241_v11 = vrot.slane %v2239_v0, 5  ;;  %v661_v37 = vadd.f32 %v6426_v20, %v6516_v26  ;;  %v4617_v14 = vcombine.low %v1393_v59, %v1393_v59 }
 0x176   :  { %v1006_v17 = vmax.f32 %v957_v10, %v989_v33  ;;  %v2236_v18 = vor.u32 %v2235_v45, %v2232_v1  ;;  %v2246_v54 = vrot.slane %v2244_v55, 4  ;;  %v2249_v19 = vrot.slane %v2247_v2, 5  ;;  %v2031_v56 = vld [vmem:[#allocation4 + $0x68] sm:$0x1f]  ;;  %v2032_v1 = vld [vmem:[#allocation4 + $0x70] sm:$0x1f] }
 0x177   :  { %v1229_v21 = vor.u32 %v1227_v16, %v1226_v9  ;;  %v2255_v57 = vrot.slane %v2253_v4, 5  ;;  %v733_v22 = vmax.f32 %v661_v37, 0.0  ;;  %v4618_v23 = vcombine.high %v1393_v59, %v1393_v59 }
 0x178   :  { %v1130_v24 = vpack.c.bf16 %v1006_v17, %v1006_v17  ;;  %v2237_v42 = vrot.slane %v2236_v18, 4  ;;  %v2250_v30 = vor.u32 %v2249_v19, %v2246_v54  ;;  %v4619_v31 = vcombine.low %v1394_v12, %v1394_v12 }
 0x179   :  { %v1303_v28 = vsel %vm6190_vm12, %v1229_v21, %v1302_v15  ;;  %v896_v36 = vmax.f32 %v733_v22, %v735_v47  ;;  %v4620_v6 = vcombine.high %v1394_v12, %v1394_v12  ;;  %v1623_v20 = vshrl.u32 %v4617_v14, 16 }
 0x17a   :  { %1304 = vst [vmem:[#allocation4 + $0x80] sm:$0x1f] %v1303_v28  ;;  %v1231_v26 = vshrl.u32 %v1130_v24, 16  ;;  %v1234_v43 = vshll.u32 %v1130_v24, 16  ;;  %v2242_v32 = vsel %vm6208_vm13, %v2237_v42, %v2241_v11  ;;  %v2251_v51 = vrot.slane %v2250_v30, 4 }
 0x17b   :  { %928 = vst [vmem:[#allocation3 + $0xf8] sm:$0xff] %v896_v36  ;;  %v1625_v5 = vrot.slane %v1623_v20, 4  ;;  %v1626_v49 = vshll.u32 %v4617_v14, 16  ;;  %v1632_v46 = vshll.u32 %v4618_v23, 16  ;;  %v1637_v13 = vshrl.u32 %v4619_v31, 16 }
 0x17c   :  { %v1233_v25 = vrot.slane %v1231_v26, 7  ;;  %v2256_v60 = vsel %vm6208_vm13, %v2251_v51, %v2255_v57  ;;  %v1640_v47 = vshll.u32 %v4619_v31, 16  ;;  %v1646_v48 = vshll.u32 %v4620_v6, 16  ;;  %v5609_v36 = vld [vmem:[#allocation4 + $0x60] ss:$8 sps:$4 sm:$0xff]  }
 0x17d   :  { %v4737_v41 = vcombine.low %v2242_v32, %v2256_v60  ;;  %v1628_v29 = vrot.slane %v1626_v49, 5  ;;  %v1634_v52 = vrot.slane %v1632_v46, 5  ;;  %v1639_v62 = vrot.slane %v1637_v13, 4  ;;  %v1395_v26 = vld [vmem:[#allocation4 + $0x70] sm:$0x1f] }
 0x17e   :  { %v1236_v8 = vor.u32 %v1234_v43, %v1233_v25  ;;  %v1642_v58 = vrot.slane %v1640_v47, 5  ;;  %v1648_v59 = vrot.slane %v1646_v48, 5  ;;  %v4761_v63 = vcombine.low %v2391_v44, %v2391_v44 }
 0x17f   :  { %4128 = vmatmul.mubr.bf16.gmra.mrb[80].mxu0 %v4737_v41  ;;  %v1629_v16 = vor.u32 %v1628_v29, %v1625_v5  ;;  %v4762_v34 = vcombine.high %v2391_v44, %v2391_v44  ;;  %v4763_v0 = vcombine.low %v2392_v50, %v2392_v50  ;;  %v4764_v55 = vcombine.high %v2392_v50, %v2392_v50  ;;  %v1308_v41 = vld [vmem:[#allocation4 + $0x90] sm:$0x1f] }
 0x180   :  { %v1306_v45 = vsel %vm6190_vm12, %v1236_v8, %v1305_v38  ;;  %v1643_v2 = vor.u32 %v1642_v58, %v1639_v62  ;;  %v4783_v4 = vrot.slane %v4761_v63, 9  ;;  %v4721_v12 = vcombine.low %v2031_v56, %v2031_v56  ;;  %v1396_v38 = vld [vmem:[#allocation4 + $0x78] sm:$0x1f] }
 0x181   :  { %1307 = vst [vmem:[#allocation4 + $0x88] sm:$0x1f] %v1306_v45  ;;  %v1630_v9 = vrot.slane %v1629_v16, 4  ;;  %v2519_v10 = vrot.slane %v4762_v34, 5  ;;  %v4784_v33 = vrot.slane %v4763_v0, 9  ;;  %v2523_v11 = vrot.slane %v4764_v55, 5 }
 0x182   :  { %v959_v37 = vld [vmem:[#allocation3 + $0xf0] ss:$2 sm:$0xff]  ;;  %v991_v14 = vld [vmem:[#allocation3 + $0xf1] ss:$2 sm:$0xff]  ;;  %v1644_v15 = vrot.slane %v1643_v2, 4  ;;  %v4722_v17 = vcombine.high %v2031_v56, %v2031_v56  ;;  %v4723_v18 = vcombine.low %v2032_v1, %v2032_v1  ;;  %v4724_v54 = vcombine.high %v2032_v1, %v2032_v1 }
 0x183   :  { %v1007_v19 = vmax.f32 %v959_v37, %v991_v14  ;;  %v1635_v21 = vsel %vm6208_vm13, %v1630_v9, %v1634_v52  ;;  %v2520_v57 = vsel %vm6259_vm0, %v4783_v4, %v2519_v10  ;;  %v2524_v22 = vsel %vm6259_vm0, %v4784_v33, %v2523_v11  ;;  %v2393_v63 = vld [vmem:[#allocation4 + $0x78] sm:$0x1e]  ;;  %v2394_v1 = vld [vmem:[#allocation4 + $0x80] sm:$0x1e] }
 0x184   :  { %v1649_v23 = vsel %vm6208_vm13, %v1644_v15, %v1648_v59  ;;  %v4794_v24 = vcombine.low %v2520_v57, %v2524_v22  ;;  %v2258_v42 = vshrl.u32 %v4721_v12, 16  ;;  %v2261_v30 = vshll.u32 %v4721_v12, 16  ;;  %v2034_v22 = vld [vmem:[#allocation4 + $0x80] sm:$0x1f] }
 0x185   :  { %v1131_v31 = vpack.c.bf16 %v1007_v19, %v1007_v19  ;;  %v4634_v28 = vcombine.low %v1635_v21, %v1649_v23  ;;  %v2267_v6 = vshll.u32 %v4722_v17, 16  ;;  %v2272_v20 = vshrl.u32 %v4723_v18, 16 }
 0x186   :  { %4135 = vmatprep.mubr.bf16.mxu0 %v4794_v24  ;;  %v2260_v43 = vrot.slane %v2258_v42, 4  ;;  %v2263_v32 = vrot.slane %v2261_v30, 5  ;;  %v2275_v51 = vshll.u32 %v4723_v18, 16  ;;  %v2281_v44 = vshll.u32 %v4724_v54, 16  ;;  %v2033_v18 = vld [vmem:[#allocation4 + $0x78] sm:$0x1f] }
 0x187   :  { %v1238_v5 = vshrl.u32 %v1131_v31, 16  ;;  %v1241_v49 = vshll.u32 %v1131_v31, 16  ;;  %3941 = vmatprep.mubr.bf16.mxu1 %v4634_v28  ;;  %v2269_v46 = vrot.slane %v2267_v6, 5  ;;  %v2274_v13 = vrot.slane %v2272_v20, 4 }
 0x188   :  { %3942 = vmatmul.mubr.bf16.gmra.mrb[20].mxu1 %v5609_v36  ;;  %v2264_v25 = vor.u32 %v2263_v32, %v2260_v43  ;;  %v2277_v60 = vrot.slane %v2275_v51, 5  ;;  %v2283_v47 = vrot.slane %v2281_v44, 5  ;;  %v4621_v48 = vcombine.low %v1395_v26, %v1395_v26 }
 0x189   :  { %v1240_v50 = vrot.slane %v1238_v5, 7  ;;  %v4622_v29 = vcombine.high %v1395_v26, %v1395_v26  ;;  %v4623_v52 = vcombine.low %v1396_v38, %v1396_v38  ;;  %v4624_v62 = vcombine.high %v1396_v38, %v1396_v38  ;;  %v1397_v5 = vld [vmem:[#allocation4 + $0x80] sm:$0x1f] }
 0x18a   :  { %v2265_v56 = vrot.slane %v2264_v25, 4  ;;  %v2278_v8 = vor.u32 %v2277_v60, %v2274_v13  ;;  %v1651_v58 = vshrl.u32 %v4621_v48, 16  ;;  %v1654_v59 = vshll.u32 %v4621_v48, 16  ;;  %v1398_v60 = vld [vmem:[#allocation4 + $0x88] sm:$0x1f] }
 0x18b   :  { %v1243_v16 = vor.u32 %v1241_v49, %v1240_v50  ;;  %v1660_v34 = vshll.u32 %v4622_v29, 16  ;;  %v1665_v0 = vshrl.u32 %v4623_v52, 16  ;;  %v1668_v55 = vshll.u32 %v4623_v52, 16 }
 0x18c   :  { %v2270_v45 = vsel %vm6208_vm13, %v2265_v56, %v2269_v46  ;;  %v2279_v2 = vrot.slane %v2278_v8, 4  ;;  %v1653_v4 = vrot.slane %v1651_v58, 4  ;;  %v1656_v12 = vrot.slane %v1654_v59, 5 }
 0x18d   :  { %v1309_v9 = vsel %vm6190_vm12, %v1243_v16, %v1308_v41  ;;  %v1662_v10 = vrot.slane %v1660_v34, 5  ;;  %v1667_v33 = vrot.slane %v1665_v0, 4  ;;  %v1670_v11 = vrot.slane %v1668_v55, 5 }
 0x18e   :  { %1310 = vst [vmem:[#allocation4 + $0x90] sm:$0x1f] %v1309_v9  ;;  %v2284_v37 = vsel %vm6208_vm13, %v2279_v2, %v2283_v47  ;;  %v1657_v14 = vor.u32 %v1656_v12, %v1653_v4  ;;  %v1674_v15 = vshll.u32 %v4624_v62, 16  ;;  %v4765_v17 = vcombine.low %v2393_v63, %v2393_v63  ;;  %v5627_v47 = vld [vmem:[#allocation4 + $0x70] ss:$8 sps:$4 sm:$0xff]  }
 0x18f   :  { %v4738_v54 = vcombine.low %v2270_v45, %v2284_v37  ;;  %v1671_v19 = vor.u32 %v1670_v11, %v1667_v33  ;;  %v4766_v21 = vcombine.high %v2393_v63, %v2393_v63  ;;  %v4767_v57 = vcombine.low %v2394_v1, %v2394_v1  ;;  %v2395_v9 = vld [vmem:[#allocation4 + $0x88] sm:$0x1e] }
 0x190   :  { %v1658_v23 = vrot.slane %v1657_v14, 4  ;;  %v1676_v24 = vrot.slane %v1674_v15, 5  ;;  %v4768_v7 = vcombine.high %v2394_v1, %v2394_v1  ;;  %v4785_v42 = vrot.slane %v4765_v17, 9 }
 0x191   :  { %4136 = vmatmul.mubr.bf16.gmra.mrb[84].mxu0 %v4738_v54  ;;  %v1672_v30 = vrot.slane %v1671_v19, 4  ;;  %v2527_v31 = vrot.slane %v4766_v21, 5  ;;  %v4786_v28 = vrot.slane %v4767_v57, 9  ;;  %v4725_v36 = vcombine.low %v2033_v18, %v2033_v18 }
 0x192   :  { %v1663_v6 = vsel %vm6208_vm13, %v1658_v23, %v1662_v10  ;;  %v2531_v20 = vrot.slane %v4768_v7, 5  ;;  %v4726_v26 = vcombine.high %v2033_v18, %v2033_v18  ;;  %v4727_v43 = vcombine.low %v2034_v22, %v2034_v22  ;;  %v2035_v23 = vld [vmem:[#allocation4 + $0x88] sm:$0x1f] }
 0x193   :  { %v1677_v32 = vsel %vm6208_vm13, %v1672_v30, %v1676_v24  ;;  %v2528_v51 = vsel %vm6259_vm0, %v4785_v42, %v2527_v31  ;;  %v4728_v44 = vcombine.high %v2034_v22, %v2034_v22  ;;  %v2286_v38 = vshrl.u32 %v4725_v36, 16 }
 0x194   :  { %v4635_v49 = vcombine.low %v1663_v6, %v1677_v32  ;;  %v2532_v46 = vsel %vm6259_vm0, %v4786_v28, %v2531_v20  ;;  %v2289_v13 = vshll.u32 %v4725_v36, 16  ;;  %v2295_v25 = vshll.u32 %v4726_v26, 16 }
 0x195   :  { %v4795_v48 = vcombine.low %v2528_v51, %v2532_v46  ;;  %v2288_v50 = vrot.slane %v2286_v38, 4  ;;  %v2300_v41 = vshrl.u32 %v4727_v43, 16  ;;  %v2303_v29 = vshll.u32 %v4727_v43, 16  ;;  %v2396_v14 = vld [vmem:[#allocation4 + $0x90] sm:$0x1e] }
 0x196   :  { %3949 = vmatprep.mubr.bf16.mxu1 %v4635_v49  ;;  %v2291_v52 = vrot.slane %v2289_v13, 5  ;;  %v2297_v62 = vrot.slane %v2295_v25, 5  ;;  %v2309_v56 = vshll.u32 %v4728_v44, 16  ;;  %v4625_v8 = vcombine.low %v1397_v5, %v1397_v5  ;;  %v2036_v31 = vld [vmem:[#allocation4 + $0x90] sm:$0x1f] }
 0x197   :  { %3950 = vmatmul.mubr.bf16.gmra.mrb[24].mxu1 %v5627_v47  ;;  %4143 = vmatprep.mubr.bf16.mxu0 %v4795_v48  ;;  %v2302_v58 = vrot.slane %v2300_v41, 4  ;;  %v2305_v59 = vrot.slane %v2303_v29, 5  ;;  %v4626_v63 = vcombine.high %v1397_v5, %v1397_v5  ;;  %v4627_v16 = vcombine.low %v1398_v60, %v1398_v60 }
 0x198   :  { %v2292_v34 = vor.u32 %v2291_v52, %v2288_v50  ;;  %v2311_v0 = vrot.slane %v2309_v56, 5  ;;  %v4628_v55 = vcombine.high %v1398_v60, %v1398_v60  ;;  %v1679_v1 = vshrl.u32 %v4625_v8, 16  ;;  %v5650_v52 = vld [vmem:[#allocation4 + $0x8] ss:$8 sps:$4 sm:$0xff]  }
 0x199   :  { %v2306_v45 = vor.u32 %v2305_v59, %v2302_v58  ;;  %v1682_v2 = vshll.u32 %v4625_v8, 16  ;;  %v1688_v4 = vshll.u32 %v4626_v63, 16  ;;  %v1693_v12 = vshrl.u32 %v4627_v16, 16  ;;  %v3014_v58 = vld [vmem:[#allocation4 + $0x10] sm:$0x1e] }
 0x19a   :  { %v2293_v10 = vrot.slane %v2292_v34, 4  ;;  %v1681_v33 = vrot.slane %v1679_v1, 4  ;;  %v1696_v11 = vshll.u32 %v4627_v16, 16  ;;  %v1702_v37 = vshll.u32 %v4628_v55, 16  ;;  %v5648_v59 = vld [vmem:[#allocation4 + $0x80] ss:$8 sps:$4 sm:$0xff]  }
 0x19b   :  { %v2307_v15 = vrot.slane %v2306_v45, 4  ;;  %v1684_v17 = vrot.slane %v1682_v2, 5  ;;  %v1690_v18 = vrot.slane %v1688_v4, 5  ;;  %v1695_v54 = vrot.slane %v1693_v12, 4  ;;  %v5790_v1 = vld [vmem:[#allocation4 + $0x8] sm:$0x1e] }
 0x19c   :  { %v2298_v19 = vsel %vm6208_vm13, %v2293_v10, %v2297_v62  ;;  %v1698_v21 = vrot.slane %v1696_v11, 5  ;;  %v1704_v57 = vrot.slane %v1702_v37, 5  ;;  %v4769_v22 = vcombine.low %v2395_v9, %v2395_v9  ;;  %v3015_v12 = vld [vmem:[#allocation4 + $0x18] sm:$0x1e]  ;;  %v3016_v37 = vld [vmem:[#allocation4 + $0x20] sm:$0x1e] }
 0x19d   :  { %v2312_v24 = vsel %vm6208_vm13, %v2307_v15, %v2311_v0  ;;  %v1685_v7 = vor.u32 %v1684_v17, %v1681_v33  ;;  %v4770_v42 = vcombine.high %v2395_v9, %v2395_v9  ;;  %v4771_v30 = vcombine.low %v2396_v14, %v2396_v14 }
 0x19e   :  { %v4739_v28 = vcombine.low %v2298_v19, %v2312_v24  ;;  %v1699_v36 = vor.u32 %v1698_v21, %v1695_v54  ;;  %v4772_v6 = vcombine.high %v2396_v14, %v2396_v14  ;;  %v4787_v20 = vrot.slane %v4769_v22, 9  ;;  %v3017_v19 = vld [vmem:[#allocation4 + $0x28] sm:$0x1e] }
 0x19f   :  { %v1686_v26 = vrot.slane %v1685_v7, 4  ;;  %v2535_v43 = vrot.slane %v4770_v42, 5  ;;  %v4788_v32 = vrot.slane %v4771_v30, 9  ;;  %v4729_v51 = vcombine.low %v2035_v23, %v2035_v23  ;;  %v5666_v30 = vld [vmem:[%s7079_s3 + $0x180] sm:$0xff]  }
 0x1a0   :  { %4144 = vmatmul.mubr.bf16.gmra.mrb[88].mxu0 %v4739_v28  ;;  %v1700_v44 = vrot.slane %v1699_v36, 4  ;;  %v2539_v38 = vrot.slane %v4772_v6, 5  ;;  %v4730_v5 = vcombine.high %v2035_v23, %v2035_v23  ;;  %v4731_v49 = vcombine.low %v2036_v31, %v2036_v31 }
 0x1a1   :  { %v1691_v46 = vsel %vm6208_vm13, %v1686_v26, %v1690_v18  ;;  %v2536_v13 = vsel %vm6259_vm0, %v4787_v20, %v2535_v43  ;;  %v4732_v25 = vcombine.high %v2036_v31, %v2036_v31  ;;  %v2314_v60 = vshrl.u32 %v4729_v51, 16  ;;  %v1749_v20 = vld [vmem:[#allocation4 + $0x18] sm:$0x1e] }
 0x1a2   :  { %v1705_v47 = vsel %vm6208_vm13, %v1700_v44, %v1704_v57  ;;  %v2540_v48 = vsel %vm6259_vm0, %v4788_v32, %v2539_v38  ;;  %v2317_v50 = vshll.u32 %v4729_v51, 16  ;;  %v2323_v41 = vshll.u32 %v4730_v5, 16  ;;  %v3018_v44 = vld [vmem:[#allocation4 + $0x30] sm:$0x1e] }
 0x1a3   :  { %v4636_v29 = vcombine.low %v1691_v46, %v1705_v47  ;;  %v4796_v62 = vcombine.low %v2536_v13, %v2540_v48  ;;  %v2316_v56 = vrot.slane %v2314_v60, 4  ;;  %v2328_v8 = vshrl.u32 %v4731_v49, 16  ;;  %v5671_v60 = vld [vmem:[#allocation4 + $0x18] ss:$8 sps:$4 sm:$0xff]  }
 0x1a4   :  { %v2319_v63 = vrot.slane %v2317_v50, 5  ;;  %v2325_v16 = vrot.slane %v2323_v41, 5  ;;  %v2331_v34 = vshll.u32 %v4731_v49, 16  ;;  %v2337_v0 = vshll.u32 %v4732_v25, 16  ;;  %v5673_v49 = vld [vmem:[%s7079_s3 + $0x1c8] sm:$0xff]  }
 0x1a5   :  { %3957 = vmatprep.mubr.bf16.mxu1 %v4636_v29  ;;  %4151 = vmatprep.mubr.bf16.mxu0 %v4796_v62  ;;  %v2330_v55 = vrot.slane %v2328_v8, 4  ;;  %v4640_v45 = vcombine.high %v5790_v1, %v5790_v1  ;;  %v4669_v2 = vrot.slane %v4637_v53, 9  ;;  %v1847_v4 = vrot.slane %v4638_v61, 5  ;;  %v3019_v41 = vld [vmem:[#allocation4 + $0x38] sm:$0x1e] }
 0x1a6   :  { %3958 = vmatmul.mubr.bf16.gmra.mrb[28].mxu1 %v5648_v59  ;;  %v2320_v9 = vor.u32 %v2319_v63, %v2316_v56  ;;  %v2333_v10 = vrot.slane %v2331_v34, 5  ;;  %v2339_v33 = vrot.slane %v2337_v0, 5  ;;  %v4670_v11 = vrot.slane %v4639_v35, 9  ;;  %v1748_v35 = vld [vmem:[#allocation4 + $0x10] sm:$0x1e]  ;;  %v5682_v56 = vld [vmem:[%s7079_s3 + $0x188] sm:$0xff]  }
 0x1a7   :  { %3998 = vmatprep.mubr.bf16.mxu1 %v5650_v52  ;;  %v1848_v14 = vsel %vm6259_vm0, %v4669_v2, %v1847_v4  ;;  %v1851_v15 = vrot.slane %v4640_v45, 5  ;;  %v4845_v53 = vcombine.low %v3014_v58, %v3014_v58  ;;  %v4846_v17 = vcombine.high %v3014_v58, %v3014_v58  ;;  %v3020_v58 = vld [vmem:[#allocation4 + $0x40] sm:$0x1e]  ;;  %v5688_v0 = vld [vmem:[%s7079_s3 + $0x1d0] sm:$0xff]   ;;  %v3021_v4 = vld [vmem:[#allocation4 + $0x48] sm:$0x1e] }
 0x1a8   :  { %v2321_v18 = vrot.slane %v2320_v9, 4  ;;  %v2334_v40 = vor.u32 %v2333_v10, %v2330_v55  ;;  %v4847_v61 = vcombine.low %v3015_v12, %v3015_v12  ;;  %v4848_v54 = vcombine.high %v3015_v12, %v3015_v12 }
 0x1a9   :  { %v1852_v21 = vsel %vm6259_vm0, %v4670_v11, %v1851_v15  ;;  %v4877_v57 = vrot.slane %v4845_v53, 9  ;;  %v3112_v22 = vrot.slane %v4846_v17, 5  ;;  %v4849_v27 = vcombine.low %v3016_v37, %v3016_v37  ;;  %v1750_v11 = vld [vmem:[#allocation4 + $0x20] sm:$0x1e] }
 0x1aa   :  { %v2326_v23 = vsel %vm6208_vm13, %v2321_v18, %v2325_v16  ;;  %v2335_v24 = vrot.slane %v2334_v40, 4  ;;  %v4685_v7 = vcombine.low %v1848_v14, %v1852_v21  ;;  %v4878_v42 = vrot.slane %v4847_v61, 9  ;;  %v5687_v40 = vld [vmem:[#allocation4 + $0x28] ss:$8 sps:$4 sm:$0xff]  }
 0x1ab   :  { %v3113_v31 = vsel %vm6259_vm0, %v4877_v57, %v3112_v22  ;;  %v3116_v28 = vrot.slane %v4848_v54, 5  ;;  %v4850_v36 = vcombine.high %v3016_v37, %v3016_v37  ;;  %v4851_v6 = vcombine.low %v3017_v19, %v3017_v19  ;;  %v5697_v21 = vld [vmem:[%s7079_s3 + $0x190] sm:$0xff]  }
 0x1ac   :  { %v2340_v26 = vsel %vm6208_vm13, %v2335_v24, %v2339_v33  ;;  %v4852_v43 = vcombine.high %v3017_v19, %v3017_v19  ;;  %v4879_v32 = vrot.slane %v4849_v27, 9  ;;  %v4641_v51 = vcombine.low %v1748_v35, %v1748_v35  ;;  %v1751_v19 = vld [vmem:[#allocation4 + $0x28] sm:$0x1e]  ;;  %v5703_v24 = vld [vmem:[%s7079_s3 + $0x1d8] sm:$0xff]  }
 0x1ad   :  { %v4740_v38 = vcombine.low %v2326_v23, %v2340_v26  ;;  %v3117_v5 = vsel %vm6259_vm0, %v4878_v42, %v3116_v28  ;;  %v3120_v46 = vrot.slane %v4850_v36, 5  ;;  %v4880_v13 = vrot.slane %v4851_v6, 9  ;;  %v3022_v23 = vld [vmem:[#allocation4 + $0x60] sm:$0x1e]  ;;  %v3023_v28 = vld [vmem:[#allocation4 + $0x68] sm:$0x1e] }
 0x1ae   :  { %3999 = vmatmul.mubr.bf16.vlgmr.msra.gmra.mrb[32].mxu1 %v4685_v7  ;;  %v4893_v25 = vcombine.low %v3113_v31, %v3117_v5  ;;  %v3124_v47 = vrot.slane %v4852_v43, 5  ;;  %v4642_v48 = vcombine.high %v1748_v35, %v1748_v35  ;;  %v4643_v50 = vcombine.low %v1749_v20, %v1749_v20  ;;  %v5712_v5 = vld [vmem:[%s7079_s3 + $0x198] sm:$0xff]  }
 0x1af   :  { %4152 = vmatmul.mubr.bf16.gmra.mrb[92].mxu0 %v4740_v38  ;;  %5203 = vmatpush3.bf16.msra.mxu1 %v5666_v30  ;;  %v3121_v29 = vsel %vm6259_vm0, %v4879_v32, %v3120_v46  ;;  %v4644_v52 = vcombine.high %v1749_v20, %v1749_v20  ;;  %v4671_v62 = vrot.slane %v4641_v51, 9  ;;  %v4853_v8 = vcombine.low %v3018_v44, %v3018_v44  ;;  %v3024_v38 = vld [vmem:[#allocation4 + $0x70] sm:$0x1e] }
 0x1b0   :  { %5385 = vmatprep.mubr.bf16.mxu0 %v4893_v25  ;;  %4006 = vmatprep.mubr.bf16.mxu1 %v5671_v60  ;;  %v3125_v59 = vsel %vm6259_vm0, %v4880_v13, %v3124_v47  ;;  %v1855_v63 = vrot.slane %v4642_v48, 5  ;;  %v4672_v16 = vrot.slane %v4643_v50, 9  ;;  %v4854_v34 = vcombine.high %v3018_v44, %v3018_v44  ;;  %v3025_v60 = vld [vmem:[#allocation4 + $0x78] sm:$0x1e]  ;;  %v5718_v47 = vld [vmem:[%s7079_s3 + $0x1e0] sm:$0xff]  }
 0x1b1   :  { %5204 = vmatprep.subr.bf16.mxu1 %v5673_v49  ;;  %v4894_v55 = vcombine.low %v3121_v29, %v3125_v59  ;;  %v1859_v1 = vrot.slane %v4644_v52, 5  ;;  %v4855_v45 = vcombine.low %v3019_v41, %v3019_v41  ;;  %v4856_v2 = vcombine.high %v3019_v41, %v3019_v41  ;;  %v1752_v52 = vld [vmem:[#allocation4 + $0x30] sm:$0x1e]  ;;  %v1753_v59 = vld [vmem:[#allocation4 + $0x38] sm:$0x1e] }
 0x1b2   :  { %v1856_v12 = vsel %vm6259_vm0, %v4671_v62, %v1855_v63  ;;  %v4881_v9 = vrot.slane %v4853_v8, 9  ;;  %v3128_v10 = vrot.slane %v4854_v34, 5  ;;  %v4857_v33 = vcombine.low %v3020_v58, %v3020_v58 }
 0x1b3   :  { %v1860_v37 = vsel %vm6259_vm0, %v4672_v16, %v1859_v1  ;;  %5205 = vmatpush3.bf16.msra.mxu1 %v5682_v56  ;;  %v4882_v14 = vrot.slane %v4855_v45, 9  ;;  %v3132_v15 = vrot.slane %v4856_v2, 5  ;;  %v4858_v53 = vcombine.high %v3020_v58, %v3020_v58  ;;  %v5723_v1 = vld [vmem:[%s7079_s3 + $0x1a0] sm:$0xff]  }
 0x1b4   :  { %v4686_v17 = vcombine.low %v1856_v12, %v1860_v37  ;;  %v3129_v18 = vsel %vm6259_vm0, %v4881_v9, %v3128_v10  ;;  %5206 = vmatprep.subr.bf16.mxu1 %v5688_v0  ;;  %v4859_v61 = vcombine.low %v3021_v4, %v3021_v4  ;;  %v4860_v54 = vcombine.high %v3021_v4, %v3021_v4  ;;  %v5702_v0 = vld [vmem:[#allocation4 + $0x38] ss:$8 sps:$4 sm:$0xff]   ;;  %v5725_v10 = vld [vmem:[%s7079_s3 + $0x1e8] sm:$0xff]  }
 0x1b5   :  { %v3133_v57 = vsel %vm6259_vm0, %v4882_v14, %v3132_v15  ;;  %v4883_v22 = vrot.slane %v4857_v33, 9  ;;  %v3136_v27 = vrot.slane %v4858_v53, 5  ;;  %v4645_v35 = vcombine.low %v1750_v11, %v1750_v11  ;;  %v3026_v9 = vld [vmem:[#allocation4 + $0x80] sm:$0x1e]  ;;  %v3027_v15 = vld [vmem:[#allocation4 + $0x88] sm:$0x1e] }
 0x1b6   :  { %4007 = vmatmul.mubr.bf16.gmra.mrb[36].mxu1 %v4686_v17  ;;  %v4895_v7 = vcombine.low %v3129_v18, %v3133_v57  ;;  %v4884_v42 = vrot.slane %v4859_v61, 9  ;;  %v3140_v30 = vrot.slane %v4860_v54, 5  ;;  %v4646_v31 = vcombine.high %v1750_v11, %v1750_v11  ;;  %v5730_v57 = vld [vmem:[%s7079_s3 + $0x1a8] sm:$0xff]  }
 0x1b7   :  { %5386 = vmatmul.mubr.bf16.vlgmr.msra.gmra.mrb[96].mxu0 %v4894_v55  ;;  %4014 = vmatprep.mubr.bf16.mxu1 %v5687_v40  ;;  %v3137_v36 = vsel %vm6259_vm0, %v4883_v22, %v3136_v27  ;;  %v4647_v6 = vcombine.low %v1751_v19, %v1751_v19  ;;  %v4648_v20 = vcombine.high %v1751_v19, %v1751_v19  ;;  %v4673_v26 = vrot.slane %v4645_v35, 9 }
 0x1b8   :  { %5389 = vmatprep.mubr.bf16.mxu0 %v4895_v7  ;;  %v3141_v43 = vsel %vm6259_vm0, %v4884_v42, %v3140_v30  ;;  %v1863_v32 = vrot.slane %v4646_v31, 5  ;;  %5207 = vmatpush3.bf16.msra.mxu1 %v5697_v21  ;;  %v4861_v51 = vcombine.low %v3022_v23, %v3022_v23  ;;  %v4862_v44 = vcombine.high %v3022_v23, %v3022_v23  ;;  %v1754_v21 = vld [vmem:[#allocation4 + $0x50] sm:$0x1e] }
 0x1b9   :  { %v4896_v49 = vcombine.low %v3137_v36, %v3141_v43  ;;  %v4674_v46 = vrot.slane %v4647_v6, 9  ;;  %v1867_v13 = vrot.slane %v4648_v20, 5  ;;  %v4863_v25 = vcombine.low %v3023_v28, %v3023_v28  ;;  %5208 = vmatprep.subr.bf16.mxu1 %v5703_v24  ;;  %v1755_v24 = vld [vmem:[#allocation4 + $0x58] sm:$0x1e]  ;;  %v5732_v7 = vld [vmem:[%s7079_s3 + $0x1f0] sm:$0xff]  }
 0x1ba   :  { %v1864_v48 = vsel %vm6259_vm0, %v4673_v26, %v1863_v32  ;;  %v4864_v50 = vcombine.high %v3023_v28, %v3023_v28  ;;  %v4885_v41 = vrot.slane %v4861_v51, 9  ;;  %v3144_v29 = vrot.slane %v4862_v44, 5 }
 0x1bb   :  { %v1868_v62 = vsel %vm6259_vm0, %v4674_v46, %v1867_v13  ;;  %v4886_v56 = vrot.slane %v4863_v25, 9  ;;  %v4865_v8 = vcombine.low %v3024_v38, %v3024_v38  ;;  %v4866_v58 = vcombine.high %v3024_v38, %v3024_v38  ;;  %v5737_v38 = vld [vmem:[%s7079_s3 + $0x1b0] sm:$0xff]   ;;  %v1757_v25 = vld [vmem:[#allocation4 + $0x68] sm:$0x1e] }
 0x1bc   :  { %v4687_v63 = vcombine.low %v1864_v48, %v1868_v62  ;;  %v3145_v16 = vsel %vm6259_vm0, %v4885_v41, %v3144_v29  ;;  %v3148_v34 = vrot.slane %v4864_v50, 5  ;;  %v4867_v55 = vcombine.low %v3025_v60, %v3025_v60  ;;  %5209 = vmatpush3.bf16.msra.mxu1 %v5712_v5  ;;  %v1756_v62 = vld [vmem:[#allocation4 + $0x60] sm:$0x1e] }
 0x1bd   :  { %v4868_v45 = vcombine.high %v3025_v60, %v3025_v60  ;;  %v4887_v2 = vrot.slane %v4865_v8, 9  ;;  %v3152_v4 = vrot.slane %v4866_v58, 5  ;;  %v4649_v12 = vcombine.low %v1752_v52, %v1752_v52  ;;  %5210 = vmatprep.subr.bf16.mxu1 %v5718_v47  ;;  %v5743_v60 = vld [vmem:[%s7079_s3 + $0x1f8] sm:$0xff]   ;;  %v3028_v8 = vld [vmem:[#allocation4 + $0x90] sm:$0x1e] }
 0x1be   :  { %4015 = vmatmul.mubr.bf16.gmra.mrb[40].mxu1 %v4687_v63  ;;  %v3149_v33 = vsel %vm6259_vm0, %v4886_v56, %v3148_v34  ;;  %v4888_v11 = vrot.slane %v4867_v55, 9  ;;  %v4650_v37 = vcombine.high %v1752_v52, %v1752_v52  ;;  %v4651_v14 = vcombine.low %v1753_v59, %v1753_v59  ;;  %v5748_v58 = vld [vmem:[%s7079_s3 + $0x1b8] sm:$0xff]  }
 0x1bf   :  { %5390 = vmatmul.mubr.bf16.gmra.mrb[100].mxu0 %v4896_v49  ;;  %v4897_v53 = vcombine.low %v3145_v16, %v3149_v33  ;;  %4022 = vmatprep.mubr.bf16.mxu1 %v5702_v0  ;;  %v3156_v17 = vrot.slane %v4868_v45, 5  ;;  %v4652_v18 = vcombine.high %v1753_v59, %v1753_v59  ;;  %v4675_v40 = vrot.slane %v4649_v12, 9  ;;  %v5717_v49 = vld [vmem:[#allocation4 + $0x58] ss:$8 sps:$4 sm:$0xff]  }
 0x1c0   :  { %v1871_v61 = vrot.slane %v4650_v37, 5  ;;  %v4676_v54 = vrot.slane %v4651_v14, 9  ;;  %v4869_v19 = vcombine.low %v3026_v9, %v3026_v9  ;;  %5211 = vmatpush3.bf16.msra.mxu1 %v5723_v1  ;;  %v3153_v22 = vsel %vm6259_vm0, %v4887_v2, %v3152_v4  ;;  %v3029_v34 = vld [vmem:[#allocation4 + $0x98] sm:$0x1e]  ;;  %v5724_v2 = vld [vmem:[#allocation4 + $0x68] ss:$8 sps:$4 sm:$0xff]  }
 0x1c1   :  { %5393 = vmatprep.mubr.bf16.mxu0 %v4897_v53  ;;  %v1875_v27 = vrot.slane %v4652_v18, 5  ;;  %v4870_v35 = vcombine.high %v3026_v9, %v3026_v9  ;;  %v4871_v23 = vcombine.low %v3027_v15, %v3027_v15  ;;  %5212 = vmatprep.subr.bf16.mxu1 %v5725_v10  ;;  %v3157_v42 = vsel %vm6259_vm0, %v4888_v11, %v3156_v17  ;;  %v1758_v10 = vld [vmem:[#allocation4 + $0x70] sm:$0x1e]  ;;  %v1759_v33 = vld [vmem:[#allocation4 + $0x78] sm:$0x1e] }
 0x1c2   :  { %v1872_v30 = vsel %vm6259_vm0, %v4675_v40, %v1871_v61  ;;  %v4872_v31 = vcombine.high %v3027_v15, %v3027_v15  ;;  %v4889_v28 = vrot.slane %v4869_v19, 9  ;;  %v4653_v26 = vcombine.low %v1754_v21, %v1754_v21  ;;  %v2654_v53 = vld [vmem:[#allocation4 + $0x10] sm:$0x1f] }
 0x1c3   :  { %v1876_v36 = vsel %vm6259_vm0, %v4676_v54, %v1875_v27  ;;  %v3160_v6 = vrot.slane %v4870_v35, 5  ;;  %v4890_v20 = vrot.slane %v4871_v23, 9  ;;  %v4654_v51 = vcombine.high %v1754_v21, %v1754_v21  ;;  %v2655_v54 = vld [vmem:[#allocation4 + $0x18] sm:$0x1f] }
 0x1c4   :  { %v4688_v43 = vcombine.low %v1872_v30, %v1876_v36  ;;  %v3164_v32 = vrot.slane %v4872_v31, 5  ;;  %v4655_v44 = vcombine.low %v1755_v24, %v1755_v24  ;;  %5213 = vmatpush3.bf16.msra.mxu1 %v5730_v57  ;;  %v4898_v5 = vcombine.low %v3153_v22, %v3157_v42  ;;  %v6707_v36 = vld [vmem:[#allocation4 + $0x20] sm:$0x1f] }
 0x1c5   :  { %v4656_v46 = vcombine.high %v1755_v24, %v1755_v24  ;;  %v4677_v13 = vrot.slane %v4653_v26, 9  ;;  %5214 = vmatprep.subr.bf16.mxu1 %v5732_v7  ;;  %v3161_v47 = vsel %vm6259_vm0, %v4889_v28, %v3160_v6  ;;  %v1879_v50 = vrot.slane %v4654_v51, 5 }
 0x1c6   :  { %4023 = vmatmul.mubr.bf16.gmra.mrb[44].mxu1 %v4688_v43  ;;  %v3165_v48 = vsel %vm6259_vm0, %v4890_v20, %v3164_v32  ;;  %v4678_v41 = vrot.slane %v4655_v44, 9  ;;  %v4659_v56 = vcombine.low %v1757_v25, %v1757_v25  ;;  %v4660_v16 = vcombine.high %v1757_v25, %v1757_v25  ;;  %v5731_v20 = vld [vmem:[#allocation4 + $0x78] ss:$8 sps:$4 sm:$0xff]   ;;  %v6709_v32 = vld [vmem:[#allocation4 + $0x28] sm:$0x1f] }
 0x1c7   :  { %5394 = vmatmul.mubr.bf16.gmra.mrb[104].mxu0 %v4898_v5  ;;  %v4899_v29 = vcombine.low %v3161_v47, %v3165_v48  ;;  %4030 = vmatprep.mubr.bf16.mxu1 %v5717_v49  ;;  %v1883_v52 = vrot.slane %v4656_v46, 5  ;;  %v1880_v59 = vsel %vm6259_vm0, %v4677_v13, %v1879_v50  ;;  %v4657_v0 = vcombine.low %v1756_v62, %v1756_v62  ;;  %v1761_v5 = vld [vmem:[#allocation4 + $0x88] sm:$0x1e] }
 0x1c8   :  { %5215 = vmatpush3.bf16.msra.mxu1 %v5737_v38  ;;  %v4658_v55 = vcombine.high %v1756_v62, %v1756_v62  ;;  %v4873_v1 = vcombine.low %v3028_v8, %v3028_v8  ;;  %v4680_v4 = vrot.slane %v4659_v56, 9  ;;  %v4874_v12 = vcombine.high %v3028_v8, %v3028_v8 }
 0x1c9   :  { %5397 = vmatprep.mubr.bf16.mxu0 %v4899_v29  ;;  %v1884_v63 = vsel %vm6259_vm0, %v4678_v41, %v1883_v52  ;;  %5216 = vmatprep.subr.bf16.mxu1 %v5743_v60  ;;  %v1891_v9 = vrot.slane %v4660_v16, 5  ;;  %v4875_v11 = vcombine.low %v3029_v34, %v3029_v34  ;;  %v4876_v37 = vcombine.high %v3029_v34, %v3029_v34  ;;  %v1760_v60 = vld [vmem:[#allocation4 + $0x80] sm:$0x1e] }
 0x1ca   :  { %v4689_v45 = vcombine.low %v1880_v59, %v1884_v63  ;;  %v4891_v14 = vrot.slane %v4873_v1, 9  ;;  %v3168_v15 = vrot.slane %v4874_v12, 5  ;;  %v4679_v17 = vrot.slane %v4657_v0, 9  ;;  %v6719_v0 = vld [vmem:[#allocation4 + $0x38] sm:$0x1f] }
 0x1cb   :  { %v1887_v18 = vrot.slane %v4658_v55, 5  ;;  %v4892_v40 = vrot.slane %v4875_v11, 9  ;;  %v3172_v61 = vrot.slane %v4876_v37, 5  ;;  %v4661_v19 = vcombine.low %v1758_v10, %v1758_v10  ;;  %v5738_v11 = vld [vmem:[#allocation4 + $0x88] ss:$8 sps:$4 sm:$0xff]  }
 0x1cc   :  { %5217 = vmatpush3.bf16.msra.mxu1 %v5748_v58  ;;  %v4663_v21 = vcombine.low %v1759_v33, %v1759_v33  ;;  %v3169_v57 = vsel %vm6259_vm0, %v4891_v14, %v3168_v15  ;;  %v1892_v22 = vsel %vm6259_vm0, %v4680_v4, %v1891_v9  ;;  %v4664_v27 = vcombine.high %v1759_v33, %v1759_v33  ;;  %v6721_v33 = vld [vmem:[#allocation4 + $0x30] sm:$0x1f] }
 0x1cd   :  { %v3173_v35 = vsel %vm6259_vm0, %v4892_v40, %v3172_v61  ;;  %v4805_v23 = vcombine.low %v2654_v53, %v2654_v53  ;;  %v4662_v24 = vcombine.high %v1758_v10, %v1758_v10  ;;  %v4807_v42 = vcombine.low %v2655_v54, %v2655_v54 }
 0x1ce   :  { %4031 = vmatmul.mubr.bf16.gmra.mrb[48].mxu1 %v4689_v45  ;;  %v4900_v7 = vcombine.low %v3169_v57, %v3173_v35  ;;  %v1888_v30 = vsel %vm6259_vm0, %v4679_v17, %v1887_v18  ;;  %v4681_v51 = vrot.slane %v4661_v19, 9  ;;  %v4682_v44 = vrot.slane %v4663_v21, 9 }
 0x1cf   :  { %4038 = vmatprep.mubr.bf16.mxu1 %v5724_v2  ;;  %v2751_v31 = vshrl.u32 %v4805_v23, 16  ;;  %v2754_v28 = vshll.u32 %v4805_v23, 16  ;;  %v4690_v6 = vcombine.low %v1888_v30, %v1892_v22  ;;  %v2765_v26 = vshrl.u32 %v4807_v42, 16 }
 0x1d0   :  { %5398 = vmatmul.mubr.bf16.gmra.mrb[108].mxu0 %v4900_v7  ;;  %v2768_v43 = vshll.u32 %v4807_v42, 16  ;;  %v1899_v38 = vrot.slane %v4664_v27, 5  ;;  %v1895_v49 = vrot.slane %v4662_v24, 5  ;;  %v4808_v46 = vcombine.high %v2655_v54, %v2655_v54 }
 0x1d1   :  { %v2767_v13 = vrot.slane %v2765_v26, 4  ;;  %v2753_v47 = vrot.slane %v2751_v31, 4  ;;  %v2756_v48 = vrot.slane %v2754_v28, 5  ;;  %v4809_v50 = vcombine.low %v6707_v36, %v6707_v36  ;;  %v6737_v31 = vld [vmem:[#allocation4 + $0x40] sm:$0x1f] }
 0x1d2   :  { %v2770_v25 = vrot.slane %v2768_v43, 5  ;;  %v4811_v41 = vcombine.low %v6709_v32, %v6709_v32  ;;  %v4667_v29 = vcombine.low %v1761_v5, %v1761_v5  ;;  %v4668_v52 = vcombine.high %v1761_v5, %v1761_v5  ;;  %v2661_v26 = vld [vmem:[#allocation4 + $0x48] sm:$0x1f] }
 0x1d3   :  { %v4806_v62 = vcombine.high %v2654_v53, %v2654_v53  ;;  %v1900_v56 = vsel %vm6259_vm0, %v4682_v44, %v1899_v38  ;;  %v1896_v63 = vsel %vm6259_vm0, %v4681_v51, %v1895_v49  ;;  %v4665_v16 = vcombine.low %v1760_v60, %v1760_v60 }
 0x1d4   :  { %v2771_v8 = vor.u32 %v2770_v25, %v2767_v13  ;;  %v2793_v58 = vshrl.u32 %v4811_v41, 16  ;;  %v2796_v59 = vshll.u32 %v4811_v41, 16  ;;  %v4666_v34 = vcombine.high %v1760_v60, %v1760_v60 }
 0x1d5   :  { %v2757_v55 = vor.u32 %v2756_v48, %v2753_v47  ;;  %v2774_v1 = vshll.u32 %v4808_v46, 16  ;;  %v2779_v45 = vshrl.u32 %v4809_v50, 16  ;;  %v2782_v2 = vshll.u32 %v4809_v50, 16 }
 0x1d6   :  { %4039 = vmatmul.mubr.bf16.gmra.mrb[52].mxu1 %v4690_v6  ;;  %v4691_v4 = vcombine.low %v1896_v63, %v1900_v56  ;;  %v4684_v12 = vrot.slane %v4667_v29, 9  ;;  %v1907_v9 = vrot.slane %v4668_v52, 5  ;;  %v2760_v10 = vshll.u32 %v4806_v62, 16 }
 0x1d7   :  { %4046 = vmatprep.mubr.bf16.mxu1 %v5731_v20  ;;  %v2772_v37 = vrot.slane %v2771_v8, 4  ;;  %v2795_v14 = vrot.slane %v2793_v58, 4  ;;  %v2798_v15 = vrot.slane %v2796_v59, 5  ;;  %v4815_v53 = vcombine.low %v6719_v0, %v6719_v0 }
 0x1d8   :  { %v4683_v17 = vrot.slane %v4665_v16, 9  ;;  %v1903_v18 = vrot.slane %v4666_v34, 5  ;;  %v4812_v40 = vcombine.high %v6709_v32, %v6709_v32  ;;  %v2758_v61 = vrot.slane %v2757_v55, 4 }
 0x1d9   :  { %v2776_v54 = vrot.slane %v2774_v1, 5  ;;  %v2781_v19 = vrot.slane %v2779_v45, 4  ;;  %v2784_v21 = vrot.slane %v2782_v2, 5  ;;  %v1908_v57 = vsel %vm6259_vm0, %v4684_v12, %v1907_v9  ;;  %v5753_v1 = vld [vmem:[#allocation4 + $0x10] ss:$8 sps:$4 sm:$0xff]  }
 0x1da   :  { %v2762_v22 = vrot.slane %v2760_v10, 5  ;;  %v4810_v27 = vcombine.high %v6707_v36, %v6707_v36  ;;  %v4813_v35 = vcombine.low %v6721_v33, %v6721_v33  ;;  %v2799_v24 = vor.u32 %v2798_v15, %v2795_v14  ;;  %v2662_v9 = vld [vmem:[#allocation4 + $0x60] sm:$0x1f] }
 0x1db   :  { %v2777_v23 = vsel %vm6208_vm13, %v2772_v37, %v2776_v54  ;;  %v2821_v7 = vshrl.u32 %v4815_v53, 16  ;;  %v2824_v42 = vshll.u32 %v4815_v53, 16  ;;  %v1904_v30 = vsel %vm6259_vm0, %v4683_v17, %v1903_v18 }
 0x1dc   :  { %v4692_v28 = vcombine.low %v1904_v30, %v1908_v57  ;;  %v2763_v6 = vsel %vm6208_vm13, %v2758_v61, %v2762_v22  ;;  %v2785_v20 = vor.u32 %v2784_v21, %v2781_v19  ;;  %v2802_v36 = vshll.u32 %v4812_v40, 16 }
 0x1dd   :  { %v4837_v43 = vcombine.low %v2763_v6, %v2777_v23  ;;  %v2788_v32 = vshll.u32 %v4810_v27, 16  ;;  %v2807_v51 = vshrl.u32 %v4813_v35, 16  ;;  %v2810_v44 = vshll.u32 %v4813_v35, 16 }
 0x1de   :  { %4047 = vmatmul.mubr.bf16.gmra.mrb[56].mxu1 %v4691_v4  ;;  %v2800_v38 = vrot.slane %v2799_v24, 4  ;;  %v2823_v5 = vrot.slane %v2821_v7, 4  ;;  %v2826_v49 = vrot.slane %v2824_v42, 5  ;;  %v4817_v3 = vcombine.low %v6737_v31, %v6737_v31  ;;  %v2665_v7 = vld [vmem:[#allocation4 + $0x78] sm:$0x1f] }
 0x1df   :  { %4054 = vmatprep.mubr.bf16.mxu1 %v5738_v11  ;;  %v4819_v46 = vcombine.low %v2661_v26, %v2661_v26  ;;  %v2786_v13 = vrot.slane %v2785_v20, 4  ;;  %v2804_v25 = vrot.slane %v2802_v36, 5  ;;  %v4816_v60 = vcombine.high %v6719_v0, %v6719_v0  ;;  %v6751_v0 = vld [vmem:[#allocation4 + $0x68] sm:$0x1f] }
 0x1e0   :  { %v2790_v47 = vrot.slane %v2788_v32, 5  ;;  %v4814_v48 = vcombine.high %v6721_v33, %v6721_v33  ;;  %v2809_v50 = vrot.slane %v2807_v51, 4  ;;  %v2812_v41 = vrot.slane %v2810_v44, 5 }
 0x1e1   :  { %v2805_v29 = vsel %vm6208_vm13, %v2800_v38, %v2804_v25  ;;  %v2827_v52 = vor.u32 %v2826_v49, %v2823_v5  ;;  %v2835_v62 = vshrl.u32 %v4817_v3, 16  ;;  %v2838_v56 = vshll.u32 %v4817_v3, 16 }
 0x1e2   :  { %v2849_v58 = vshrl.u32 %v4819_v46, 16  ;;  %v2852_v59 = vshll.u32 %v4819_v46, 16  ;;  %v2791_v16 = vsel %vm6208_vm13, %v2786_v13, %v2790_v47  ;;  %v2830_v34 = vshll.u32 %v4816_v60, 16 }
 0x1e3   :  { %v4838_v45 = vcombine.low %v2791_v16, %v2805_v29  ;;  %v2813_v2 = vor.u32 %v2812_v41, %v2809_v50  ;;  %v2816_v4 = vshll.u32 %v4814_v48, 16  ;;  %v4820_v12 = vcombine.high %v2661_v26, %v2661_v26 }
 0x1e4   :  { %v2828_v33 = vrot.slane %v2827_v52, 4  ;;  %v2837_v11 = vrot.slane %v2835_v62, 4  ;;  %v2840_v37 = vrot.slane %v2838_v56, 5  ;;  %v2851_v15 = vrot.slane %v2849_v58, 4  ;;  %v6773_v58 = vld [vmem:[#allocation4 + $0x88] sm:$0x1f] }
 0x1e5   :  { %v2854_v53 = vrot.slane %v2852_v59, 5  ;;  %v4823_v17 = vcombine.low %v6751_v0, %v6751_v0  ;;  %v2832_v40 = vrot.slane %v2830_v34, 5  ;;  %v4821_v61 = vcombine.low %v2662_v9, %v2662_v9  ;;  %v5763_v34 = vld [vmem:[#allocation4 + $0x30] ss:$8 sps:$4 sm:$0xff]  }
 0x1e6   :  { %4055 = vmatmul.mubr.bf16.gmra.mrb[60].mxu1 %v4692_v28  ;;  %v2814_v54 = vrot.slane %v2813_v2, 4  ;;  %v4818_v19 = vcombine.high %v6737_v31, %v6737_v31  ;;  %v2818_v21 = vrot.slane %v2816_v4, 5  ;;  %v2858_v22 = vshll.u32 %v4820_v12, 16  ;;  %v5758_v28 = vld [vmem:[#allocation4 + $0x20] ss:$8 sps:$4 sm:$0xff]  }
 0x1e7   :  { %4192 = vmatprep.mubr.bf16.mxu1 %v4837_v43  ;;  %v2833_v57 = vsel %vm6208_vm13, %v2828_v33, %v2832_v40  ;;  %v2841_v27 = vor.u32 %v2840_v37, %v2837_v11  ;;  %v2855_v35 = vor.u32 %v2854_v53, %v2851_v15  ;;  %v2877_v23 = vshrl.u32 %v4823_v17, 16  ;;  %v2664_v31 = vld [vmem:[#allocation4 + $0x70] sm:$0x1f]  ;;  %v2666_v12 = vld [vmem:[#allocation4 + $0x80] sm:$0x1f] }
 0x1e8   :  { %v2880_v24 = vshll.u32 %v4823_v17, 16  ;;  %v2863_v42 = vshrl.u32 %v4821_v61, 16  ;;  %v2866_v30 = vshll.u32 %v4821_v61, 16  ;;  %v2819_v6 = vsel %vm6208_vm13, %v2814_v54, %v2818_v21 }
 0x1e9   :  { %v5026_v8 = vpop.f32.mrb[0].mxu1  ;;  %v2844_v20 = vshll.u32 %v4818_v19, 16  ;;  %v4839_v36 = vcombine.low %v2819_v6, %v2833_v57  ;;  %v2860_v26 = vrot.slane %v2858_v22, 5  ;;  %v4827_v43 = vcombine.low %v2665_v7, %v2665_v7 }
 0x1ea   :  { %v5027_v63 = vpop.f32.mrb[1].mxu1  ;;  %v2842_v32 = vrot.slane %v2841_v27, 4  ;;  %v2856_v51 = vrot.slane %v2855_v35, 4  ;;  %v2879_v44 = vrot.slane %v2877_v23, 4  ;;  %v2882_v38 = vrot.slane %v2880_v24, 5 }
 0x1eb   :  { %v5029_v55 = vpop.f32.mrb[2].mxu1  ;;  %v6753_v14 = vadd.f32 %v5027_v63, %v5026_v8  ;;  %v4824_v5 = vcombine.high %v6751_v0, %v6751_v0  ;;  %v2865_v49 = vrot.slane %v2863_v42, 4  ;;  %v2868_v3 = vrot.slane %v2866_v30, 5  ;;  %v2668_v35 = vld [vmem:[#allocation4 + $0x90] sm:$0x1f] }
 0x1ec   :  { %v5030_v10 = vpop.f32.mrb[3].mxu1  ;;  %v2846_v13 = vrot.slane %v2844_v20, 5  ;;  %v4822_v25 = vcombine.high %v2662_v9, %v2662_v9  ;;  %v4825_v60 = vcombine.low %v2664_v31, %v2664_v31  ;;  %v2905_v48 = vshrl.u32 %v4827_v43, 16  ;;  %v2669_v23 = vld [vmem:[#allocation4 + $0x98] sm:$0x1f] }
 0x1ed   :  { %v6757_v18 = vadd.f32 %v5030_v10, %v5029_v55  ;;  %v2908_v50 = vshll.u32 %v4827_v43, 16  ;;  %v2861_v62 = vsel %vm6208_vm13, %v2856_v51, %v2860_v26  ;;  %v2883_v56 = vor.u32 %v2882_v38, %v2879_v44  ;;  %v5768_v24 = vld [vmem:[#allocation4 + $0x40] ss:$8 sps:$4 sm:$0xff]  }
 0x1ee   :  { %4193 = vmatmul.mubr.bf16.vlgmr.msra.gmra.mrb[64].mxu1 %v5753_v1  ;;  %v2847_v52 = vsel %vm6208_vm13, %v2842_v32, %v2846_v13  ;;  %v2869_v59 = vor.u32 %v2868_v3, %v2865_v49  ;;  %v2886_v63 = vshll.u32 %v4824_v5, 16  ;;  %v2872_v0 = vshll.u32 %v4822_v25, 16 }
 0x1ef   :  { %4200 = vmatprep.mubr.bf16.mxu1 %v4838_v45  ;;  %v2891_v55 = vshrl.u32 %v4825_v60, 16  ;;  %v2894_v1 = vshll.u32 %v4825_v60, 16  ;;  %v4840_v45 = vcombine.low %v2847_v52, %v2861_v62  ;;  %v2907_v2 = vrot.slane %v2905_v48, 4 }
 0x1f0   :  { %v2910_v4 = vrot.slane %v2908_v50, 5  ;;  %v4831_v9 = vcombine.low %v6773_v58, %v6773_v58  ;;  %v2884_v10 = vrot.slane %v2883_v56, 4  ;;  %v2870_v33 = vrot.slane %v2869_v59, 4  ;;  %v5773_v59 = vld [vmem:[#allocation4 + $0x60] ss:$8 sps:$4 sm:$0xff]  }
 0x1f1   :  { %v2888_v11 = vrot.slane %v2886_v63, 5  ;;  %v4828_v37 = vcombine.high %v2665_v7, %v2665_v7  ;;  %v4826_v15 = vcombine.high %v2664_v31, %v2664_v31  ;;  %v2893_v53 = vrot.slane %v2891_v55, 4 }
 0x1f2   :  { %v2896_v17 = vrot.slane %v2894_v1, 5  ;;  %v4829_v40 = vcombine.low %v2666_v12, %v2666_v12  ;;  %v2874_v61 = vrot.slane %v2872_v0, 5  ;;  %v2911_v54 = vor.u32 %v2910_v4, %v2907_v2 }
 0x1f3   :  { %v2933_v19 = vshrl.u32 %v4831_v9, 16  ;;  %v2936_v21 = vshll.u32 %v4831_v9, 16  ;;  %v2889_v57 = vsel %vm6208_vm13, %v2884_v10, %v2888_v11  ;;  %v2914_v27 = vshll.u32 %v4828_v37, 16 }
 0x1f4   :  { %v2875_v22 = vsel %vm6208_vm13, %v2870_v33, %v2874_v61  ;;  %v2897_v42 = vor.u32 %v2896_v17, %v2893_v53  ;;  %v2900_v7 = vshll.u32 %v4826_v15, 16  ;;  %v2919_v30 = vshrl.u32 %v4829_v40, 16 }
 0x1f5   :  { %v4841_v6 = vcombine.low %v2875_v22, %v2889_v57  ;;  %v2912_v20 = vrot.slane %v2911_v54, 4  ;;  %v2938_v26 = vrot.slane %v2936_v21, 5  ;;  %v4833_v32 = vcombine.low %v2668_v35, %v2668_v35 }
 0x1f6   :  { %4201 = vmatmul.mubr.bf16.gmra.mrb[68].mxu1 %v5758_v28  ;;  %v2922_v28 = vshll.u32 %v4829_v40, 16  ;;  %v4835_v51 = vcombine.low %v2669_v23, %v2669_v23  ;;  %v2916_v44 = vrot.slane %v2914_v27, 5  ;;  %v4830_v38 = vcombine.high %v2666_v12, %v2666_v12 }
 0x1f7   :  { %4208 = vmatprep.mubr.bf16.mxu1 %v4839_v36  ;;  %v5154_v46 = vpop.f32.mrb[64].mxu0  ;;  %v2935_v36 = vrot.slane %v2933_v19, 4  ;;  %v2898_v3 = vrot.slane %v2897_v42, 4  ;;  %v2921_v13 = vrot.slane %v2919_v30, 4  ;;  %v2947_v52 = vshrl.u32 %v4833_v32, 16 }
 0x1f8   :  { %v5155_v47 = vpop.f32.mrb[65].mxu0  ;;  %v2924_v25 = vrot.slane %v2922_v28, 5  ;;  %v2917_v48 = vsel %vm6208_vm13, %v2912_v20, %v2916_v44  ;;  %v2950_v62 = vshll.u32 %v4833_v32, 16  ;;  %v2961_v56 = vshrl.u32 %v4835_v51, 16  ;;  %v5778_v19 = vld [vmem:[#allocation4 + $0x70] ss:$8 sps:$4 sm:$0xff]  }
 0x1f9   :  { %v6767_v41 = vadd.f32 %v5155_v47, %v5154_v46  ;;  %v5157_v29 = vpop.f32.mrb[66].mxu0  ;;  %v4832_v46 = vcombine.high %v6773_v58, %v6773_v58  ;;  %v2902_v47 = vrot.slane %v2900_v7, 5  ;;  %v2939_v50 = vor.u32 %v2938_v26, %v2935_v36  ;;  %v5783_v26 = vld [vmem:[#allocation4 + $0x80] ss:$8 sps:$4 sm:$0xff]  }
 0x1fa   :  { %v5158_v8 = vpop.f32.mrb[67].mxu0  ;;  %v2928_v58 = vshll.u32 %v4830_v38, 16  ;;  %v4836_v2 = vcombine.high %v2669_v23, %v2669_v23  ;;  %v2949_v4 = vrot.slane %v2947_v52, 4  ;;  %v2952_v12 = vrot.slane %v2950_v62, 5 }
 0x1fb   :  { %v6775_v16 = vadd.f32 %v5158_v8, %v5157_v29  ;;  %v2964_v8 = vshll.u32 %v4835_v51, 16  ;;  %v2903_v63 = vsel %vm6208_vm13, %v2898_v3, %v2902_v47  ;;  %v2942_v0 = vshll.u32 %v4832_v46, 16 }
 0x1fc   :  { %v4842_v55 = vcombine.low %v2903_v63, %v2917_v48  ;;  %v2940_v1 = vrot.slane %v2939_v50, 4  ;;  %v2963_v9 = vrot.slane %v2961_v56, 4  ;;  %v2930_v37 = vrot.slane %v2928_v58, 5 }
 0x1fd   :  { %v2966_v10 = vrot.slane %v2964_v8, 5  ;;  %v2944_v11 = vrot.slane %v2942_v0, 5  ;;  %v2953_v17 = vor.u32 %v2952_v12, %v2949_v4  ;;  %v2970_v61 = vshll.u32 %v4836_v2, 16 }
 0x1fe   :  { %4209 = vmatmul.mubr.bf16.gmra.mrb[72].mxu1 %v5763_v34  ;;  %v2925_v34 = vor.u32 %v2924_v25, %v2921_v13 }
 0x1ff   :  { %4216 = vmatprep.mubr.bf16.mxu1 %v4840_v45  ;;  %v4834_v45 = vcombine.high %v2668_v35, %v2668_v35  ;;  %v2945_v53 = vsel %vm6208_vm13, %v2940_v1, %v2944_v11  ;;  %v2967_v40 = vor.u32 %v2966_v10, %v2963_v9  ;;  %v2954_v23 = vrot.slane %v2953_v17, 4 }
 0x200   :  { %v2926_v33 = vrot.slane %v2925_v34, 4  ;;  %v2972_v7 = vrot.slane %v2970_v61, 5 }
 0x201   :  { %v2956_v15 = vshll.u32 %v4834_v45, 16  ;;  %v2968_v42 = vrot.slane %v2967_v40, 4 }
 0x202   :  { %v2931_v21 = vsel %vm6208_vm13, %v2926_v33, %v2930_v37 }
 0x203   :  { %v4843_v22 = vcombine.low %v2931_v21, %v2945_v53  ;;  %v2973_v20 = vsel %vm6208_vm13, %v2968_v42, %v2972_v7 }
 0x205   :  { %v5032_v31 = vpop.f32.mrb[4].mxu1 }
 0x206   :  { %4217 = vmatmul.mubr.bf16.gmra.mrb[76].mxu1 %v5768_v24  ;;  %v5033_v43 = vpop.f32.mrb[5].mxu1  ;;  %v2958_v24 = vrot.slane %v2956_v15, 5 }
 0x207   :  { %4224 = vmatprep.mubr.bf16.mxu1 %v4841_v6  ;;  %v6783_v5 = vadd.f32 %v5033_v43, %v5032_v31  ;;  %v5035_v49 = vpop.f32.mrb[6].mxu1 }
 0x208   :  { %v5036_v60 = vpop.f32.mrb[7].mxu1  ;;  %v2959_v6 = vsel %vm6208_vm13, %v2954_v23, %v2958_v24 }
 0x209   :  { %v6789_v29 = vadd.f32 %v5036_v60, %v5035_v49  ;;  %v4844_v43 = vcombine.low %v2959_v6, %v2973_v20  ;;  %v5788_v49 = vld [vmem:[#allocation4 + $0x90] ss:$8 sps:$4 sm:$0xff]  }
 0x20e   :  { %4225 = vmatmul.mubr.bf16.gmra.mrb[80].mxu1 %v5773_v59 }
 0x20f   :  { %4232 = vmatprep.mubr.bf16.mxu1 %v4842_v55 }
 0x213   :  { %v5160_v54 = vpop.f32.mrb[68].mxu0 }
 0x214   :  { %v5161_v57 = vpop.f32.mrb[69].mxu0 }
 0x215   :  { %v6797_v27 = vadd.f32 %v5161_v57, %v5160_v54  ;;  %v5163_v35 = vpop.f32.mrb[70].mxu0  ;;  %v4406_v57 = vld [vmem:[%s7081_s5] sm:$0xff] }
 0x216   :  { %4233 = vmatmul.mubr.bf16.gmra.mrb[84].mxu1 %v5778_v19  ;;  %v5164_v30 = vpop.f32.mrb[71].mxu0  ;;  %v5816_v19 = vmov 0.0|0.0  }
 0x217   :  { %4240 = vmatprep.mubr.bf16.mxu1 %v4843_v22  ;;  %v6799_v28 = vadd.f32 %v5164_v30, %v5163_v35  ;;  %5436 = vmatprep.subr.bf16.mxu1 %v5816_v19  ;;  %v4407_v22 = vld [vmem:[%s7081_s5 + $0x8] sm:$0xff] }
 0x218   :  { %v5437_v23 = vpack.c.bf16 %v4407_v22, %v4406_v57 }
 0x21a   :  { %5438 = vmatpush3.bf16.msra.mxu1 %v5437_v23  ;;  %v4414_v23 = vld [vmem:[%s7081_s5 + $0x40] sm:$0xff] }
 0x21b   :  { %v5038_v36 = vpop.f32.mrb[8].mxu1  ;;  %5439 = vmatprep.subr.bf16.mxu1 %v5816_v19 }
 0x21c   :  { %v5039_v31 = vpop.f32.mrb[9].mxu1 }
 0x21d   :  { %v6805_v32 = vadd.f32 %v5039_v31, %v5038_v36  ;;  %v5041_v51 = vpop.f32.mrb[10].mxu1 }
 0x21e   :  { %4241 = vmatmul.mubr.bf16.gmra.mrb[88].mxu1 %v5783_v26  ;;  %v5042_v44 = vpop.f32.mrb[11].mxu1 }
 0x21f   :  { %4248 = vmatprep.mubr.bf16.mxu1 %v4844_v43  ;;  %v6807_v38 = vadd.f32 %v5042_v44, %v5041_v51  ;;  %v4408_v44 = vld [vmem:[%s7081_s5 + $0x10] sm:$0xff] }
 0x226   :  { %4249 = vmatmul.mubr.bf16.gmra.mrb[92].mxu1 %v5788_v49  ;;  %v4409_v49 = vld [vmem:[%s7081_s5 + $0x18] sm:$0xff] }
 0x227   :  { %v5166_v3 = vpop.f32.mrb[72].mxu0 }
 0x228   :  { %v5167_v46 = vpop.f32.mrb[73].mxu0 }
 0x229   :  { %v6809_v13 = vadd.f32 %v5167_v46, %v5166_v3  ;;  %v5169_v39 = vpop.f32.mrb[74].mxu0  ;;  %v5440_v3 = vpack.c.bf16 %v4409_v49, %v4408_v44 }
 0x22a   :  { %v5170_v25 = vpop.f32.mrb[75].mxu0 }
 0x22b   :  { %v6811_v60 = vadd.f32 %v5170_v25, %v5169_v39  ;;  %5441 = vmatpush3.bf16.msra.mxu1 %v5440_v3  ;;  %v4410_v39 = vld [vmem:[%s7081_s5 + $0x20] sm:$0xff]  ;;  %v4411_v25 = vld [vmem:[%s7081_s5 + $0x28] sm:$0xff] }
 0x22c   :  { %5442 = vmatprep.subr.bf16.mxu1 %v5816_v19 }
 0x232   :  { %v5044_v47 = vpop.f32.mrb[12].mxu1 }
 0x233   :  { %v5045_v48 = vpop.f32.mrb[13].mxu1 }
 0x234   :  { %v6813_v50 = vadd.f32 %v5045_v48, %v5044_v47  ;;  %v5047_v52 = vpop.f32.mrb[14].mxu1  ;;  %v5443_v48 = vpack.c.bf16 %v4411_v25, %v4410_v39 }
 0x235   :  { %v5048_v62 = vpop.f32.mrb[15].mxu1 }
 0x236   :  { %v6815_v56 = vadd.f32 %v5048_v62, %v5047_v52  ;;  %5444 = vmatpush3.bf16.msra.mxu1 %v5443_v48 }
 0x237   :  { %5445 = vmatprep.subr.bf16.mxu1 %v5816_v19 }
 0x23f   :  { %v5172_v8 = vpop.f32.mrb[76].mxu0 }
 0x240   :  { %v5173_v59 = vpop.f32.mrb[77].mxu0 }
 0x241   :  { %v6817_v63 = vadd.f32 %v5173_v59, %v5172_v8  ;;  %v5175_v34 = vpop.f32.mrb[78].mxu0 }
 0x242   :  { %v5176_v58 = vpop.f32.mrb[79].mxu0 }
 0x243   :  { %v6819_v0 = vadd.f32 %v5176_v58, %v5175_v34 }
 0x248   :  { %v5050_v55 = vpop.f32.mrb[16].mxu1 }
 0x249   :  { %v5051_v1 = vpop.f32.mrb[17].mxu1 }
 0x24a   :  { %v6821_v45 = vadd.f32 %v5051_v1, %v5050_v55  ;;  %v5053_v2 = vpop.f32.mrb[18].mxu1 }
 0x24b   :  { %v5054_v4 = vpop.f32.mrb[19].mxu1 }
 0x24c   :  { %v6823_v12 = vadd.f32 %v5054_v4, %v5053_v2  ;;  %v4412_v2 = vld [vmem:[%s7081_s5 + $0x30] sm:$0xff]  ;;  %v4413_v4 = vld [vmem:[%s7081_s5 + $0x38] sm:$0xff] }
 0x252   :  { %v5178_v9 = vpop.f32.mrb[80].mxu0 }
 0x253   :  { %v5179_v10 = vpop.f32.mrb[81].mxu0 }
 0x254   :  { %v6825_v33 = vadd.f32 %v5179_v10, %v5178_v9  ;;  %v5181_v11 = vpop.f32.mrb[82].mxu0  ;;  %v5446_v10 = vpack.c.bf16 %v4413_v4, %v4412_v2 }
 0x255   :  { %v5182_v37 = vpop.f32.mrb[83].mxu0 }
 0x256   :  { %v6827_v15 = vadd.f32 %v5182_v37, %v5181_v11  ;;  %5447 = vmatpush3.bf16.msra.mxu1 %v5446_v10  ;;  %v6881_v37 = vld [vmem:[%s7080_s4] ss:$0 sm:$0xff] }
 0x257   :  { %5448 = vmatprep.subr.bf16.mxu1 %v5816_v19 }
 0x25b   :  { %v5056_v53 = vpop.f32.mrb[20].mxu1 }
 0x25c   :  { %v5057_v17 = vpop.f32.mrb[21].mxu1 }
 0x25d   :  { %v6829_v40 = vadd.f32 %v5057_v17, %v5056_v53  ;;  %v5059_v61 = vpop.f32.mrb[22].mxu1 }
 0x25e   :  { %v5060_v54 = vpop.f32.mrb[23].mxu1 }
 0x25f   :  { %v6832_v21 = vadd.f32 %v5060_v54, %v5059_v61  ;;  %v3904_v54 = vadd.f32 %v6753_v14, %v6881_v37 }
 0x264   :  { %v5184_v35 = vpop.f32.mrb[84].mxu0 }
 0x265   :  { %v5185_v24 = vpop.f32.mrb[85].mxu0 }
 0x266   :  { %v6840_v42 = vadd.f32 %v5185_v24, %v5184_v35  ;;  %v5187_v7 = vpop.f32.mrb[86].mxu0  ;;  %v4415_v24 = vld [vmem:[%s7081_s5 + $0x48] sm:$0xff] }
 0x267   :  { %v5188_v30 = vpop.f32.mrb[87].mxu0 }
 0x268   :  { %v6843_v6 = vadd.f32 %v5188_v30, %v5187_v7 }
 0x26a   :  { %v5062_v20 = vpop.f32.mrb[24].mxu1 }
 0x26b   :  { %v5063_v36 = vpop.f32.mrb[25].mxu1 }
 0x26c   :  { %v6845_v26 = vadd.f32 %v5063_v36, %v5062_v20  ;;  %v5065_v31 = vpop.f32.mrb[26].mxu1  ;;  %v5449_v36 = vpack.c.bf16 %v4415_v24, %v4414_v23 }
 0x26d   :  { %v5066_v43 = vpop.f32.mrb[27].mxu1 }
 0x26e   :  { %v6847_v51 = vadd.f32 %v5066_v43, %v5065_v31  ;;  %v3907_v31 = vadd.f32 %v6757_v18, %v6881_v37  ;;  %5450 = vmatpush3.bf16.msra.mxu1 %v5449_v36  ;;  %v3912_v18 = vadd.f32 %v6783_v5, %v6881_v37 }
 0x26f   :  { %5451 = vmatprep.subr.bf16.mxu1 %v5816_v19 }
 0x273   :  { %v5190_v46 = vpop.f32.mrb[88].mxu0 }
 0x274   :  { %v5191_v47 = vpop.f32.mrb[89].mxu0 }
 0x275   :  { %v6862_v52 = vadd.f32 %v5191_v47, %v5190_v46  ;;  %v5193_v62 = vpop.f32.mrb[90].mxu0 }
 0x276   :  { %v5194_v8 = vpop.f32.mrb[91].mxu0 }
 0x277   :  { %v6864_v59 = vadd.f32 %v5194_v8, %v5193_v62 }
 0x279   :  { %v5068_v34 = vpop.f32.mrb[28].mxu1 }
 0x27a   :  { %v5069_v58 = vpop.f32.mrb[29].mxu1 }
 0x27b   :  { %v6867_v55 = vadd.f32 %v5069_v58, %v5068_v34  ;;  %v5071_v1 = vpop.f32.mrb[30].mxu1 }
 0x27c   :  { %v5072_v9 = vpop.f32.mrb[31].mxu1 }
 0x27d   :  { %v6875_v11 = vadd.f32 %v5072_v9, %v5071_v1  ;;  %v3915_v1 = vadd.f32 %v6789_v29, %v6881_v37  ;;  %v4417_v29 = vld [vmem:[%s7081_s5 + $0x58] sm:$0xff] }
 0x281   :  { %v5090_v53 = vpop.f32.mrb[32].mxu1 }
 0x282   :  { %v5196_v17 = vpop.f32.mrb[92].mxu0  ;;  %v5091_v61 = vpop.f32.mrb[33].mxu1 }
 0x283   :  { %v5197_v57 = vpop.f32.mrb[93].mxu0  ;;  %v5092_v22 = vadd.f32 %v5091_v61, %v5090_v53  ;;  %v5093_v35 = vpop.f32.mrb[34].mxu1  ;;  %v4418_v61 = vld [vmem:[%s7081_s5 + $0x60] sm:$0xff] }
 0x284   :  { %v6891_v7 = vadd.f32 %v5197_v57, %v5196_v17  ;;  %v5199_v30 = vpop.f32.mrb[94].mxu0  ;;  %v5094_v20 = vpop.f32.mrb[35].mxu1  ;;  %v4416_v17 = vld [vmem:[%s7081_s5 + $0x50] sm:$0xff] }
 0x285   :  { %v4001_v14 = vadd.f32 %v5092_v22, %v3904_v54  ;;  %v5200_v43 = vpop.f32.mrb[95].mxu0  ;;  %v5095_v44 = vadd.f32 %v5094_v20, %v5093_v35  ;;  %v5452_v57 = vpack.c.bf16 %v4417_v29, %v4416_v17  ;;  %v5818_v22 = vmov 0.0  }
 0x286   :  { %v6895_v49 = vadd.f32 %v5200_v43, %v5199_v30  ;;  %5433 = vmatprep.mubr.msk.f32.mxu1 %vm5817_vm1, %v5818_v22  ;;  %v3920_v35 = vadd.f32 %v6805_v32, %v6881_v37  ;;  %v4420_v32 = vld [vmem:[%s7081_s5 + $0x70] sm:$0xff] }
 0x287   :  { %v4004_v3 = vadd.f32 %v5095_v44, %v3907_v31  ;;  %v6898_v46 = vadd.f32 %v6767_v41, %v4001_v14  ;;  %5453 = vmatpush3.bf16.msra.mxu1 %v5452_v57  ;;  %v3923_v14 = vadd.f32 %v6807_v38, %v6881_v37 }
 0x288   :  { %5454 = vmatprep.subr.bf16.mxu1 %v5816_v19 }
 0x289   :  { %v5096_v39 = vpop.f32.mrb[36].mxu1  ;;  %v6902_v25 = vadd.f32 %v6775_v16, %v4004_v3 }
 0x28a   :  { %v6904_v47 = vpop.f32.mrb[96].mxu0  ;;  %v5097_v48 = vpop.f32.mrb[37].mxu1 }
 0x28b   :  { %v6908_v62 = vpop.f32.mrb[97].mxu0  ;;  %v5098_v8 = vadd.f32 %v5097_v48, %v5096_v39  ;;  %v5099_v34 = vpop.f32.mrb[38].mxu1  ;;  %v4421_v39 = vld [vmem:[%s7081_s5 + $0x78] sm:$0xff] }
 0x28c   :  { %v6910_v58 = vpop.f32.mrb[98].mxu0  ;;  %v5100_v41 = vpop.f32.mrb[39].mxu1  ;;  %v5458_v38 = vpack.c.bf16 %v4421_v39, %v4420_v32 }
 0x28d   :  { %v4009_v2 = vadd.f32 %v5098_v8, %v3912_v18  ;;  %v6914_v4 = vpop.f32.mrb[99].mxu0  ;;  %v5101_v16 = vadd.f32 %v5100_v41, %v5099_v34 }
 0x28f   :  { %v4012_v9 = vadd.f32 %v5101_v16, %v3915_v1  ;;  %v6917_v10 = vadd.f32 %v6797_v27, %v4009_v2  ;;  %v3928_v2 = vadd.f32 %v6813_v50, %v6881_v37 }
 0x291   :  { %v5102_v53 = vpop.f32.mrb[40].mxu1  ;;  %v6920_v5 = vadd.f32 %v6799_v28, %v4012_v9  ;;  %v4419_v28 = vld [vmem:[%s7081_s5 + $0x68] sm:$0xff] }
 0x292   :  { %v6931_v54 = vpop.f32.mrb[100].mxu0  ;;  %v5103_v27 = vpop.f32.mrb[41].mxu1  ;;  %v5455_v31 = vpack.c.bf16 %v4419_v28, %v4418_v61 }
 0x293   :  { %v6938_v23 = vpop.f32.mrb[101].mxu0  ;;  %v5104_v24 = vadd.f32 %v5103_v27, %v5102_v53  ;;  %v5105_v30 = vpop.f32.mrb[42].mxu1 }
 0x294   :  { %v6940_v20 = vpop.f32.mrb[102].mxu0  ;;  %v5106_v36 = vpop.f32.mrb[43].mxu1  ;;  %5456 = vmatpush3.bf16.msra.mxu1 %v5455_v31 }
 0x295   :  { %v4017_v43 = vadd.f32 %v5104_v24, %v3920_v35  ;;  %v6944_v44 = vpop.f32.mrb[103].mxu0  ;;  %v5107_v3 = vadd.f32 %v5106_v36, %v5105_v30  ;;  %5457 = vmatprep.subr.bf16.mxu1 %v5816_v19  ;;  %v3936_v35 = vadd.f32 %v6821_v45, %v6881_v37 }
 0x297   :  { %v4020_v48 = vadd.f32 %v5107_v3, %v3923_v14  ;;  %v6954_v18 = vadd.f32 %v6809_v13, %v4017_v43 }
 0x298   :  { %5459 = vmatpush3.bf16.msra.mxu1 %v5458_v38 }
 0x299   :  { %v5108_v8 = vpop.f32.mrb[44].mxu1  ;;  %v6957_v34 = vadd.f32 %v6811_v60, %v4020_v48  ;;  %v3931_v60 = vadd.f32 %v6815_v56, %v6881_v37  ;;  %v3939_v56 = vadd.f32 %v6823_v12, %v6881_v37  ;;  %v3944_v12 = vadd.f32 %v6829_v40, %v6881_v37 }
 0x29a   :  { %v6960_v41 = vpop.f32.mrb[104].mxu0  ;;  %v5109_v1 = vpop.f32.mrb[45].mxu1  ;;  %v3952_v40 = vadd.f32 %v6845_v26, %v6881_v37  ;;  %v3960_v26 = vadd.f32 %v6867_v55, %v6881_v37 }
 0x29b   :  { %v6964_v16 = vpop.f32.mrb[105].mxu0  ;;  %v5110_v9 = vadd.f32 %v5109_v1, %v5108_v8  ;;  %v5111_v53 = vpop.f32.mrb[46].mxu1 }
 0x29c   :  { %v6966_v13 = vpop.f32.mrb[106].mxu0  ;;  %v5112_v17 = vpop.f32.mrb[47].mxu1 }
 0x29d   :  { %v4025_v29 = vadd.f32 %v5110_v9, %v3928_v2  ;;  %v6970_v61 = vpop.f32.mrb[107].mxu0  ;;  %v5113_v19 = vadd.f32 %v5112_v17, %v5111_v53 }
 0x29f   :  { %v4028_v27 = vadd.f32 %v5113_v19, %v3931_v60  ;;  %v6973_v57 = vadd.f32 %v6817_v63, %v4025_v29 }
 0x2a1   :  { %v5114_v50 = vpop.f32.mrb[48].mxu1  ;;  %v6976_v28 = vadd.f32 %v6819_v0, %v4028_v27 }
 0x2a2   :  { %v5115_v22 = vpop.f32.mrb[49].mxu1 }
 0x2a3   :  { %v5116_v24 = vadd.f32 %v5115_v22, %v5114_v50  ;;  %v5117_v30 = vpop.f32.mrb[50].mxu1  ;;  %v6982_v3 = vpop.f32.mrb[108].mxu0 }
 0x2a4   :  { %v5118_v36 = vpop.f32.mrb[51].mxu1  ;;  %v6987_v0 = vpop.f32.mrb[109].mxu0 }
 0x2a5   :  { %v4033_v31 = vadd.f32 %v5116_v24, %v3936_v35  ;;  %v5119_v14 = vadd.f32 %v5118_v36, %v5117_v30  ;;  %v6989_v39 = vpop.f32.mrb[110].mxu0 }
 0x2a6   :  { %v6994_v38 = vpop.f32.mrb[111].mxu0 }
 0x2a7   :  { %v4036_v43 = vadd.f32 %v5119_v14, %v3939_v56  ;;  %v6985_v63 = vadd.f32 %v6825_v33, %v4033_v31  ;;  %v3947_v33 = vadd.f32 %v6832_v21, %v6881_v37  ;;  %v3955_v21 = vadd.f32 %v6847_v51, %v6881_v37 }
 0x2a8   :  { %v3963_v51 = vadd.f32 %v6875_v11, %v6881_v37 }
 0x2a9   :  { %v5120_v32 = vpop.f32.mrb[52].mxu1  ;;  %v6992_v45 = vadd.f32 %v6827_v15, %v4036_v43 }
 0x2aa   :  { %v5121_v48 = vpop.f32.mrb[53].mxu1 }
 0x2ab   :  { %v5122_v8 = vadd.f32 %v5121_v48, %v5120_v32  ;;  %v5123_v1 = vpop.f32.mrb[54].mxu1 }
 0x2ac   :  { %v5124_v2 = vpop.f32.mrb[55].mxu1 }
 0x2ad   :  { %v4041_v9 = vadd.f32 %v5122_v8, %v3944_v12  ;;  %v5125_v53 = vadd.f32 %v5124_v2, %v5123_v1 }
 0x2af   :  { %v4044_v17 = vadd.f32 %v5125_v53, %v3947_v33  ;;  %v7001_v60 = vadd.f32 %v6840_v42, %v4041_v9 }
 0x2b1   :  { %v5126_v15 = vpop.f32.mrb[56].mxu1  ;;  %v7004_v29 = vadd.f32 %v6843_v6, %v4044_v17 }
 0x2b2   :  { %v5127_v19 = vpop.f32.mrb[57].mxu1 }
 0x2b3   :  { %v5128_v27 = vadd.f32 %v5127_v19, %v5126_v15  ;;  %v5129_v50 = vpop.f32.mrb[58].mxu1 }
 0x2b4   :  { %v5130_v22 = vpop.f32.mrb[59].mxu1 }
 0x2b5   :  { %v4049_v35 = vadd.f32 %v5128_v27, %v3952_v40  ;;  %v5131_v24 = vadd.f32 %v5130_v22, %v5129_v50 }
 0x2b7   :  { %v4052_v30 = vadd.f32 %v5131_v24, %v3955_v21  ;;  %v7011_v42 = vadd.f32 %v6862_v52, %v4049_v35 }
 0x2b9   :  { %v5132_v36 = vpop.f32.mrb[60].mxu1  ;;  %v7014_v6 = vadd.f32 %v6864_v59, %v4052_v30 }
 0x2ba   :  { %v5133_v56 = vpop.f32.mrb[61].mxu1 }
 0x2bb   :  { %v5134_v31 = vadd.f32 %v5133_v56, %v5132_v36  ;;  %v5135_v14 = vpop.f32.mrb[62].mxu1 }
 0x2bc   :  { %v5136_v43 = vpop.f32.mrb[63].mxu1 }
 0x2bd   :  { %v4057_v32 = vadd.f32 %v5134_v31, %v3960_v26  ;;  %v5137_v48 = vadd.f32 %v5136_v43, %v5135_v14 }
 0x2bf   :  { %v4060_v12 = vadd.f32 %v5137_v48, %v3963_v51  ;;  %v7021_v52 = vadd.f32 %v6891_v7, %v4057_v32 }
 0x2c1   :  { %v5218_v8 = vpop.f32.mrb[64].mxu1  ;;  %v7024_v59 = vadd.f32 %v6895_v49, %v4060_v12 }
 0x2c2   :  { %v5219_v1 = vpop.f32.mrb[65].mxu1 }
 0x2c3   :  { %v5220_v2 = vadd.f32 %v5219_v1, %v5218_v8  ;;  %v5221_v33 = vpop.f32.mrb[66].mxu1 }
 0x2c4   :  { %v5222_v55 = vpop.f32.mrb[67].mxu1 }
 0x2c5   :  { %v4195_v9 = vadd.f32 %v5220_v2, %v6898_v46  ;;  %v5223_v53 = vadd.f32 %v5222_v55, %v5221_v33 }
 0x2c7   :  { %v4292_v17 = vadd.f32 %v6908_v62, %v4195_v9  ;;  %v4198_v11 = vadd.f32 %v5223_v53, %v6902_v25 }
 0x2c9   :  { %v4295_v37 = vadd.f32 %v6914_v4, %v4198_v11  ;;  %v5224_v15 = vpop.f32.mrb[68].mxu1  ;;  %v4354_v19 = vmax.f32 %v4292_v17, 0.0 }
 0x2ca   :  { %v5225_v7 = vpop.f32.mrb[69].mxu1 }
 0x2cb   :  { %v4355_v40 = vmax.f32 %v4295_v37, 0.0  ;;  %v5226_v27 = vadd.f32 %v5225_v7, %v5224_v15  ;;  %v5227_v49 = vpop.f32.mrb[70].mxu1 }
 0x2cc   :  { %v5228_v50 = vpop.f32.mrb[71].mxu1 }
 0x2cd   :  { %v4370_v22 = vadd.f32 %v4355_v40, %v4354_v19  ;;  %v4203_v21 = vadd.f32 %v5226_v27, %v6917_v10  ;;  %v5229_v35 = vadd.f32 %v5228_v50, %v5227_v49 }
 0x2cf   :  { %v4300_v46 = vadd.f32 %v6904_v47, %v4203_v21  ;;  %v4206_v24 = vadd.f32 %v5229_v35, %v6920_v5 }
 0x2d1   :  { %v4356_v62 = vmax.f32 %v4300_v46, 0.0  ;;  %v4303_v25 = vadd.f32 %v6910_v58, %v4206_v24  ;;  %v5230_v30 = vpop.f32.mrb[72].mxu1 }
 0x2d2   :  { %v5231_v4 = vpop.f32.mrb[73].mxu1 }
 0x2d3   :  { %v4371_v36 = vadd.f32 %v4370_v22, %v4356_v62  ;;  %v4357_v56 = vmax.f32 %v4303_v25, 0.0  ;;  %v5232_v26 = vadd.f32 %v5231_v4, %v5230_v30  ;;  %v5233_v31 = vpop.f32.mrb[74].mxu1 }
 0x2d4   :  { %v5234_v14 = vpop.f32.mrb[75].mxu1 }
 0x2d5   :  { %v4372_v43 = vadd.f32 %v4371_v36, %v4357_v56  ;;  %v4211_v51 = vadd.f32 %v5232_v26, %v6954_v18  ;;  %v5235_v32 = vadd.f32 %v5234_v14, %v5233_v31 }
 0x2d7   :  { %v4308_v10 = vadd.f32 %v6938_v23, %v4211_v51  ;;  %v4214_v47 = vadd.f32 %v5235_v32, %v6957_v34 }
 0x2d9   :  { %v4358_v48 = vmax.f32 %v4308_v10, 0.0  ;;  %v4311_v5 = vadd.f32 %v6944_v44, %v4214_v47  ;;  %v5236_v12 = vpop.f32.mrb[76].mxu1 }
 0x2da   :  { %v5237_v58 = vpop.f32.mrb[77].mxu1 }
 0x2db   :  { %v4373_v8 = vadd.f32 %v4372_v43, %v4358_v48  ;;  %v4359_v1 = vmax.f32 %v4311_v5, 0.0  ;;  %v5238_v2 = vadd.f32 %v5237_v58, %v5236_v12  ;;  %v5239_v33 = vpop.f32.mrb[78].mxu1 }
 0x2dc   :  { %v5240_v55 = vpop.f32.mrb[79].mxu1 }
 0x2dd   :  { %v4374_v9 = vadd.f32 %v4373_v8, %v4359_v1  ;;  %v4219_v53 = vadd.f32 %v5238_v2, %v6973_v57  ;;  %v5241_v17 = vadd.f32 %v5240_v55, %v5239_v33 }
 0x2df   :  { %v4316_v18 = vadd.f32 %v6931_v54, %v4219_v53  ;;  %v4222_v23 = vadd.f32 %v5241_v17, %v6976_v28 }
 0x2e1   :  { %v4360_v11 = vmax.f32 %v4316_v18, 0.0  ;;  %v4319_v34 = vadd.f32 %v6940_v20, %v4222_v23  ;;  %v5242_v37 = vpop.f32.mrb[80].mxu1 }
 0x2e2   :  { %v5243_v44 = vpop.f32.mrb[81].mxu1 }
 0x2e3   :  { %v4375_v15 = vadd.f32 %v4374_v9, %v4360_v11  ;;  %v4361_v7 = vmax.f32 %v4319_v34, 0.0  ;;  %v5244_v19 = vadd.f32 %v5243_v44, %v5242_v37  ;;  %v5245_v40 = vpop.f32.mrb[82].mxu1 }
 0x2e4   :  { %v5246_v27 = vpop.f32.mrb[83].mxu1 }
 0x2e5   :  { %v4376_v49 = vadd.f32 %v4375_v15, %v4361_v7  ;;  %v4227_v50 = vadd.f32 %v5244_v19, %v6985_v63  ;;  %v5247_v22 = vadd.f32 %v5246_v27, %v5245_v40 }
 0x2e7   :  { %v4324_v57 = vadd.f32 %v6964_v16, %v4227_v50  ;;  %v4230_v54 = vadd.f32 %v5247_v22, %v6992_v45  ;;  %v4377_v58 = vrot.slane %v4376_v49, 4 }
 0x2e9   :  { %v4327_v28 = vadd.f32 %v6970_v61, %v4230_v54  ;;  %v5248_v21 = vpop.f32.mrb[84].mxu1  ;;  %v4362_v20 = vmax.f32 %v4324_v57, 0.0  ;;  %v4378_v17 = vadd.f32 %v4377_v58, %v4376_v49 }
 0x2ea   :  { %v5249_v35 = vpop.f32.mrb[85].mxu1 }
 0x2eb   :  { %v4363_v46 = vmax.f32 %v4327_v28, 0.0  ;;  %v5250_v24 = vadd.f32 %v5249_v35, %v5248_v21  ;;  %v5251_v62 = vpop.f32.mrb[86].mxu1  ;;  %v4379_v23 = vrot.slane %v4378_v17, 2  ;;  %v4974_v35 = vld [vmem:[%s7082_s6] ss:$0 sm:$0xff] }
 0x2ec   :  { %v5252_v25 = vpop.f32.mrb[87].mxu1 }
 0x2ed   :  { %v4383_v30 = vadd.f32 %v4363_v46, %v4362_v20  ;;  %v4235_v4 = vadd.f32 %v5250_v24, %v7001_v60  ;;  %v5253_v36 = vadd.f32 %v5252_v25, %v5251_v62  ;;  %v4380_v44 = vadd.f32 %v4379_v23, %v4378_v17 }
 0x2ef   :  { %v4332_v63 = vadd.f32 %v6960_v41, %v4235_v4  ;;  %v4238_v56 = vadd.f32 %v5253_v36, %v7004_v29  ;;  %v4381_v19 = vrot.slane %v4380_v44, 1 }
 0x2f1   :  { %v4364_v16 = vmax.f32 %v4332_v63, 0.0  ;;  %v4335_v45 = vadd.f32 %v6966_v13, %v4238_v56  ;;  %v5254_v26 = vpop.f32.mrb[88].mxu1  ;;  %v4382_v50 = vadd.f32 %v4381_v19, %v4380_v44 }
 0x2f2   :  { %v5255_v61 = vpop.f32.mrb[89].mxu1 }
 0x2f3   :  { %v4384_v31 = vadd.f32 %v4383_v30, %v4364_v16  ;;  %v4365_v14 = vmax.f32 %v4335_v45, 0.0  ;;  %v5256_v43 = vadd.f32 %v5255_v61, %v5254_v26  ;;  %v5257_v51 = vpop.f32.mrb[90].mxu1  ;;  %v4397_v22 = vmul.f32 0.015625, %v4382_v50 }
 0x2f4   :  { %v5258_v32 = vpop.f32.mrb[91].mxu1 }
 0x2f5   :  { %v4385_v10 = vadd.f32 %v4384_v31, %v4365_v14  ;;  %v4243_v47 = vadd.f32 %v5256_v43, %v7011_v42  ;;  %v5259_v48 = vadd.f32 %v5258_v32, %v5257_v51 }
 0x2f7   :  { %v4340_v60 = vadd.f32 %v6987_v0, %v4243_v47  ;;  %v4246_v41 = vadd.f32 %v5259_v48, %v7014_v6 }
 0x2f9   :  { %v4366_v5 = vmax.f32 %v4340_v60, 0.0  ;;  %v4343_v29 = vadd.f32 %v6994_v38, %v4246_v41  ;;  %v5260_v12 = vpop.f32.mrb[92].mxu1 }
 0x2fa   :  { %v5261_v13 = vpop.f32.mrb[93].mxu1 }
 0x2fb   :  { %v4386_v8 = vadd.f32 %v4385_v10, %v4366_v5  ;;  %v4367_v1 = vmax.f32 %v4343_v29, 0.0  ;;  %v5262_v2 = vadd.f32 %v5261_v13, %v5260_v12  ;;  %v5263_v33 = vpop.f32.mrb[94].mxu1 }
 0x2fc   :  { %v5264_v55 = vpop.f32.mrb[95].mxu1 }
 0x2fd   :  { %v4387_v9 = vadd.f32 %v4386_v8, %v4367_v1  ;;  %v4251_v53 = vadd.f32 %v5262_v2, %v7021_v52  ;;  %v5265_v42 = vadd.f32 %v5264_v55, %v5263_v33 }
 0x2ff   :  { %v4348_v0 = vadd.f32 %v6982_v3, %v4251_v53  ;;  %v4254_v6 = vadd.f32 %v5265_v42, %v7024_v59  ;;  %v4399_v3 = vld [vmem:[%s7083_s7] sm:$0x3]  ;;  %s5791_s7 = scalar_lea.vmem %s4514_s17, 32 }
 0x300   :  { %v4401_v49 = vrot.slane %v4399_v3, 1  ;;  %v4404_v54 = vmul.f32 %v4399_v3, %v4397_v22  ;;  %p5792_p0 = scmp.ne.s32.totalorder %s4514_s17, %s5791_s7  ;;  %p5797_p2 = scmp.lt.s32.totalorder %s5791_s7, %s5791_s7 }
 0x301   :  { %v4368_v18 = vmax.f32 %v4348_v0, 0.0  ;;  %v4351_v38 = vadd.f32 %v6989_v39, %v4254_v6 }
 0x302   :  { %p5798_p3 = por %p5797_p2, %p5796_p1 }
 0x303   :  { %v4388_v11 = vadd.f32 %v4387_v9, %v4368_v18  ;;  %v4369_v34 = vmax.f32 %v4351_v38, 0.0 }
 0x304   :  { %p5799_p4 = pnand %p5798_p3, %p5792_p0 }
 0x305   :  { %v4389_v37 = vadd.f32 %v4388_v11, %v4369_v34 }
 0x307   :  { %v4390_v15 = vrot.slane %v4389_v37, 4 }
 0x309   :  { %v4391_v7 = vadd.f32 %v4390_v15, %v4389_v37 }
 0x30b   :  { %v4392_v40 = vrot.slane %v4391_v7, 2 }
 0x30d   :  { %v4393_v27 = vadd.f32 %v4392_v40, %v4391_v7 }
 0x30f   :  { %v4394_v52 = vrot.slane %v4393_v27, 1 }
 0x311   :  { %v4395_v59 = vadd.f32 %v4394_v52, %v4393_v27 }
 0x313   :  { %v4398_v39 = vmul.f32 0.015625, %v4395_v59 }
 0x315   :  { %v4405_v57 = vmul.f32 %v4401_v49, %v4398_v39 }
 0x317   :  { %v4431_v28 = vrot.slane %v4405_v57, 7 }
 0x319   :  { %v4433_v21 = vsel %vm4432_vm2, %v4431_v28, %v4404_v54 }
 0x31a   :  { %5434 = vmatmul.mubr.f32.vlgmr.msra.gmra.mrb[96].mxu1 %v4433_v21 }
 0x3ed   :  { %v4501_v20 = vpop.f32.mrb[96].mxu1 }
 0x3ee   :  { %v4502_v46 = vadd.f32 %v4974_v35, %v4501_v20  ;;  %v5435_v24 = vpop.f32.mrb[97].mxu1 }
 0x3f0   :  { %4506 = vst.msk [vmem:[#allocation6] sm:$0x3] %vm4505_vm3, %v4502_v46 }
 0x3f1   :  { %5802 = shalt.err (!%p5799_p4)
}
 0x3f2   :  { %s5803_s20 = scalar_lea.hbm %s7084_s8, 32 }
 0x3f3   :  { %p5804_p5 = scmp.ne.s32.totalorder %s7084_s8, %s5803_s20  ;;  %p5807_p6 = scmp.lt.u32.totalorder %s5803_s20, %s7084_s8 }
 0x3f5   :  { %p5809_p7 = pnand %p5807_p6, %p5804_p5 }
 0x3f7   :  { %5812 = shalt.err (!%p5809_p7)
}
 0x3f8   :  { %4516 = dma.vmem_to_hbm [thread:$0]  %s4514_s17, 32, %s7084_s8, [#allocation7]  }
 0x3f9   :  { %5813 = dma.done.wait [#allocation7], 32  }
 0x3fa   :  { %5814 = vsyncadd [#allocation7], 4294967264 }
 0x3fb   :  { %4520 = vsyncpa [#allocation7], 1 }

</bundles_post_ra>
